<compile_context>
chip_gen: v7x
topology: tpu7x:2x2x1
jax: 0.10.0
libtpu: 0.0.40
codegen_flags: <defaults>
</compile_context>

<pallas_src>
import jax
import jax.numpy as jnp
from jax.experimental import pallas as pl
from jax.experimental.pallas import tpu as pltpu

EPS = 1e-5
IN_FEATURES = 28 * 28   # 784  (784 % 8 == 0 -> legal full-array sublane extent)
HIDDEN = 512
OUT_RAW = 10
OUT_PAD = 128           # lane-dense output store; wrapper slices [:, :10]


def _bn_relu(h, gamma, beta):
    """Training-mode BatchNorm1d over the batch axis (one-pass stats) + ReLU.

    h is f32 (MXU accumulator output); statistics stay in f32.
    """
    mean = jnp.mean(h, axis=0, keepdims=True)
    mean_sq = jnp.mean(h * h, axis=0, keepdims=True)
    var = jnp.maximum(mean_sq - mean * mean, 0.0)          # biased variance
    inv = jax.lax.rsqrt(var + EPS)
    out = (h - mean) * (inv * gamma) + beta
    return jnp.maximum(out, 0.0)
    # NOTE: axis-0 reductions run on XLU/VPU; moving them to the otherwise-idle
    # MXU (ones(1,B)/B @ h) is a possible micro-opt, but the kernel is
    # HBM/overhead-bound, so it is deliberately not done here.


def bn_fmnist_mlp_kernel(
    x_ref,            # (B, 784)   f32  (flattened image; cast to bf16 in-kernel)
    w1_ref,           # (784, 512) bf16
    g1_ref, be1_ref,  # (1, 512)   f32
    w2_ref,           # (512, 512) bf16
    g2_ref, be2_ref,  # (1, 512)   f32
    w3_ref,           # (512, 128) bf16 (zero-padded cols 10->128)
    b3_ref,           # (1, 128)   f32  (zero-padded cols)
    out_ref,          # (B, 128)   f32
):
    x = x_ref[...].astype(jnp.bfloat16)

    # Layer 1: Linear(784->512) [bias cancels in BN] + BN + ReLU
    h = jnp.dot(x, w1_ref[...], preferred_element_type=jnp.float32)
    h = _bn_relu(h, g1_ref[...], be1_ref[...])
    # Dropout(p=0.0) is identity.

    # Layer 2: Linear(512->512) [bias cancels in BN] + BN + ReLU
    h = jnp.dot(h.astype(jnp.bfloat16), w2_ref[...],
                preferred_element_type=jnp.float32)
    h = _bn_relu(h, g2_ref[...], be2_ref[...])
    # Dropout(p=0.0) is identity.

    # Output head: Linear(512->10), lane-padded to 128.
    out_ref[...] = jnp.dot(h.astype(jnp.bfloat16), w3_ref[...],
                           preferred_element_type=jnp.float32) + b3_ref[...]


def prepare_kernel_params(params):
    """ONE-TIME weight prep: bf16 cast + head lane padding.

    Call once and cache/reuse the result across forwards; doing this per call
    costs more HBM traffic than the kernel itself moves.
    """
    w1 = params["w1"].astype(jnp.bfloat16)                                  # (784, 512)
    w2 = params["w2"].astype(jnp.bfloat16)                                  # (512, 512)
    w3 = jnp.pad(params["w3"], ((0, 0), (0, OUT_PAD - OUT_RAW))).astype(jnp.bfloat16)
    b3 = jnp.pad(params["b3"], ((0, 0), (0, OUT_PAD - OUT_RAW)))
    return (w1, params["g1"], params["be1"],
            w2, params["g2"], params["be2"],
            w3, b3)


def _vmem_cap_bytes():
    """Usable VMEM budget for this generation (physical capacity - headroom)."""
    try:
        cap = int(pltpu.get_tpu_info().vmem_capacity_bytes)
    except Exception:
        cap = 64 << 20          # conservative fallback (v7x per-TC VMEM)
    return cap - (16 << 20)


@jax.jit
def bn_fmnist_mlp_forward(x, kernel_params):
    """x: (B, 1, 28, 28) f32 (NCHW, like PyTorch); kernel_params from
    prepare_kernel_params. Returns (B, 10) f32 logits."""
    B = x.shape[0]
    x_flat = x.reshape(B, IN_FEATURES)          # nn.Flatten(); no-copy under jit

    args = (x_flat,) + tuple(kernel_params)

    # Every operand is block == full array, single grid point (no pipelining).
    full = lambda a: pl.BlockSpec(a.shape, lambda: (0,) * a.ndim)

    operand_bytes = sum(int(a.size) * a.dtype.itemsize for a in args)
    out_bytes = B * OUT_PAD * 4
    # Single grid point => single-buffered operands; add in-kernel temporaries
    # (bf16 copy of x, a handful of live (B,512) f32 intermediates) + slack.
    temp_bytes = B * IN_FEATURES * 2 + 6 * B * HIDDEN * 4
    vmem_needed = operand_bytes + out_bytes + temp_bytes + (4 << 20)
    vmem_cap = _vmem_cap_bytes()
    vmem_limit = min(max(vmem_needed, 32 << 20), vmem_cap)
    if vmem_needed > vmem_cap:
        # TODO(synk): batch-tiled two-pass-BN grid path (parallel semantics) for
        # batches too large for single-call VMEM residency; the cutoff is
        # generation-dependent (v7x 64 MiB vs v5e/v6e 128 MiB).
        raise ValueError(
            f"batch {B} needs ~{vmem_needed >> 20} MiB VMEM > {vmem_cap >> 20} MiB cap; "
            "use a batch-tiled two-pass-BN path.")

    flops = 2 * B * (IN_FEATURES * HIDDEN + HIDDEN * HIDDEN + HIDDEN * OUT_PAD)

    out = pl.pallas_call(
        bn_fmnist_mlp_kernel,
        out_shape=jax.ShapeDtypeStruct((B, OUT_PAD), jnp.float32),
        in_specs=[full(a) for a in args],
        out_specs=pl.BlockSpec((B, OUT_PAD), lambda: (0, 0)),
        compiler_params=pltpu.CompilerParams(vmem_limit_bytes=int(vmem_limit)),
        cost_estimate=pl.CostEstimate(
            flops=flops,
            transcendentals=2 * HIDDEN,            # rsqrt per BN feature
            bytes_accessed=operand_bytes + out_bytes,
        ),
    )(*args)

    return out[:, :OUT_RAW]


def init_params(key):
    """Deterministic init mimicking PyTorch's default Linear init
    (uniform(-1/sqrt(fan_in), 1/sqrt(fan_in))); BN gamma=1, beta=0.
    b1/b2 are kept here only so the f32 reference can prove they cancel."""
    ks = jax.random.split(key, 6)

    def lin(kw, kb, fan_in, fan_out):
        bound = 1.0 / jnp.sqrt(fan_in)
        w = jax.random.uniform(kw, (fan_in, fan_out), jnp.float32, -bound, bound)
        b = jax.random.uniform(kb, (1, fan_out), jnp.float32, -bound, bound)
        return w, b

    w1, b1 = lin(ks[0], ks[1], IN_FEATURES, HIDDEN)
    w2, b2 = lin(ks[2], ks[3], HIDDEN, HIDDEN)
    w3, b3 = lin(ks[4], ks[5], HIDDEN, OUT_RAW)
    ones = jnp.ones((1, HIDDEN), jnp.float32)
    zeros = jnp.zeros((1, HIDDEN), jnp.float32)
    return {
        "w1": w1, "b1": b1, "g1": ones, "be1": zeros,
        "w2": w2, "b2": b2, "g2": ones, "be2": zeros,
        "w3": w3, "b3": b3,
    }


def _bn_ref(h, g, be):
    m = h.mean(0, keepdims=True)
    v = ((h - m) ** 2).mean(0, keepdims=True)
    return jnp.maximum((h - m) / jnp.sqrt(v + EPS) * g + be, 0.0)


def _reference_forward_f32(x, p):
    """Full-precision reference WITH b1/b2 (demonstrates bias cancellation)."""
    h = x.reshape(x.shape[0], -1)
    h = _bn_ref(h @ p["w1"] + p["b1"], p["g1"], p["be1"])
    h = _bn_ref(h @ p["w2"] + p["b2"], p["g2"], p["be2"])
    return h @ p["w3"] + p["b3"]


def _reference_forward_bf16(x, p):
    """Reference with the same bf16 matmul scheme as the kernel."""
    bf = jnp.bfloat16
    h = x.reshape(x.shape[0], -1).astype(bf)
    h = jnp.dot(h, p["w1"].astype(bf), preferred_element_type=jnp.float32)
    h = _bn_ref(h, p["g1"], p["be1"])
    h = jnp.dot(h.astype(bf), p["w2"].astype(bf), preferred_element_type=jnp.float32)
    h = _bn_ref(h, p["g2"], p["be2"])
    return jnp.dot(h.astype(bf), p["w3"].astype(bf),
                   preferred_element_type=jnp.float32) + p["b3"]


if __name__ == "__main__":
    key = jax.random.PRNGKey(0)
    k_param, k_x = jax.random.split(key)

    params = init_params(k_param)
    # One-time kernel-format weight prep; reuse across every forward call.
    kernel_params = prepare_kernel_params(params)
    kernel_params = jax.block_until_ready(kernel_params)

    # MXU-friendly batch; BN stats are exact over the full batch. For real
    # throughput prefer B >= 512 (kernel is weight-DMA bound at small B).
    B = 128
    x = jax.random.normal(k_x, (B, 1, 28, 28), jnp.float32)

    logits = bn_fmnist_mlp_forward(x, kernel_params)
    logits = jax.block_until_ready(logits)
    assert logits.shape == (B, OUT_RAW)

    ref_bf16 = _reference_forward_bf16(x, params)
    ref_f32 = _reference_forward_f32(x, params)
    assert jnp.allclose(logits, ref_bf16, atol=1e-2, rtol=1e-2), \
        "mismatch vs bf16 reference"
    assert jnp.allclose(logits, ref_f32, atol=5e-2, rtol=5e-2), \
        "mismatch vs f32 reference"

    print("KERNEL_OK")
</pallas_src>

<mosaic_0001>
module attributes {stable_mosaic.version = 11 : i64} {
  func.func @bn_fmnist_mlp_kernel(%arg0: memref<128x784xf32, #tpu.memory_space<vmem>>, %arg1: memref<784x512xbf16, #tpu.memory_space<vmem>>, %arg2: memref<1x512xf32, #tpu.memory_space<vmem>>, %arg3: memref<1x512xf32, #tpu.memory_space<vmem>>, %arg4: memref<512x512xbf16, #tpu.memory_space<vmem>>, %arg5: memref<1x512xf32, #tpu.memory_space<vmem>>, %arg6: memref<1x512xf32, #tpu.memory_space<vmem>>, %arg7: memref<512x128xbf16, #tpu.memory_space<vmem>>, %arg8: memref<1x128xf32, #tpu.memory_space<vmem>>, %arg9: memref<128x128xf32, #tpu.memory_space<vmem>>) attributes {dimension_semantics = [], scalar_prefetch = 0 : i64, scratch_operands = 0 : i64, tpu.core_type = #tpu.core_type<tc>} {
    %c0 = arith.constant 0 : index
    %c0_0 = arith.constant 0 : index
    %0 = vector.load %arg0[%c0, %c0_0] : memref<128x784xf32, #tpu.memory_space<vmem>>, vector<128x784xf32>
    %1 = arith.truncf %0 : vector<128x784xf32> to vector<128x784xbf16>
    %c0_1 = arith.constant 0 : index
    %c0_2 = arith.constant 0 : index
    %2 = vector.load %arg1[%c0_1, %c0_2] : memref<784x512xbf16, #tpu.memory_space<vmem>>, vector<784x512xbf16>
    %cst = arith.constant dense<0.000000e+00> : vector<128x512xf32>
    %3 = tpu.matmul %1, %2, %cst {dimension_numbers = #tpu.dot_dimension_numbers<[1], [0], [0], [1], [0, 0, 1, 1], [], []>} : vector<128x784xbf16>, vector<784x512xbf16>, vector<128x512xf32> -> vector<128x512xf32>
    %c0_3 = arith.constant 0 : index
    %c0_4 = arith.constant 0 : index
    %4 = vector.load %arg2[%c0_3, %c0_4] : memref<1x512xf32, #tpu.memory_space<vmem>>, vector<1x512xf32>
    %c0_5 = arith.constant 0 : index
    %c0_6 = arith.constant 0 : index
    %5 = vector.load %arg3[%c0_5, %c0_6] : memref<1x512xf32, #tpu.memory_space<vmem>>, vector<1x512xf32>
    %cst_7 = arith.constant dense<0.000000e+00> : vector<512xf32>
    %6 = vector.multi_reduction <add>, %3, %cst_7 [0] : vector<128x512xf32> to vector<512xf32>
    %7 = vector.shape_cast %6 : vector<512xf32> to vector<1x512xf32>
    %cst_8 = arith.constant 1.280000e+02 : f32
    %8 = vector.broadcast %cst_8 : f32 to vector<1x512xf32>
    %9 = arith.divf %7, %8 : vector<1x512xf32>
    %10 = arith.mulf %3, %3 : vector<128x512xf32>
    %cst_9 = arith.constant dense<0.000000e+00> : vector<512xf32>
    %11 = vector.multi_reduction <add>, %10, %cst_9 [0] : vector<128x512xf32> to vector<512xf32>
    %12 = vector.shape_cast %11 : vector<512xf32> to vector<1x512xf32>
    %cst_10 = arith.constant 1.280000e+02 : f32
    %13 = vector.broadcast %cst_10 : f32 to vector<1x512xf32>
    %14 = arith.divf %12, %13 : vector<1x512xf32>
    %15 = arith.mulf %9, %9 : vector<1x512xf32>
    %16 = arith.subf %14, %15 : vector<1x512xf32>
    %cst_11 = arith.constant 0.000000e+00 : f32
    %17 = vector.broadcast %cst_11 : f32 to vector<1x512xf32>
    %18 = arith.maximumf %16, %17 : vector<1x512xf32>
    %cst_12 = arith.constant 9.99999974E-6 : f32
    %19 = vector.broadcast %cst_12 : f32 to vector<1x512xf32>
    %20 = arith.addf %18, %19 : vector<1x512xf32>
    %21 = math.rsqrt %20 : vector<1x512xf32>
    %22 = vector.broadcast %9 : vector<1x512xf32> to vector<128x512xf32>
    %23 = arith.subf %3, %22 : vector<128x512xf32>
    %24 = arith.mulf %21, %4 : vector<1x512xf32>
    %25 = vector.broadcast %24 : vector<1x512xf32> to vector<128x512xf32>
    %26 = arith.mulf %23, %25 : vector<128x512xf32>
    %27 = vector.broadcast %5 : vector<1x512xf32> to vector<128x512xf32>
    %28 = arith.addf %26, %27 : vector<128x512xf32>
    %cst_13 = arith.constant 0.000000e+00 : f32
    %29 = vector.broadcast %cst_13 : f32 to vector<128x512xf32>
    %30 = arith.maximumf %28, %29 : vector<128x512xf32>
    %31 = arith.truncf %30 : vector<128x512xf32> to vector<128x512xbf16>
    %c0_14 = arith.constant 0 : index
    %c0_15 = arith.constant 0 : index
    %32 = vector.load %arg4[%c0_14, %c0_15] : memref<512x512xbf16, #tpu.memory_space<vmem>>, vector<512x512xbf16>
    %cst_16 = arith.constant dense<0.000000e+00> : vector<128x512xf32>
    %33 = tpu.matmul %31, %32, %cst_16 {dimension_numbers = #tpu.dot_dimension_numbers<[1], [0], [0], [1], [0, 0, 1, 1], [], []>} : vector<128x512xbf16>, vector<512x512xbf16>, vector<128x512xf32> -> vector<128x512xf32>
    %c0_17 = arith.constant 0 : index
    %c0_18 = arith.constant 0 : index
    %34 = vector.load %arg5[%c0_17, %c0_18] : memref<1x512xf32, #tpu.memory_space<vmem>>, vector<1x512xf32>
    %c0_19 = arith.constant 0 : index
    %c0_20 = arith.constant 0 : index
    %35 = vector.load %arg6[%c0_19, %c0_20] : memref<1x512xf32, #tpu.memory_space<vmem>>, vector<1x512xf32>
    %cst_21 = arith.constant dense<0.000000e+00> : vector<512xf32>
    %36 = vector.multi_reduction <add>, %33, %cst_21 [0] : vector<128x512xf32> to vector<512xf32>
    %37 = vector.shape_cast %36 : vector<512xf32> to vector<1x512xf32>
    %cst_22 = arith.constant 1.280000e+02 : f32
    %38 = vector.broadcast %cst_22 : f32 to vector<1x512xf32>
    %39 = arith.divf %37, %38 : vector<1x512xf32>
    %40 = arith.mulf %33, %33 : vector<128x512xf32>
    %cst_23 = arith.constant dense<0.000000e+00> : vector<512xf32>
    %41 = vector.multi_reduction <add>, %40, %cst_23 [0] : vector<128x512xf32> to vector<512xf32>
    %42 = vector.shape_cast %41 : vector<512xf32> to vector<1x512xf32>
    %cst_24 = arith.constant 1.280000e+02 : f32
    %43 = vector.broadcast %cst_24 : f32 to vector<1x512xf32>
    %44 = arith.divf %42, %43 : vector<1x512xf32>
    %45 = arith.mulf %39, %39 : vector<1x512xf32>
    %46 = arith.subf %44, %45 : vector<1x512xf32>
    %cst_25 = arith.constant 0.000000e+00 : f32
    %47 = vector.broadcast %cst_25 : f32 to vector<1x512xf32>
    %48 = arith.maximumf %46, %47 : vector<1x512xf32>
    %cst_26 = arith.constant 9.99999974E-6 : f32
    %49 = vector.broadcast %cst_26 : f32 to vector<1x512xf32>
    %50 = arith.addf %48, %49 : vector<1x512xf32>
    %51 = math.rsqrt %50 : vector<1x512xf32>
    %52 = vector.broadcast %39 : vector<1x512xf32> to vector<128x512xf32>
    %53 = arith.subf %33, %52 : vector<128x512xf32>
    %54 = arith.mulf %51, %34 : vector<1x512xf32>
    %55 = vector.broadcast %54 : vector<1x512xf32> to vector<128x512xf32>
    %56 = arith.mulf %53, %55 : vector<128x512xf32>
    %57 = vector.broadcast %35 : vector<1x512xf32> to vector<128x512xf32>
    %58 = arith.addf %56, %57 : vector<128x512xf32>
    %cst_27 = arith.constant 0.000000e+00 : f32
    %59 = vector.broadcast %cst_27 : f32 to vector<128x512xf32>
    %60 = arith.maximumf %58, %59 : vector<128x512xf32>
    %61 = arith.truncf %60 : vector<128x512xf32> to vector<128x512xbf16>
    %c0_28 = arith.constant 0 : index
    %c0_29 = arith.constant 0 : index
    %62 = vector.load %arg7[%c0_28, %c0_29] : memref<512x128xbf16, #tpu.memory_space<vmem>>, vector<512x128xbf16>
    %cst_30 = arith.constant dense<0.000000e+00> : vector<128x128xf32>
    %63 = tpu.matmul %61, %62, %cst_30 {dimension_numbers = #tpu.dot_dimension_numbers<[1], [0], [0], [1], [0, 0, 1, 1], [], []>} : vector<128x512xbf16>, vector<512x128xbf16>, vector<128x128xf32> -> vector<128x128xf32>
    %c0_31 = arith.constant 0 : index
    %c0_32 = arith.constant 0 : index
    %64 = vector.load %arg8[%c0_31, %c0_32] : memref<1x128xf32, #tpu.memory_space<vmem>>, vector<1x128xf32>
    %65 = vector.broadcast %64 : vector<1x128xf32> to vector<128x128xf32>
    %66 = arith.addf %63, %65 : vector<128x128xf32>
    %c0_33 = arith.constant 0 : index
    %c0_34 = arith.constant 0 : index
    %67 = vector.load %arg9[%c0_33, %c0_34] : memref<128x128xf32, #tpu.memory_space<vmem>>, vector<128x128xf32>
    tpu.vector_store %arg9[%c0_33, %c0_34], %66 {strides = array<i32>} : memref<128x128xf32, #tpu.memory_space<vmem>>, vector<128x128xf32>,
    return
  }
}

</mosaic_0001>

<bundles_post_ra>
// kernel: bn_fmnist_mlp_forward.1
= control target key start
LH: loop header
LB: loop body
LE: loop exit
PB: predicated region body
PF: predicated region fallthrough
CT: control target
= control target key end

     0   :  { %14 = vsyncpa [#allocation3], 0  ;;  %s9474_s0 = inlined_call_operand.vmem [shape: f32[128,784], index: 0, kind: input, shape index: {}]   ;;  %s9475_s1 = inlined_call_operand.vmem [shape: bf16[784,512], index: 1, kind: input, shape index: {}]   ;;  %s9476_s2 = inlined_call_operand.vmem [shape: f32[1,512], index: 2, kind: input, shape index: {}]   ;;  %s9477_s3 = inlined_call_operand.vmem [shape: f32[1,512], index: 3, kind: input, shape index: {}]   ;;  %s9478_s4 = inlined_call_operand.hbm [shape: bf16[512,512], index: 4, kind: input, shape index: {}]   ;;  %s9479_s5 = inlined_call_operand.vmem [shape: f32[1,512], index: 5, kind: input, shape index: {}]   ;;  %s9480_s6 = inlined_call_operand.vmem [shape: f32[1,512], index: 6, kind: input, shape index: {}]   ;;  %s9481_s7 = inlined_call_operand.hbm [shape: bf16[512,128], index: 7, kind: input, shape index: {}]   ;;  %s9482_s8 = inlined_call_operand.vmem [shape: f32[1,128], index: 8, kind: input, shape index: {}]   ;;  %s9483_s9 = inlined_call_operand.vmem [shape: f32[128,128], index: 9, kind: output, shape index: {}]  }
   0x1   :  { %15 = vsyncpa [#allocation5], 0  ;;  %s6604_s30 = smov [#allocation2]   ;;  %s6556_s13 = scalar_lea.hbm %s9478_s4, 16384 }
   0x2   :  { %s29_s10 = sshll.u32 %s6604_s30, 4  ;;  %p6557_p0 = scmp.ne.s32.totalorder %s9478_s4, %s6556_s13  ;;  %s30_s10 = int_to_ptr.vmem [resolvable:$true] %s29_s10 }
   0x3   :  { %p6560_p1 = scmp.lt.u32.totalorder %s6556_s13, %s9478_s4 }
   0x5   :  { %p6562_p2 = pnand %p6560_p1, %p6557_p0 }
   0x7   :  { %6565 = shalt.err (!%p6562_p2)
}
   0x8   :  { %s6566_s18 = scalar_lea.vmem %s30_s10, 16384  ;;  %p6571_p4 = scmp.lt.s32.totalorder %s30_s10, %s30_s10 }
   0x9   :  { %p6567_p3 = scmp.ne.s32.totalorder %s30_s10, %s6566_s18  ;;  %p6572_p5 = scmp.lt.s32.totalorder %s6566_s18, %s6566_s18 }
   0xb   :  { %p6573_p6 = por %p6572_p5, %p6571_p4 }
   0xd   :  { %p6574_p7 = pnand %p6573_p6, %p6567_p3 }
   0xf   :  { %6577 = shalt.err (!%p6574_p7)
}
  0x10   :  { %s6605_s19 = smov 256   ;;  %s6606_s20 = smov 16  }
  0x11   :  { %35 = dma.hbm_to_vmem [thread:$0]  %s9478_s4, 16384, %s30_s10, [#allocation3], %s6605_s19, %s6605_s19, %s6606_s20  }
  0x12   :  { %s6607_s23 = smov [#allocation4]   ;;  %s6578_s27 = scalar_lea.hbm %s9481_s7, 4096 }
  0x13   :  { %s45_s24 = sshll.u32 %s6607_s23, 4  ;;  %p6579_p8 = scmp.ne.s32.totalorder %s9481_s7, %s6578_s27  ;;  %s46_s24 = int_to_ptr.vmem [resolvable:$true] %s45_s24 }
  0x14   :  { %p6582_p9 = scmp.lt.u32.totalorder %s6578_s27, %s9481_s7 }
  0x16   :  { %p6584_p10 = pnand %p6582_p9, %p6579_p8 }
  0x18   :  { %6587 = shalt.err (!%p6584_p10)
}
  0x19   :  { %s6588_s12 = scalar_lea.vmem %s46_s24, 4096  ;;  %p6593_p12 = scmp.lt.s32.totalorder %s46_s24, %s46_s24 }
  0x1a   :  { %p6589_p11 = scmp.ne.s32.totalorder %s46_s24, %s6588_s12  ;;  %p6594_p13 = scmp.lt.s32.totalorder %s6588_s12, %s6588_s12 }
  0x1c   :  { %p6595_p0 = por %p6594_p13, %p6593_p12 }
  0x1e   :  { %p6596_p1 = pnand %p6595_p0, %p6589_p11 }
  0x20   :  { %6599 = shalt.err (!%p6596_p1)
}
  0x21   :  { %s6608_s4 = smov 64   ;;  %s6609_s10 = smov 4  }
  0x22   :  { %51 = dma.hbm_to_vmem [thread:$0]  %s9481_s7, 4096, %s46_s24, [#allocation5], %s6608_s4, %s6608_s4, %s6609_s10  }
  0x23   :  { %6600 = dma.done.wait [#allocation3], 16384  }
  0x24   :  { %6601 = vsyncadd [#allocation3], 4294950912 }
  0x25   :  { %6602 = dma.done.wait [#allocation5], 4096  }
  0x26   :  { %6603 = vsyncadd [#allocation5], 4294963200  ;;  %v6022_v0 = vld [vmem:[%s9475_s1 + $0x4] ss:$16 sps:$4 sm:$0xff]   ;;  %v6024_v1 = vld [vmem:[%s9475_s1 + $0xc] ss:$16 sps:$4 sm:$0xff]  }
  0x27   :  { %1430 = vmatprep.subr.bf16.mxu0 %v6022_v0  ;;  %v6026_v2 = vld [vmem:[%s9475_s1] ss:$16 sps:$4 sm:$0xff]   ;;  %v6027_v3 = vld [vmem:[%s9475_s1 + $0x8] ss:$16 sps:$4 sm:$0xff]   ;;  %1882 = vmatprep.subr.bf16.mxu1 %v6024_v1  ;;  %v6028_v4 = vld [vmem:[%s9475_s1 + $0x24] ss:$16 sps:$4 sm:$0xff]  }
  0x28   :  { %1431 = vmatpush1.bf16.msra.mxu0 %v6026_v2  ;;  %1883 = vmatpush1.bf16.msra.mxu1 %v6027_v3  ;;  %v6030_v5 = vld [vmem:[%s9475_s1 + $0x2c] ss:$16 sps:$4 sm:$0xff]   ;;  %v6032_v6 = vld [vmem:[%s9475_s1 + $0x20] ss:$16 sps:$4 sm:$0xff]   ;;  %v6033_v7 = vld [vmem:[%s9475_s1 + $0x28] ss:$16 sps:$4 sm:$0xff]  }
  0x29   :  { %1432 = vmatprep.subr.bf16.mxu0 %v6028_v4  ;;  %1884 = vmatprep.subr.bf16.mxu1 %v6030_v5  ;;  %v6034_v8 = vld [vmem:[%s9475_s1 + $0x44] ss:$16 sps:$4 sm:$0xff]   ;;  %v6036_v9 = vld [vmem:[%s9475_s1 + $0x4c] ss:$16 sps:$4 sm:$0xff]   ;;  %v6038_v10 = vld [vmem:[%s9475_s1 + $0x40] ss:$16 sps:$4 sm:$0xff]  }
  0x2a   :  { %v6039_v11 = vld [vmem:[%s9475_s1 + $0x48] ss:$16 sps:$4 sm:$0xff]   ;;  %v6040_v12 = vld [vmem:[%s9475_s1 + $0x64] ss:$16 sps:$4 sm:$0xff]   ;;  %v6042_v13 = vld [vmem:[%s9475_s1 + $0x6c] ss:$16 sps:$4 sm:$0xff]  }
  0x2b   :  { %v6044_v14 = vld [vmem:[%s9475_s1 + $0x60] ss:$16 sps:$4 sm:$0xff]   ;;  %v6045_v15 = vld [vmem:[%s9475_s1 + $0x68] ss:$16 sps:$4 sm:$0xff]   ;;  %v6046_v16 = vld [vmem:[%s9475_s1 + $0x84] ss:$16 sps:$4 sm:$0xff]  }
  0x2c   :  { %1433 = vmatpush1.bf16.msra.mxu0 %v6032_v6  ;;  %1885 = vmatpush1.bf16.msra.mxu1 %v6033_v7  ;;  %v6048_v17 = vld [vmem:[%s9475_s1 + $0x8c] ss:$16 sps:$4 sm:$0xff]   ;;  %v6050_v18 = vld [vmem:[%s9475_s1 + $0x80] ss:$16 sps:$4 sm:$0xff]   ;;  %v6051_v19 = vld [vmem:[%s9475_s1 + $0x88] ss:$16 sps:$4 sm:$0xff]  }
  0x2d   :  { %1434 = vmatprep.subr.bf16.mxu0 %v6034_v8  ;;  %1886 = vmatprep.subr.bf16.mxu1 %v6036_v9  ;;  %v6052_v20 = vld [vmem:[%s9475_s1 + $0xa4] ss:$16 sps:$4 sm:$0xff]   ;;  %v6054_v21 = vld [vmem:[%s9475_s1 + $0xac] ss:$16 sps:$4 sm:$0xff]   ;;  %v6056_v22 = vld [vmem:[%s9475_s1 + $0xa0] ss:$16 sps:$4 sm:$0xff]  }
  0x2e   :  { %v6057_v23 = vld [vmem:[%s9475_s1 + $0xa8] ss:$16 sps:$4 sm:$0xff]   ;;  %v6058_v24 = vld [vmem:[%s9475_s1 + $0xc4] ss:$16 sps:$4 sm:$0xff]   ;;  %v6060_v25 = vld [vmem:[%s9475_s1 + $0xcc] ss:$16 sps:$4 sm:$0xff]  }
  0x2f   :  { %v6062_v26 = vld [vmem:[%s9475_s1 + $0xc0] ss:$16 sps:$4 sm:$0xff]   ;;  %v6063_v27 = vld [vmem:[%s9475_s1 + $0xc8] ss:$16 sps:$4 sm:$0xff]   ;;  %v6064_v28 = vld [vmem:[%s9475_s1 + $0xe4] ss:$16 sps:$4 sm:$0xff]  }
  0x30   :  { %1435 = vmatpush1.bf16.msra.mxu0 %v6038_v10  ;;  %1887 = vmatpush1.bf16.msra.mxu1 %v6039_v11  ;;  %v6066_v29 = vld [vmem:[%s9475_s1 + $0xec] ss:$16 sps:$4 sm:$0xff]   ;;  %v6068_v30 = vld [vmem:[%s9475_s1 + $0xe0] ss:$16 sps:$4 sm:$0xff]   ;;  %v6069_v31 = vld [vmem:[%s9475_s1 + $0xe8] ss:$16 sps:$4 sm:$0xff]  }
  0x31   :  { %1436 = vmatprep.subr.bf16.mxu0 %v6040_v12  ;;  %1888 = vmatprep.subr.bf16.mxu1 %v6042_v13  ;;  %v6070_v32 = vld [vmem:[%s9475_s1 + $0x104] ss:$16 sps:$4 sm:$0xff]   ;;  %v6072_v33 = vld [vmem:[%s9475_s1 + $0x10c] ss:$16 sps:$4 sm:$0xff]   ;;  %v6074_v34 = vld [vmem:[%s9475_s1 + $0x100] ss:$16 sps:$4 sm:$0xff]  }
  0x32   :  { %v6075_v35 = vld [vmem:[%s9475_s1 + $0x108] ss:$16 sps:$4 sm:$0xff]   ;;  %v6076_v36 = vld [vmem:[%s9475_s1 + $0x124] ss:$16 sps:$4 sm:$0xff]   ;;  %v6078_v37 = vld [vmem:[%s9475_s1 + $0x12c] ss:$16 sps:$4 sm:$0xff]  }
  0x33   :  { %v6080_v38 = vld [vmem:[%s9475_s1 + $0x120] ss:$16 sps:$4 sm:$0xff]   ;;  %v6081_v39 = vld [vmem:[%s9475_s1 + $0x128] ss:$16 sps:$4 sm:$0xff]   ;;  %v6082_v40 = vld [vmem:[%s9475_s1 + $0x144] ss:$16 sps:$4 sm:$0xff]  }
  0x34   :  { %1437 = vmatpush1.bf16.msra.mxu0 %v6044_v14  ;;  %1889 = vmatpush1.bf16.msra.mxu1 %v6045_v15  ;;  %v6084_v41 = vld [vmem:[%s9475_s1 + $0x14c] ss:$16 sps:$4 sm:$0xff]   ;;  %v6086_v42 = vld [vmem:[%s9475_s1 + $0x140] ss:$16 sps:$4 sm:$0xff]   ;;  %v6087_v43 = vld [vmem:[%s9475_s1 + $0x148] ss:$16 sps:$4 sm:$0xff]  }
  0x35   :  { %1438 = vmatprep.subr.bf16.mxu0 %v6046_v16  ;;  %1890 = vmatprep.subr.bf16.mxu1 %v6048_v17  ;;  %v6088_v44 = vld [vmem:[%s9475_s1 + $0x164] ss:$16 sps:$4 sm:$0xff]   ;;  %v6090_v45 = vld [vmem:[%s9475_s1 + $0x16c] ss:$16 sps:$4 sm:$0xff]   ;;  %v6092_v47 = vld [vmem:[%s9475_s1 + $0x160] ss:$16 sps:$4 sm:$0xff]  }
  0x36   :  { %v62_v46 = vld [vmem:[%s9474_s0 + $0x8] sm:$0xff]  ;;  %v69_v49 = vld [vmem:[%s9474_s0 + $0x40] sm:$0xff]  ;;  %v68_v4 = vld [vmem:[%s9474_s0 + $0x38] sm:$0xff]  ;;  %vm1405_vm0 = vcmask 130048  }
  0x37   :  { %v6093_v48 = vld [vmem:[%s9475_s1 + $0x168] ss:$16 sps:$4 sm:$0xff]   ;;  %v6094_v50 = vld [vmem:[%s9475_s1 + $0x184] ss:$16 sps:$4 sm:$0xff]   ;;  %v174_v51 = vpack.c.bf16 %v69_v49, %v62_v46  ;;  %v6096_v52 = vld [vmem:[%s9475_s1 + $0x18c] ss:$16 sps:$4 sm:$0xff]  }
  0x38   :  { %1439 = vmatpush1.bf16.msra.mxu0 %v6050_v18  ;;  %1891 = vmatpush1.bf16.msra.mxu1 %v6051_v19  ;;  %v6098_v53 = vld [vmem:[%s9475_s1 + $0x180] ss:$16 sps:$4 sm:$0xff]   ;;  %v6099_v54 = vld [vmem:[%s9475_s1 + $0x188] ss:$16 sps:$4 sm:$0xff]   ;;  %v6100_v55 = vld [vmem:[%s9475_s1 + $0x1a4] ss:$16 sps:$4 sm:$0xff]  }
  0x39   :  { %1440 = vmatprep.subr.bf16.mxu0 %v6052_v20  ;;  %1892 = vmatprep.subr.bf16.mxu1 %v6054_v21  ;;  %v6102_v56 = vld [vmem:[%s9475_s1 + $0x1ac] ss:$16 sps:$4 sm:$0xff]   ;;  %v6104_v57 = vld [vmem:[%s9475_s1 + $0x1a0] ss:$16 sps:$4 sm:$0xff]   ;;  %v6105_v58 = vld [vmem:[%s9475_s1 + $0x1a8] ss:$16 sps:$4 sm:$0xff]  }
  0x3a   :  { %1462 = vmatprep.mubr.bf16.mxu0 %v174_v51  ;;  %1914 = vmatprep.mubr.bf16.mxu1 %v174_v51  ;;  %v6106_v59 = vld [vmem:[%s9475_s1 + $0x1c4] ss:$16 sps:$4 sm:$0xff]   ;;  %v6108_v60 = vld [vmem:[%s9475_s1 + $0x1cc] ss:$16 sps:$4 sm:$0xff]   ;;  %v6110_v61 = vld [vmem:[%s9475_s1 + $0x1c0] ss:$16 sps:$4 sm:$0xff]  }
  0x3b   :  { %v6111_v62 = vld [vmem:[%s9475_s1 + $0x1c8] ss:$16 sps:$4 sm:$0xff]   ;;  %v6112_v63 = vld [vmem:[%s9475_s1 + $0x1e4] ss:$16 sps:$4 sm:$0xff]   ;;  %v6114_v0 = vld [vmem:[%s9475_s1 + $0x1ec] ss:$16 sps:$4 sm:$0xff]  }
  0x3c   :  { %1441 = vmatpush1.bf16.msra.mxu0 %v6056_v22  ;;  %1893 = vmatpush1.bf16.msra.mxu1 %v6057_v23  ;;  %v6116_v1 = vld [vmem:[%s9475_s1 + $0x1e0] ss:$16 sps:$4 sm:$0xff]   ;;  %v6117_v2 = vld [vmem:[%s9475_s1 + $0x1e8] ss:$16 sps:$4 sm:$0xff]   ;;  %v6120_v5 = vld [vmem:[%s9475_s1 + $0x204] ss:$16 sps:$4 sm:$0xff]  }
  0x3d   :  { %1442 = vmatprep.subr.bf16.mxu0 %v6058_v24  ;;  %1894 = vmatprep.subr.bf16.mxu1 %v6060_v25  ;;  %v61_v3 = vld [vmem:[%s9474_s0] sm:$0xff]  ;;  %v6123_v6 = vld [vmem:[%s9475_s1 + $0x20c] ss:$16 sps:$4 sm:$0xff]   ;;  %v6121_v9 = vld [vmem:[%s9475_s1 + $0x208] ss:$16 sps:$4 sm:$0xff]  }
  0x3e   :  { %v6118_v7 = vld [vmem:[%s9475_s1 + $0x200] ss:$16 sps:$4 sm:$0xff]   ;;  %v173_v8 = vpack.c.bf16 %v68_v4, %v61_v3  ;;  %v76_v10 = vld [vmem:[%s9474_s0 + $0x78] sm:$0xff]  ;;  %v6126_v12 = vld [vmem:[%s9475_s1 + $0x224] ss:$16 sps:$4 sm:$0xff]  }
  0x3f   :  { %v83_v11 = vld [vmem:[%s9474_s0 + $0xb0] sm:$0xff]  ;;  %v6129_v13 = vld [vmem:[%s9475_s1 + $0x22c] ss:$16 sps:$4 sm:$0xff]   ;;  %v6127_v16 = vld [vmem:[%s9475_s1 + $0x228] ss:$16 sps:$4 sm:$0xff]  }
  0x40   :  { %1443 = vmatpush1.bf16.msra.mxu0 %v6062_v26  ;;  %1895 = vmatpush1.bf16.msra.mxu1 %v6063_v27  ;;  %v6124_v14 = vld [vmem:[%s9475_s1 + $0x220] ss:$16 sps:$4 sm:$0xff]   ;;  %v181_v15 = vpack.c.bf16 %v83_v11, %v76_v10  ;;  %v82_v18 = vld [vmem:[%s9474_s0 + $0xa8] sm:$0xff]  ;;  %v6132_v19 = vld [vmem:[%s9475_s1 + $0x244] ss:$16 sps:$4 sm:$0xff]  }
  0x41   :  { %1444 = vmatprep.subr.bf16.mxu0 %v6064_v28  ;;  %1896 = vmatprep.subr.bf16.mxu1 %v6066_v29  ;;  %v75_v17 = vld [vmem:[%s9474_s0 + $0x70] sm:$0xff]  ;;  %v6135_v20 = vld [vmem:[%s9475_s1 + $0x24c] ss:$16 sps:$4 sm:$0xff]   ;;  %v6133_v22 = vld [vmem:[%s9475_s1 + $0x248] ss:$16 sps:$4 sm:$0xff]  }
  0x42   :  { %v6130_v21 = vld [vmem:[%s9475_s1 + $0x240] ss:$16 sps:$4 sm:$0xff]   ;;  %v180_v23 = vpack.c.bf16 %v82_v18, %v75_v17  ;;  %v90_v24 = vld [vmem:[%s9474_s0 + $0xe8] sm:$0xff]  ;;  %v6138_v26 = vld [vmem:[%s9475_s1 + $0x264] ss:$16 sps:$4 sm:$0xff]  }
  0x43   :  { %v97_v25 = vld [vmem:[%s9474_s0 + $0x120] sm:$0xff]  ;;  %v6141_v27 = vld [vmem:[%s9475_s1 + $0x26c] ss:$16 sps:$4 sm:$0xff]   ;;  %v6169_v3 = vld [vmem:[%s9475_s1 + $0x308] ss:$16 sps:$4 sm:$0xff]  }
  0x44   :  { %1445 = vmatpush1.bf16.msra.mxu0 %v6068_v30  ;;  %1897 = vmatpush1.bf16.msra.mxu1 %v6069_v31  ;;  %v188_v28 = vpack.c.bf16 %v97_v25, %v90_v24  ;;  %v6136_v29 = vld [vmem:[%s9475_s1 + $0x260] ss:$16 sps:$4 sm:$0xff]   ;;  %v6139_v30 = vld [vmem:[%s9475_s1 + $0x268] ss:$16 sps:$4 sm:$0xff]   ;;  %v6174_v4 = vld [vmem:[%s9475_s1 + $0x324] ss:$16 sps:$4 sm:$0xff]  }
  0x45   :  { %1446 = vmatprep.subr.bf16.mxu0 %v6070_v32  ;;  %1898 = vmatprep.subr.bf16.mxu1 %v6072_v33  ;;  %v89_v31 = vld [vmem:[%s9474_s0 + $0xe0] sm:$0xff]  ;;  %v96_v32 = vld [vmem:[%s9474_s0 + $0x118] sm:$0xff]  ;;  %v110_v46 = vld [vmem:[%s9474_s0 + $0x188] sm:$0xff] }
  0x46   :  { %v6144_v33 = vld [vmem:[%s9475_s1 + $0x284] ss:$16 sps:$4 sm:$0xff]   ;;  %v6154_v49 = vld [vmem:[%s9475_s1 + $0x2c0] ss:$16 sps:$4 sm:$0xff]   ;;  %v118_v51 = vld [vmem:[%s9474_s0 + $0x1c8] sm:$0xff] }
  0x47   :  { %v138_v10 = vld [vmem:[%s9474_s0 + $0x268] sm:$0xff]  ;;  %v6180_v11 = vld [vmem:[%s9475_s1 + $0x344] ss:$16 sps:$4 sm:$0xff]   ;;  %v152_v24 = vld [vmem:[%s9474_s0 + $0x2d8] sm:$0xff] }
  0x48   :  { %1447 = vmatpush1.bf16.msra.mxu0 %v6074_v34  ;;  %1899 = vmatpush1.bf16.msra.mxu1 %v6075_v35  ;;  %v6147_v34 = vld [vmem:[%s9475_s1 + $0x28c] ss:$16 sps:$4 sm:$0xff]   ;;  %v6142_v35 = vld [vmem:[%s9475_s1 + $0x280] ss:$16 sps:$4 sm:$0xff]   ;;  %v6186_v18 = vld [vmem:[%s9475_s1 + $0x364] ss:$16 sps:$4 sm:$0xff]  }
  0x49   :  { %1448 = vmatprep.subr.bf16.mxu0 %v6076_v36  ;;  %1900 = vmatprep.subr.bf16.mxu1 %v6078_v37  ;;  %v6145_v36 = vld [vmem:[%s9475_s1 + $0x288] ss:$16 sps:$4 sm:$0xff]   ;;  %v187_v37 = vpack.c.bf16 %v96_v32, %v89_v31  ;;  %v153_v17 = vld [vmem:[%s9474_s0 + $0x2e0] sm:$0xff]  ;;  %v167_v31 = vld [vmem:[%s9474_s0 + $0x350] sm:$0xff] }
  0x4a   :  { %v6192_v25 = vld [vmem:[%s9475_s1 + $0x384] ss:$16 sps:$4 sm:$0xff]  }
  0x4b   :  { %v6198_v32 = vld [vmem:[%s9475_s1 + $0x3a4] ss:$16 sps:$4 sm:$0xff]  }
  0x4c   :  { %1449 = vmatpush1.bf16.msra.mxu0 %v6080_v38  ;;  %1901 = vmatpush1.bf16.msra.mxu1 %v6081_v39  ;;  %v104_v38 = vld [vmem:[%s9474_s0 + $0x158] sm:$0xff]  ;;  %v111_v39 = vld [vmem:[%s9474_s0 + $0x190] sm:$0xff] }
  0x4d   :  { %1450 = vmatprep.subr.bf16.mxu0 %v6082_v40  ;;  %1902 = vmatprep.subr.bf16.mxu1 %v6084_v41  ;;  %v6150_v40 = vld [vmem:[%s9475_s1 + $0x2a4] ss:$16 sps:$4 sm:$0xff]   ;;  %v6153_v41 = vld [vmem:[%s9475_s1 + $0x2ac] ss:$16 sps:$4 sm:$0xff]  }
  0x50   :  { %1451 = vmatpush1.bf16.msra.mxu0 %v6086_v42  ;;  %1903 = vmatpush1.bf16.msra.mxu1 %v6087_v43  ;;  %v6148_v42 = vld [vmem:[%s9475_s1 + $0x2a0] ss:$16 sps:$4 sm:$0xff]   ;;  %v195_v43 = vpack.c.bf16 %v111_v39, %v104_v38  ;;  %v166_v38 = vld [vmem:[%s9474_s0 + $0x348] sm:$0xff]  ;;  %v6204_v39 = vld [vmem:[%s9475_s1 + $0x3c4] ss:$16 sps:$4 sm:$0xff]  }
  0x51   :  { %1452 = vmatprep.subr.bf16.mxu0 %v6088_v44  ;;  %1904 = vmatprep.subr.bf16.mxu1 %v6090_v45  ;;  %v6151_v44 = vld [vmem:[%s9475_s1 + $0x2a8] ss:$16 sps:$4 sm:$0xff]   ;;  %v103_v45 = vld [vmem:[%s9474_s0 + $0x150] sm:$0xff] }
  0x54   :  { %1453 = vmatpush1.bf16.msra.mxu0 %v6092_v47  ;;  %1905 = vmatpush1.bf16.msra.mxu1 %v6093_v48  ;;  %v6156_v47 = vld [vmem:[%s9475_s1 + $0x2c4] ss:$16 sps:$4 sm:$0xff]   ;;  %v6159_v48 = vld [vmem:[%s9475_s1 + $0x2cc] ss:$16 sps:$4 sm:$0xff]  }
  0x55   :  { %1454 = vmatprep.subr.bf16.mxu0 %v6094_v50  ;;  %1906 = vmatprep.subr.bf16.mxu1 %v6096_v52  ;;  %v194_v50 = vpack.c.bf16 %v110_v46, %v103_v45  ;;  %v125_v52 = vld [vmem:[%s9474_s0 + $0x200] sm:$0xff]  ;;  %v71_v45 = vld [vmem:[%s9474_s0 + $0x50] sm:$0xff] }
  0x56   :  { %v6210_v46 = vld [vmem:[%s9475_s1 + $0x3e4] ss:$16 sps:$4 sm:$0xff]  }
  0x58   :  { %1455 = vmatpush1.bf16.msra.mxu0 %v6098_v53  ;;  %1907 = vmatpush1.bf16.msra.mxu1 %v6099_v54  ;;  %v6157_v53 = vld [vmem:[%s9475_s1 + $0x2c8] ss:$16 sps:$4 sm:$0xff]   ;;  %v6162_v54 = vld [vmem:[%s9475_s1 + $0x2e4] ss:$16 sps:$4 sm:$0xff]  }
  0x59   :  { %1456 = vmatprep.subr.bf16.mxu0 %v6100_v55  ;;  %1908 = vmatprep.subr.bf16.mxu1 %v6102_v56  ;;  %v6165_v55 = vld [vmem:[%s9475_s1 + $0x2ec] ss:$16 sps:$4 sm:$0xff]   ;;  %v6160_v56 = vld [vmem:[%s9475_s1 + $0x2e0] ss:$16 sps:$4 sm:$0xff]  }
  0x5c   :  { %1457 = vmatpush1.bf16.msra.mxu0 %v6104_v57  ;;  %1909 = vmatpush1.bf16.msra.mxu1 %v6105_v58  ;;  %v6163_v57 = vld [vmem:[%s9475_s1 + $0x2e8] ss:$16 sps:$4 sm:$0xff]   ;;  %v202_v58 = vpack.c.bf16 %v125_v52, %v118_v51  ;;  %v63_v51 = vld [vmem:[%s9474_s0 + $0x10] sm:$0xff] }
  0x5d   :  { %1458 = vmatprep.subr.bf16.mxu0 %v6106_v59  ;;  %1910 = vmatprep.subr.bf16.mxu1 %v6108_v60  ;;  %v117_v59 = vld [vmem:[%s9474_s0 + $0x1c0] sm:$0xff]  ;;  %v124_v60 = vld [vmem:[%s9474_s0 + $0x1f8] sm:$0xff]  ;;  %v70_v52 = vld [vmem:[%s9474_s0 + $0x48] sm:$0xff] }
  0x60   :  { %1459 = vmatpush1.bf16.msra.mxu0 %v6110_v61  ;;  %1911 = vmatpush1.bf16.msra.mxu1 %v6111_v62  ;;  %v6168_v61 = vld [vmem:[%s9475_s1 + $0x304] ss:$16 sps:$4 sm:$0xff]   ;;  %v6171_v62 = vld [vmem:[%s9475_s1 + $0x30c] ss:$16 sps:$4 sm:$0xff]  }
  0x61   :  { %1460 = vmatprep.subr.bf16.mxu0 %v6112_v63  ;;  %1912 = vmatprep.subr.bf16.mxu1 %v6114_v0  ;;  %v201_v63 = vpack.c.bf16 %v124_v60, %v117_v59  ;;  %v132_v0 = vld [vmem:[%s9474_s0 + $0x238] sm:$0xff]  ;;  %v6222_v60 = vld [vmem:[%s9475_s1 + $0x424] ss:$16 sps:$4 sm:$0xff]  }
  0x62   :  { %v6217_v59 = vld [vmem:[%s9475_s1 + $0x408] ss:$16 sps:$4 sm:$0xff]  }
  0x64   :  { %1461 = vmatpush1.bf16.msra.mxu0 %v6116_v1  ;;  %1913 = vmatpush1.bf16.msra.mxu1 %v6117_v2  ;;  %v139_v1 = vld [vmem:[%s9474_s0 + $0x270] sm:$0xff] }
  0x65   :  { %1543 = vmatprep.subr.bf16.mxu0 %v6120_v5  ;;  %1995 = vmatprep.subr.bf16.mxu1 %v6123_v6  ;;  %v6166_v2 = vld [vmem:[%s9475_s1 + $0x300] ss:$16 sps:$4 sm:$0xff]   ;;  %v6177_v5 = vld [vmem:[%s9475_s1 + $0x32c] ss:$16 sps:$4 sm:$0xff]  }
  0x66   :  { %v6172_v6 = vld [vmem:[%s9475_s1 + $0x320] ss:$16 sps:$4 sm:$0xff]  }
  0x67   :  { %1463 = vmatmul.mubr.bf16.vlgmr.msra.gmra.mrb[0].mxu0 %v173_v8  ;;  %1915 = vmatmul.mubr.bf16.vlgmr.msra.gmra.mrb[0].mxu1 %v173_v8  ;;  %v209_v8 = vpack.c.bf16 %v139_v1, %v132_v0  ;;  %v77_v1 = vld [vmem:[%s9474_s0 + $0x80] sm:$0xff] }
  0x68   :  { %1544 = vmatpush1.bf16.msra.mxu0 %v6118_v7  ;;  %1996 = vmatpush1.bf16.msra.mxu1 %v6121_v9  ;;  %v6175_v7 = vld [vmem:[%s9475_s1 + $0x328] ss:$16 sps:$4 sm:$0xff]   ;;  %v131_v9 = vld [vmem:[%s9474_s0 + $0x230] sm:$0xff] }
  0x69   :  { %1545 = vmatprep.subr.bf16.mxu0 %v6126_v12  ;;  %1997 = vmatprep.subr.bf16.mxu1 %v6129_v13  ;;  %v6183_v12 = vld [vmem:[%s9475_s1 + $0x34c] ss:$16 sps:$4 sm:$0xff]   ;;  %v6178_v13 = vld [vmem:[%s9475_s1 + $0x340] ss:$16 sps:$4 sm:$0xff]  }
  0x6a   :  { %1472 = vmatprep.mubr.bf16.mxu0 %v181_v15  ;;  %1924 = vmatprep.mubr.bf16.mxu1 %v181_v15  ;;  %v6181_v15 = vld [vmem:[%s9475_s1 + $0x348] ss:$16 sps:$4 sm:$0xff]  }
  0x6c   :  { %1546 = vmatpush1.bf16.msra.mxu0 %v6124_v14  ;;  %1998 = vmatpush1.bf16.msra.mxu1 %v6127_v16  ;;  %v208_v14 = vpack.c.bf16 %v138_v10, %v131_v9  ;;  %v146_v16 = vld [vmem:[%s9474_s0 + $0x2a8] sm:$0xff]  ;;  %v6234_v10 = vld [vmem:[%s9475_s1 + $0x464] ss:$16 sps:$4 sm:$0xff]  }
  0x6d   :  { %1547 = vmatprep.subr.bf16.mxu0 %v6132_v19  ;;  %1999 = vmatprep.subr.bf16.mxu1 %v6135_v20  ;;  %v6189_v19 = vld [vmem:[%s9475_s1 + $0x36c] ss:$16 sps:$4 sm:$0xff]   ;;  %v6184_v20 = vld [vmem:[%s9475_s1 + $0x360] ss:$16 sps:$4 sm:$0xff]   ;;  %v6229_v9 = vld [vmem:[%s9475_s1 + $0x448] ss:$16 sps:$4 sm:$0xff]  }
  0x6f   :  { %1473 = vmatmul.mubr.bf16.gmra.mrb[4].mxu0 %v180_v23  ;;  %1925 = vmatmul.mubr.bf16.gmra.mrb[4].mxu1 %v180_v23  ;;  %v145_v23 = vld [vmem:[%s9474_s0 + $0x2a0] sm:$0xff] }
  0x70   :  { %1548 = vmatpush1.bf16.msra.mxu0 %v6130_v21  ;;  %2000 = vmatpush1.bf16.msra.mxu1 %v6133_v22  ;;  %v216_v21 = vpack.c.bf16 %v153_v17, %v146_v16  ;;  %v6187_v22 = vld [vmem:[%s9475_s1 + $0x368] ss:$16 sps:$4 sm:$0xff]   ;;  %v6240_v17 = vld [vmem:[%s9475_s1 + $0x484] ss:$16 sps:$4 sm:$0xff]  }
  0x71   :  { %1549 = vmatprep.subr.bf16.mxu0 %v6138_v26  ;;  %2001 = vmatprep.subr.bf16.mxu1 %v6141_v27  ;;  %v6195_v26 = vld [vmem:[%s9475_s1 + $0x38c] ss:$16 sps:$4 sm:$0xff]   ;;  %v6190_v27 = vld [vmem:[%s9475_s1 + $0x380] ss:$16 sps:$4 sm:$0xff]  }
  0x72   :  { %1482 = vmatprep.mubr.bf16.mxu0 %v188_v28  ;;  %1934 = vmatprep.mubr.bf16.mxu1 %v188_v28  ;;  %v6193_v28 = vld [vmem:[%s9475_s1 + $0x388] ss:$16 sps:$4 sm:$0xff]  }
  0x73   :  { %v98_v16 = vld [vmem:[%s9474_s0 + $0x128] sm:$0xff] }
  0x74   :  { %1550 = vmatpush1.bf16.msra.mxu0 %v6136_v29  ;;  %2002 = vmatpush1.bf16.msra.mxu1 %v6139_v30  ;;  %v215_v29 = vpack.c.bf16 %v152_v24, %v145_v23  ;;  %v160_v30 = vld [vmem:[%s9474_s0 + $0x318] sm:$0xff]  ;;  %v113_v23 = vld [vmem:[%s9474_s0 + $0x1a0] sm:$0xff] }
  0x75   :  { %1551 = vmatprep.subr.bf16.mxu0 %v6144_v33  ;;  %2003 = vmatprep.subr.bf16.mxu1 %v6147_v34  ;;  %v6201_v33 = vld [vmem:[%s9475_s1 + $0x3ac] ss:$16 sps:$4 sm:$0xff]   ;;  %v223_v34 = vpack.c.bf16 %v167_v31, %v160_v30  ;;  %v6246_v24 = vld [vmem:[%s9475_s1 + $0x4a4] ss:$16 sps:$4 sm:$0xff]  }
  0x76   :  { %v112_v30 = vld [vmem:[%s9474_s0 + $0x198] sm:$0xff]  ;;  %v6252_v31 = vld [vmem:[%s9475_s1 + $0x4c4] ss:$16 sps:$4 sm:$0xff]  }
  0x77   :  { %1483 = vmatmul.mubr.bf16.gmra.mrb[8].mxu0 %v187_v37  ;;  %1935 = vmatmul.mubr.bf16.gmra.mrb[8].mxu1 %v187_v37  ;;  %v159_v37 = vld [vmem:[%s9474_s0 + $0x310] sm:$0xff] }
  0x78   :  { %1552 = vmatpush1.bf16.msra.mxu0 %v6142_v35  ;;  %2004 = vmatpush1.bf16.msra.mxu1 %v6145_v36  ;;  %v6196_v35 = vld [vmem:[%s9475_s1 + $0x3a0] ss:$16 sps:$4 sm:$0xff]   ;;  %v6199_v36 = vld [vmem:[%s9475_s1 + $0x3a8] ss:$16 sps:$4 sm:$0xff]  }
  0x79   :  { %1553 = vmatprep.subr.bf16.mxu0 %v6150_v40  ;;  %2005 = vmatprep.subr.bf16.mxu1 %v6153_v41  ;;  %v6207_v40 = vld [vmem:[%s9475_s1 + $0x3cc] ss:$16 sps:$4 sm:$0xff]   ;;  %v6202_v41 = vld [vmem:[%s9475_s1 + $0x3c0] ss:$16 sps:$4 sm:$0xff]  }
  0x7a   :  { %1492 = vmatprep.mubr.bf16.mxu0 %v195_v43  ;;  %1944 = vmatprep.mubr.bf16.mxu1 %v195_v43  ;;  %v222_v43 = vpack.c.bf16 %v166_v38, %v159_v37  ;;  %v6253_v37 = vld [vmem:[%s9475_s1 + $0x4c8] ss:$16 sps:$4 sm:$0xff]   ;;  %v6258_v38 = vld [vmem:[%s9475_s1 + $0x4e4] ss:$16 sps:$4 sm:$0xff]  }
  0x7c   :  { %1554 = vmatpush1.bf16.msra.mxu0 %v6148_v42  ;;  %2006 = vmatpush1.bf16.msra.mxu1 %v6151_v44  ;;  %v6205_v42 = vld [vmem:[%s9475_s1 + $0x3c8] ss:$16 sps:$4 sm:$0xff]  }
  0x7d   :  { %1555 = vmatprep.subr.bf16.mxu0 %v6156_v47  ;;  %2007 = vmatprep.subr.bf16.mxu1 %v6159_v48  ;;  %v64_v44 = vld [vmem:[%s9474_s0 + $0x18] sm:$0xff]  ;;  %v6208_v48 = vld [vmem:[%s9475_s1 + $0x3e0] ss:$16 sps:$4 sm:$0xff]  }
  0x7e   :  { %v6213_v47 = vld [vmem:[%s9475_s1 + $0x3ec] ss:$16 sps:$4 sm:$0xff]  }
  0x7f   :  { %1493 = vmatmul.mubr.bf16.gmra.mrb[12].mxu0 %v194_v50  ;;  %1945 = vmatmul.mubr.bf16.gmra.mrb[12].mxu1 %v194_v50  ;;  %v6211_v50 = vld [vmem:[%s9475_s1 + $0x3e8] ss:$16 sps:$4 sm:$0xff]  }
  0x80   :  { %1556 = vmatpush1.bf16.msra.mxu0 %v6154_v49  ;;  %2008 = vmatpush1.bf16.msra.mxu1 %v6157_v53  ;;  %v176_v49 = vpack.c.bf16 %v71_v45, %v64_v44  ;;  %v6216_v53 = vld [vmem:[%s9475_s1 + $0x404] ss:$16 sps:$4 sm:$0xff]   ;;  %v126_v44 = vld [vmem:[%s9474_s0 + $0x208] sm:$0xff] }
  0x81   :  { %1557 = vmatprep.subr.bf16.mxu0 %v6162_v54  ;;  %2009 = vmatprep.subr.bf16.mxu1 %v6165_v55  ;;  %v6219_v54 = vld [vmem:[%s9475_s1 + $0x40c] ss:$16 sps:$4 sm:$0xff]   ;;  %v6214_v55 = vld [vmem:[%s9475_s1 + $0x400] ss:$16 sps:$4 sm:$0xff]   ;;  %v6264_v45 = vld [vmem:[%s9475_s1 + $0x504] ss:$16 sps:$4 sm:$0xff]  }
  0x82   :  { %1502 = vmatprep.mubr.bf16.mxu0 %v202_v58  ;;  %1954 = vmatprep.mubr.bf16.mxu1 %v202_v58  ;;  %v85_v58 = vld [vmem:[%s9474_s0 + $0xc0] sm:$0xff] }
  0x84   :  { %1558 = vmatpush1.bf16.msra.mxu0 %v6160_v56  ;;  %2010 = vmatpush1.bf16.msra.mxu1 %v6163_v57  ;;  %v175_v56 = vpack.c.bf16 %v70_v52, %v63_v51  ;;  %v78_v57 = vld [vmem:[%s9474_s0 + $0x88] sm:$0xff]  ;;  %v6270_v52 = vld [vmem:[%s9475_s1 + $0x524] ss:$16 sps:$4 sm:$0xff]  }
  0x85   :  { %1559 = vmatprep.subr.bf16.mxu0 %v6168_v61  ;;  %2011 = vmatprep.subr.bf16.mxu1 %v6171_v62  ;;  %v6225_v61 = vld [vmem:[%s9475_s1 + $0x42c] ss:$16 sps:$4 sm:$0xff]   ;;  %v6220_v62 = vld [vmem:[%s9475_s1 + $0x420] ss:$16 sps:$4 sm:$0xff]   ;;  %v183_v0 = vpack.c.bf16 %v85_v58, %v78_v57  ;;  %v6265_v51 = vld [vmem:[%s9475_s1 + $0x508] ss:$16 sps:$4 sm:$0xff]  }
  0x86   :  { %v133_v57 = vld [vmem:[%s9474_s0 + $0x240] sm:$0xff]  ;;  %v140_v58 = vld [vmem:[%s9474_s0 + $0x278] sm:$0xff] }
  0x87   :  { %1503 = vmatmul.mubr.bf16.gmra.mrb[16].mxu0 %v201_v63  ;;  %1955 = vmatmul.mubr.bf16.gmra.mrb[16].mxu1 %v201_v63  ;;  %v6223_v63 = vld [vmem:[%s9475_s1 + $0x428] ss:$16 sps:$4 sm:$0xff]  }
  0x88   :  { %1560 = vmatpush1.bf16.msra.mxu0 %v6166_v2  ;;  %2012 = vmatpush1.bf16.msra.mxu1 %v6169_v3  ;;  %v84_v2 = vld [vmem:[%s9474_s0 + $0xb8] sm:$0xff]  ;;  %v6228_v3 = vld [vmem:[%s9475_s1 + $0x444] ss:$16 sps:$4 sm:$0xff]  }
  0x89   :  { %1561 = vmatprep.subr.bf16.mxu0 %v6174_v4  ;;  %2013 = vmatprep.subr.bf16.mxu1 %v6177_v5  ;;  %v6231_v4 = vld [vmem:[%s9475_s1 + $0x44c] ss:$16 sps:$4 sm:$0xff]   ;;  %v182_v5 = vpack.c.bf16 %v84_v2, %v77_v1  ;;  %v210_v1 = vpack.c.bf16 %v140_v58, %v133_v57  ;;  %v6282_v2 = vld [vmem:[%s9475_s1 + $0x564] ss:$16 sps:$4 sm:$0xff]  }
  0x8a   :  { %1512 = vmatprep.mubr.bf16.mxu0 %v209_v8  ;;  %1964 = vmatprep.mubr.bf16.mxu1 %v209_v8  ;;  %v6226_v8 = vld [vmem:[%s9475_s1 + $0x440] ss:$16 sps:$4 sm:$0xff]   ;;  %v114_v58 = vld [vmem:[%s9474_s0 + $0x1a8] sm:$0xff] }
  0x8b   :  { %v107_v57 = vld [vmem:[%s9474_s0 + $0x170] sm:$0xff] }
  0x8c   :  { %1562 = vmatpush1.bf16.msra.mxu0 %v6172_v6  ;;  %2014 = vmatpush1.bf16.msra.mxu1 %v6175_v7  ;;  %v92_v6 = vld [vmem:[%s9474_s0 + $0xf8] sm:$0xff]  ;;  %v99_v7 = vld [vmem:[%s9474_s0 + $0x130] sm:$0xff] }
  0x8d   :  { %1563 = vmatprep.subr.bf16.mxu0 %v6180_v11  ;;  %2015 = vmatprep.subr.bf16.mxu1 %v6183_v12  ;;  %v6237_v11 = vld [vmem:[%s9475_s1 + $0x46c] ss:$16 sps:$4 sm:$0xff]   ;;  %v6232_v12 = vld [vmem:[%s9475_s1 + $0x460] ss:$16 sps:$4 sm:$0xff]  }
  0x8f   :  { %1513 = vmatmul.mubr.bf16.gmra.mrb[20].mxu0 %v208_v14  ;;  %1965 = vmatmul.mubr.bf16.gmra.mrb[20].mxu1 %v208_v14  ;;  %v190_v14 = vpack.c.bf16 %v99_v7, %v92_v6  ;;  %v147_v7 = vld [vmem:[%s9474_s0 + $0x2b0] sm:$0xff] }
  0x90   :  { %1564 = vmatpush1.bf16.msra.mxu0 %v6178_v13  ;;  %2016 = vmatpush1.bf16.msra.mxu1 %v6181_v15  ;;  %v6235_v13 = vld [vmem:[%s9475_s1 + $0x468] ss:$16 sps:$4 sm:$0xff]   ;;  %v91_v15 = vld [vmem:[%s9474_s0 + $0xf0] sm:$0xff] }
  0x91   :  { %1565 = vmatprep.subr.bf16.mxu0 %v6186_v18  ;;  %2017 = vmatprep.subr.bf16.mxu1 %v6189_v19  ;;  %v6243_v18 = vld [vmem:[%s9475_s1 + $0x48c] ss:$16 sps:$4 sm:$0xff]   ;;  %v6238_v19 = vld [vmem:[%s9475_s1 + $0x480] ss:$16 sps:$4 sm:$0xff]  }
  0x92   :  { %1522 = vmatprep.mubr.bf16.mxu0 %v216_v21  ;;  %1974 = vmatprep.mubr.bf16.mxu1 %v216_v21  ;;  %v6241_v21 = vld [vmem:[%s9475_s1 + $0x488] ss:$16 sps:$4 sm:$0xff]  }
  0x94   :  { %1566 = vmatpush1.bf16.msra.mxu0 %v6184_v20  ;;  %2018 = vmatpush1.bf16.msra.mxu1 %v6187_v22  ;;  %v189_v20 = vpack.c.bf16 %v98_v16, %v91_v15  ;;  %v106_v22 = vld [vmem:[%s9474_s0 + $0x168] sm:$0xff]  ;;  %v6294_v16 = vld [vmem:[%s9475_s1 + $0x5a4] ss:$16 sps:$4 sm:$0xff]  }
  0x95   :  { %1567 = vmatprep.subr.bf16.mxu0 %v6192_v25  ;;  %2019 = vmatprep.subr.bf16.mxu1 %v6195_v26  ;;  %v6249_v25 = vld [vmem:[%s9475_s1 + $0x4ac] ss:$16 sps:$4 sm:$0xff]   ;;  %v6244_v26 = vld [vmem:[%s9475_s1 + $0x4a0] ss:$16 sps:$4 sm:$0xff]  }
  0x97   :  { %1523 = vmatmul.mubr.bf16.gmra.mrb[24].mxu0 %v215_v29  ;;  %1975 = vmatmul.mubr.bf16.gmra.mrb[24].mxu1 %v215_v29  ;;  %v105_v29 = vld [vmem:[%s9474_s0 + $0x160] sm:$0xff] }
  0x98   :  { %1568 = vmatpush1.bf16.msra.mxu0 %v6190_v27  ;;  %2020 = vmatpush1.bf16.msra.mxu1 %v6193_v28  ;;  %v197_v27 = vpack.c.bf16 %v113_v23, %v106_v22  ;;  %v6247_v28 = vld [vmem:[%s9475_s1 + $0x4a8] ss:$16 sps:$4 sm:$0xff]   ;;  %v6300_v23 = vld [vmem:[%s9475_s1 + $0x5c4] ss:$16 sps:$4 sm:$0xff]  }
  0x99   :  { %1569 = vmatprep.subr.bf16.mxu0 %v6198_v32  ;;  %2021 = vmatprep.subr.bf16.mxu1 %v6201_v33  ;;  %v6255_v32 = vld [vmem:[%s9475_s1 + $0x4cc] ss:$16 sps:$4 sm:$0xff]   ;;  %v196_v33 = vpack.c.bf16 %v112_v30, %v105_v29  ;;  %v6306_v30 = vld [vmem:[%s9475_s1 + $0x5e4] ss:$16 sps:$4 sm:$0xff]  }
  0x9a   :  { %1532 = vmatprep.mubr.bf16.mxu0 %v223_v34  ;;  %1984 = vmatprep.mubr.bf16.mxu1 %v223_v34  ;;  %v120_v34 = vld [vmem:[%s9474_s0 + $0x1d8] sm:$0xff] }
  0x9b   :  { %v168_v22 = vld [vmem:[%s9474_s0 + $0x358] sm:$0xff] }
  0x9c   :  { %1570 = vmatpush1.bf16.msra.mxu0 %v6196_v35  ;;  %2022 = vmatpush1.bf16.msra.mxu1 %v6199_v36  ;;  %v127_v35 = vld [vmem:[%s9474_s0 + $0x210] sm:$0xff] }
  0x9d   :  { %1571 = vmatprep.subr.bf16.mxu0 %v6204_v39  ;;  %2023 = vmatprep.subr.bf16.mxu1 %v6207_v40  ;;  %v6250_v36 = vld [vmem:[%s9475_s1 + $0x4c0] ss:$16 sps:$4 sm:$0xff]   ;;  %v6261_v39 = vld [vmem:[%s9475_s1 + $0x4ec] ss:$16 sps:$4 sm:$0xff]   ;;  %v204_v40 = vpack.c.bf16 %v127_v35, %v120_v34 }
  0x9e   :  { %v65_v35 = vld [vmem:[%s9474_s0 + $0x20] sm:$0xff] }
  0x9f   :  { %1533 = vmatmul.mubr.bf16.gmra.mrb[28].mxu0 %v222_v43  ;;  %1985 = vmatmul.mubr.bf16.gmra.mrb[28].mxu1 %v222_v43  ;;  %v119_v43 = vld [vmem:[%s9474_s0 + $0x1d0] sm:$0xff] }
  0xa0   :  { %1572 = vmatpush1.bf16.msra.mxu0 %v6202_v41  ;;  %2024 = vmatpush1.bf16.msra.mxu1 %v6205_v42  ;;  %v6256_v41 = vld [vmem:[%s9475_s1 + $0x4e0] ss:$16 sps:$4 sm:$0xff]   ;;  %v6259_v42 = vld [vmem:[%s9475_s1 + $0x4e8] ss:$16 sps:$4 sm:$0xff]  }
  0xa1   :  { %1573 = vmatprep.subr.bf16.mxu0 %v6210_v46  ;;  %2025 = vmatprep.subr.bf16.mxu1 %v6213_v47  ;;  %v6267_v46 = vld [vmem:[%s9475_s1 + $0x50c] ss:$16 sps:$4 sm:$0xff]   ;;  %v203_v47 = vpack.c.bf16 %v126_v44, %v119_v43  ;;  %v6313_v43 = vld [vmem:[%s9475_s1 + $0x608] ss:$16 sps:$4 sm:$0xff]  }
  0xa2   :  { %1575 = vmatprep.mubr.bf16.mxu0 %v176_v49  ;;  %2027 = vmatprep.mubr.bf16.mxu1 %v176_v49  ;;  %v141_v49 = vld [vmem:[%s9474_s0 + $0x280] sm:$0xff] }
  0xa4   :  { %1574 = vmatpush1.bf16.msra.mxu0 %v6208_v48  ;;  %2026 = vmatpush1.bf16.msra.mxu1 %v6211_v50  ;;  %v134_v48 = vld [vmem:[%s9474_s0 + $0x248] sm:$0xff]  ;;  %v6262_v50 = vld [vmem:[%s9475_s1 + $0x500] ss:$16 sps:$4 sm:$0xff]  }
  0xa5   :  { %1656 = vmatprep.subr.bf16.mxu0 %v6216_v53  ;;  %2108 = vmatprep.subr.bf16.mxu1 %v6219_v54  ;;  %v6273_v53 = vld [vmem:[%s9475_s1 + $0x52c] ss:$16 sps:$4 sm:$0xff]   ;;  %v211_v54 = vpack.c.bf16 %v141_v49, %v134_v48  ;;  %v101_v48 = vld [vmem:[%s9474_s0 + $0x140] sm:$0xff] }
  0xa7   :  { %1576 = vmatmul.mubr.bf16.vlgmr.msra.gmra.mrb[0].mxu0 %v175_v56  ;;  %2028 = vmatmul.mubr.bf16.vlgmr.msra.gmra.mrb[0].mxu1 %v175_v56  ;;  %v6271_v56 = vld [vmem:[%s9475_s1 + $0x528] ss:$16 sps:$4 sm:$0xff]  }
  0xa8   :  { %1657 = vmatpush1.bf16.msra.mxu0 %v6214_v55  ;;  %2109 = vmatpush1.bf16.msra.mxu1 %v6217_v59  ;;  %v6268_v55 = vld [vmem:[%s9475_s1 + $0x520] ss:$16 sps:$4 sm:$0xff]   ;;  %v6276_v59 = vld [vmem:[%s9475_s1 + $0x544] ss:$16 sps:$4 sm:$0xff]  }
  0xa9   :  { %1658 = vmatprep.subr.bf16.mxu0 %v6222_v60  ;;  %2110 = vmatprep.subr.bf16.mxu1 %v6225_v61  ;;  %v6279_v60 = vld [vmem:[%s9475_s1 + $0x54c] ss:$16 sps:$4 sm:$0xff]   ;;  %v6274_v61 = vld [vmem:[%s9475_s1 + $0x540] ss:$16 sps:$4 sm:$0xff]  }
  0xaa   :  { %1585 = vmatprep.mubr.bf16.mxu0 %v183_v0  ;;  %2037 = vmatprep.mubr.bf16.mxu1 %v183_v0  ;;  %v155_v0 = vld [vmem:[%s9474_s0 + $0x2f0] sm:$0xff] }
  0xac   :  { %1659 = vmatpush1.bf16.msra.mxu0 %v6220_v62  ;;  %2111 = vmatpush1.bf16.msra.mxu1 %v6223_v63  ;;  %v6277_v62 = vld [vmem:[%s9475_s1 + $0x548] ss:$16 sps:$4 sm:$0xff]  }
  0xad   :  { %1660 = vmatprep.subr.bf16.mxu0 %v6228_v3  ;;  %2112 = vmatprep.subr.bf16.mxu1 %v6231_v4  ;;  %v148_v63 = vld [vmem:[%s9474_s0 + $0x2b8] sm:$0xff]  ;;  %v6280_v4 = vld [vmem:[%s9475_s1 + $0x560] ss:$16 sps:$4 sm:$0xff]  }
  0xae   :  { %v6285_v3 = vld [vmem:[%s9475_s1 + $0x56c] ss:$16 sps:$4 sm:$0xff]   ;;  %v218_v6 = vpack.c.bf16 %v155_v0, %v148_v63  ;;  %v121_v63 = vld [vmem:[%s9474_s0 + $0x1e0] sm:$0xff] }
  0xaf   :  { %1586 = vmatmul.mubr.bf16.gmra.mrb[4].mxu0 %v182_v5  ;;  %2038 = vmatmul.mubr.bf16.gmra.mrb[4].mxu1 %v182_v5  ;;  %v6283_v5 = vld [vmem:[%s9475_s1 + $0x568] ss:$16 sps:$4 sm:$0xff]  }
  0xb0   :  { %1661 = vmatpush1.bf16.msra.mxu0 %v6226_v8  ;;  %2113 = vmatpush1.bf16.msra.mxu1 %v6229_v9  ;;  %v154_v8 = vld [vmem:[%s9474_s0 + $0x2e8] sm:$0xff]  ;;  %v6288_v9 = vld [vmem:[%s9475_s1 + $0x584] ss:$16 sps:$4 sm:$0xff]   ;;  %v128_v0 = vld [vmem:[%s9474_s0 + $0x218] sm:$0xff] }
  0xb1   :  { %1662 = vmatprep.subr.bf16.mxu0 %v6234_v10  ;;  %2114 = vmatprep.subr.bf16.mxu1 %v6237_v11  ;;  %v6291_v10 = vld [vmem:[%s9475_s1 + $0x58c] ss:$16 sps:$4 sm:$0xff]   ;;  %v217_v15 = vpack.c.bf16 %v154_v8, %v147_v7  ;;  %v157_v8 = vld [vmem:[%s9474_s0 + $0x300] sm:$0xff] }
  0xb2   :  { %1595 = vmatprep.mubr.bf16.mxu0 %v190_v14  ;;  %2047 = vmatprep.mubr.bf16.mxu1 %v190_v14  ;;  %v162_v11 = vld [vmem:[%s9474_s0 + $0x328] sm:$0xff] }
  0xb3   :  { %v6289_v14 = vld [vmem:[%s9475_s1 + $0x588] ss:$16 sps:$4 sm:$0xff]  }
  0xb4   :  { %1663 = vmatpush1.bf16.msra.mxu0 %v6232_v12  ;;  %2115 = vmatpush1.bf16.msra.mxu1 %v6235_v13  ;;  %v169_v12 = vld [vmem:[%s9474_s0 + $0x360] sm:$0xff]  ;;  %v150_v7 = vld [vmem:[%s9474_s0 + $0x2c8] sm:$0xff] }
  0xb5   :  { %1664 = vmatprep.subr.bf16.mxu0 %v6240_v17  ;;  %2116 = vmatprep.subr.bf16.mxu1 %v6243_v18  ;;  %v6286_v13 = vld [vmem:[%s9475_s1 + $0x580] ss:$16 sps:$4 sm:$0xff]   ;;  %v6297_v17 = vld [vmem:[%s9475_s1 + $0x5ac] ss:$16 sps:$4 sm:$0xff]  }
  0xb6   :  { %v6292_v18 = vld [vmem:[%s9475_s1 + $0x5a0] ss:$16 sps:$4 sm:$0xff]  }
  0xb7   :  { %1596 = vmatmul.mubr.bf16.gmra.mrb[8].mxu0 %v189_v20  ;;  %2048 = vmatmul.mubr.bf16.gmra.mrb[8].mxu1 %v189_v20  ;;  %v225_v20 = vpack.c.bf16 %v169_v12, %v162_v11  ;;  %v149_v11 = vld [vmem:[%s9474_s0 + $0x2c0] sm:$0xff]  ;;  %v156_v12 = vld [vmem:[%s9474_s0 + $0x2f8] sm:$0xff] }
  0xb8   :  { %1665 = vmatpush1.bf16.msra.mxu0 %v6238_v19  ;;  %2117 = vmatpush1.bf16.msra.mxu1 %v6241_v21  ;;  %v6295_v19 = vld [vmem:[%s9475_s1 + $0x5a8] ss:$16 sps:$4 sm:$0xff]   ;;  %v161_v21 = vld [vmem:[%s9474_s0 + $0x320] sm:$0xff] }
  0xb9   :  { %1666 = vmatprep.subr.bf16.mxu0 %v6246_v24  ;;  %2118 = vmatprep.subr.bf16.mxu1 %v6249_v25  ;;  %v6303_v24 = vld [vmem:[%s9475_s1 + $0x5cc] ss:$16 sps:$4 sm:$0xff]   ;;  %v224_v29 = vpack.c.bf16 %v168_v22, %v161_v21  ;;  %v67_v21 = vld [vmem:[%s9474_s0 + $0x30] sm:$0xff] }
  0xba   :  { %1605 = vmatprep.mubr.bf16.mxu0 %v197_v27  ;;  %2057 = vmatprep.mubr.bf16.mxu1 %v197_v27  ;;  %v66_v25 = vld [vmem:[%s9474_s0 + $0x28] sm:$0xff]  ;;  %v6298_v27 = vld [vmem:[%s9475_s1 + $0x5c0] ss:$16 sps:$4 sm:$0xff]  }
  0xbb   :  { %v74_v22 = vld [vmem:[%s9474_s0 + $0x68] sm:$0xff] }
  0xbc   :  { %1667 = vmatpush1.bf16.msra.mxu0 %v6244_v26  ;;  %2119 = vmatpush1.bf16.msra.mxu1 %v6247_v28  ;;  %v73_v26 = vld [vmem:[%s9474_s0 + $0x60] sm:$0xff]  ;;  %v6301_v28 = vld [vmem:[%s9475_s1 + $0x5c8] ss:$16 sps:$4 sm:$0xff]  }
  0xbd   :  { %1668 = vmatprep.subr.bf16.mxu0 %v6252_v31  ;;  %2120 = vmatprep.subr.bf16.mxu1 %v6255_v32  ;;  %v6309_v31 = vld [vmem:[%s9475_s1 + $0x5ec] ss:$16 sps:$4 sm:$0xff]   ;;  %v6304_v32 = vld [vmem:[%s9475_s1 + $0x5e0] ss:$16 sps:$4 sm:$0xff]   ;;  %v178_v34 = vpack.c.bf16 %v73_v26, %v66_v25 }
  0xbe   :  { %v88_v25 = vld [vmem:[%s9474_s0 + $0xd8] sm:$0xff] }
  0xbf   :  { %1606 = vmatmul.mubr.bf16.gmra.mrb[12].mxu0 %v196_v33  ;;  %2058 = vmatmul.mubr.bf16.gmra.mrb[12].mxu1 %v196_v33  ;;  %v6307_v33 = vld [vmem:[%s9475_s1 + $0x5e8] ss:$16 sps:$4 sm:$0xff]  }
  0xc0   :  { %1669 = vmatpush1.bf16.msra.mxu0 %v6250_v36  ;;  %2121 = vmatpush1.bf16.msra.mxu1 %v6253_v37  ;;  %v72_v36 = vld [vmem:[%s9474_s0 + $0x58] sm:$0xff]  ;;  %v6312_v37 = vld [vmem:[%s9475_s1 + $0x604] ss:$16 sps:$4 sm:$0xff]  }
  0xc1   :  { %1670 = vmatprep.subr.bf16.mxu0 %v6258_v38  ;;  %2122 = vmatprep.subr.bf16.mxu1 %v6261_v39  ;;  %v80_v38 = vld [vmem:[%s9474_s0 + $0x98] sm:$0xff]  ;;  %v87_v39 = vld [vmem:[%s9474_s0 + $0xd0] sm:$0xff] }
  0xc2   :  { %1615 = vmatprep.mubr.bf16.mxu0 %v204_v40  ;;  %2067 = vmatprep.mubr.bf16.mxu1 %v204_v40  ;;  %v6315_v40 = vld [vmem:[%s9475_s1 + $0x60c] ss:$16 sps:$4 sm:$0xff]   ;;  %v185_v44 = vpack.c.bf16 %v87_v39, %v80_v38  ;;  %v151_v39 = vld [vmem:[%s9474_s0 + $0x2d0] sm:$0xff] }
  0xc4   :  { %1671 = vmatpush1.bf16.msra.mxu0 %v6256_v41  ;;  %2123 = vmatpush1.bf16.msra.mxu1 %v6259_v42  ;;  %v6310_v41 = vld [vmem:[%s9475_s1 + $0x600] ss:$16 sps:$4 sm:$0xff]   ;;  %v177_v42 = vpack.c.bf16 %v72_v36, %v65_v35 }
  0xc5   :  { %1672 = vmatprep.subr.bf16.mxu0 %v6264_v45  ;;  %2124 = vmatprep.subr.bf16.mxu1 %v6267_v46  ;;  %v79_v45 = vld [vmem:[%s9474_s0 + $0x90] sm:$0xff]  ;;  %v86_v46 = vld [vmem:[%s9474_s0 + $0xc8] sm:$0xff]  ;;  %v137_v36 = vld [vmem:[%s9474_s0 + $0x260] sm:$0xff] }
  0xc6   :  { %v184_v49 = vpack.c.bf16 %v86_v46, %v79_v45  ;;  %v6318_v45 = vld [vmem:[#allocation2 + $0x4] ss:$16 sps:$4 sm:$0xff]   ;;  %v6321_v46 = vld [vmem:[#allocation2 + $0xc] ss:$16 sps:$4 sm:$0xff]  }
  0xc7   :  { %1616 = vmatmul.mubr.bf16.gmra.mrb[16].mxu0 %v203_v47  ;;  %2068 = vmatmul.mubr.bf16.gmra.mrb[16].mxu1 %v203_v47  ;;  %v94_v47 = vld [vmem:[%s9474_s0 + $0x108] sm:$0xff] }
  0xc8   :  { %1673 = vmatpush1.bf16.msra.mxu0 %v6262_v50  ;;  %2125 = vmatpush1.bf16.msra.mxu1 %v6265_v51  ;;  %v192_v50 = vpack.c.bf16 %v101_v48, %v94_v47  ;;  %v93_v51 = vld [vmem:[%s9474_s0 + $0x100] sm:$0xff]  ;;  %v6319_v48 = vld [vmem:[#allocation2 + $0x8] ss:$16 sps:$4 sm:$0xff]  }
  0xc9   :  { %1674 = vmatprep.subr.bf16.mxu0 %v6270_v52  ;;  %2126 = vmatprep.subr.bf16.mxu1 %v6273_v53  ;;  %v100_v52 = vld [vmem:[%s9474_s0 + $0x138] sm:$0xff]  ;;  %v6316_v47 = vld [vmem:[#allocation2] ss:$16 sps:$4 sm:$0xff]  }
  0xca   :  { %1625 = vmatprep.mubr.bf16.mxu0 %v211_v54  ;;  %2077 = vmatprep.mubr.bf16.mxu1 %v211_v54  ;;  %v108_v53 = vld [vmem:[%s9474_s0 + $0x178] sm:$0xff]  ;;  %v115_v54 = vld [vmem:[%s9474_s0 + $0x1b0] sm:$0xff] }
  0xcc   :  { %1675 = vmatpush1.bf16.msra.mxu0 %v6268_v55  ;;  %2127 = vmatpush1.bf16.msra.mxu1 %v6271_v56  ;;  %v191_v55 = vpack.c.bf16 %v100_v52, %v93_v51  ;;  %v199_v56 = vpack.c.bf16 %v115_v54, %v108_v53  ;;  %v6322_v51 = vld [vmem:[#allocation2 + $0x20] ss:$16 sps:$4 sm:$0xff]   ;;  %v6325_v52 = vld [vmem:[#allocation2 + $0x28] ss:$16 sps:$4 sm:$0xff]   ;;  %v6330_v53 = vld [vmem:[#allocation2 + $0x44] ss:$16 sps:$4 sm:$0xff]  }
  0xcd   :  { %1676 = vmatprep.subr.bf16.mxu0 %v6276_v59  ;;  %2128 = vmatprep.subr.bf16.mxu1 %v6279_v60  ;;  %v122_v59 = vld [vmem:[%s9474_s0 + $0x1e8] sm:$0xff]  ;;  %v129_v60 = vld [vmem:[%s9474_s0 + $0x220] sm:$0xff] }
  0xce   :  { %v6333_v54 = vld [vmem:[#allocation2 + $0x4c] ss:$16 sps:$4 sm:$0xff]  }
  0xcf   :  { %1626 = vmatmul.mubr.bf16.gmra.mrb[20].mxu0 %v210_v1  ;;  %2078 = vmatmul.mubr.bf16.gmra.mrb[20].mxu1 %v210_v1  ;;  %v136_v1 = vld [vmem:[%s9474_s0 + $0x258] sm:$0xff] }
  0xd0   :  { %1677 = vmatpush1.bf16.msra.mxu0 %v6274_v61  ;;  %2129 = vmatpush1.bf16.msra.mxu1 %v6277_v62  ;;  %v198_v61 = vpack.c.bf16 %v114_v58, %v107_v57  ;;  %v206_v62 = vpack.c.bf16 %v129_v60, %v122_v59  ;;  %v6336_v57 = vld [vmem:[#allocation2 + $0x64] ss:$16 sps:$4 sm:$0xff]   ;;  %v6339_v58 = vld [vmem:[#allocation2 + $0x6c] ss:$16 sps:$4 sm:$0xff]   ;;  %v6334_v59 = vld [vmem:[#allocation2 + $0x60] ss:$16 sps:$4 sm:$0xff]  }
  0xd1   :  { %1678 = vmatprep.subr.bf16.mxu0 %v6282_v2  ;;  %2130 = vmatprep.subr.bf16.mxu1 %v6285_v3  ;;  %v143_v2 = vld [vmem:[%s9474_s0 + $0x290] sm:$0xff]  ;;  %v205_v3 = vpack.c.bf16 %v128_v0, %v121_v63  ;;  %v6337_v60 = vld [vmem:[#allocation2 + $0x68] ss:$16 sps:$4 sm:$0xff]  }
  0xd2   :  { %1635 = vmatprep.mubr.bf16.mxu0 %v218_v6  ;;  %2087 = vmatprep.mubr.bf16.mxu1 %v218_v6  ;;  %v142_v6 = vld [vmem:[%s9474_s0 + $0x288] sm:$0xff]  ;;  %v6340_v63 = vld [vmem:[#allocation2 + $0x80] ss:$16 sps:$4 sm:$0xff]  }
  0xd3   :  { %v6343_v0 = vld [vmem:[#allocation2 + $0x88] ss:$16 sps:$4 sm:$0xff]  }
  0xd4   :  { %1679 = vmatpush1.bf16.msra.mxu0 %v6280_v4  ;;  %2131 = vmatpush1.bf16.msra.mxu1 %v6283_v5  ;;  %v213_v4 = vpack.c.bf16 %v143_v2, %v136_v1  ;;  %v135_v5 = vld [vmem:[%s9474_s0 + $0x250] sm:$0xff]  ;;  %v6351_v2 = vld [vmem:[#allocation2 + $0xac] ss:$16 sps:$4 sm:$0xff]  }
  0xd5   :  { %1680 = vmatprep.subr.bf16.mxu0 %v6288_v9  ;;  %2132 = vmatprep.subr.bf16.mxu1 %v6291_v10  ;;  %v212_v9 = vpack.c.bf16 %v142_v6, %v135_v5  ;;  %v220_v10 = vpack.c.bf16 %v157_v8, %v150_v7  ;;  %v6348_v1 = vld [vmem:[#allocation2 + $0xa4] ss:$16 sps:$4 sm:$0xff]   ;;  %v6357_v6 = vld [vmem:[#allocation2 + $0xcc] ss:$16 sps:$4 sm:$0xff]   ;;  %v6352_v7 = vld [vmem:[#allocation2 + $0xc0] ss:$16 sps:$4 sm:$0xff]  }
  0xd6   :  { %v6354_v5 = vld [vmem:[#allocation2 + $0xc4] ss:$16 sps:$4 sm:$0xff]   ;;  %v6355_v8 = vld [vmem:[#allocation2 + $0xc8] ss:$16 sps:$4 sm:$0xff]  }
  0xd7   :  { %1636 = vmatmul.mubr.bf16.gmra.mrb[24].mxu0 %v217_v15  ;;  %2088 = vmatmul.mubr.bf16.gmra.mrb[24].mxu1 %v217_v15  ;;  %v219_v15 = vpack.c.bf16 %v156_v12, %v149_v11  ;;  %v6358_v11 = vld [vmem:[#allocation2 + $0xe0] ss:$16 sps:$4 sm:$0xff]   ;;  %v6361_v12 = vld [vmem:[#allocation2 + $0xe8] ss:$16 sps:$4 sm:$0xff]  }
  0xd8   :  { %1681 = vmatpush1.bf16.msra.mxu0 %v6286_v13  ;;  %2133 = vmatpush1.bf16.msra.mxu1 %v6289_v14  ;;  %v164_v13 = vld [vmem:[%s9474_s0 + $0x338] sm:$0xff]  ;;  %v171_v14 = vld [vmem:[%s9474_s0 + $0x370] sm:$0xff] }
  0xd9   :  { %1682 = vmatprep.subr.bf16.mxu0 %v6294_v16  ;;  %2134 = vmatprep.subr.bf16.mxu1 %v6297_v17  ;;  %v227_v16 = vpack.c.bf16 %v171_v14, %v164_v13  ;;  %v163_v17 = vld [vmem:[%s9474_s0 + $0x330] sm:$0xff]  ;;  %v6369_v14 = vld [vmem:[#allocation2 + $0x10c] ss:$16 sps:$4 sm:$0xff]  }
  0xda   :  { %1645 = vmatprep.mubr.bf16.mxu0 %v225_v20  ;;  %2097 = vmatprep.mubr.bf16.mxu1 %v225_v20  ;;  %v6610_v20 = vmov 0   ;;  %v6366_v13 = vld [vmem:[#allocation2 + $0x104] ss:$16 sps:$4 sm:$0xff]  }
  0xdc   :  { %1683 = vmatpush1.bf16.msra.mxu0 %v6292_v18  ;;  %2135 = vmatpush1.bf16.msra.mxu1 %v6295_v19  ;;  %v170_v18 = vld [vmem:[%s9474_s0 + $0x368] sm:$0xff] }
  0xdd   :  { %1684 = vmatprep.subr.bf16.mxu0 %v6300_v23  ;;  %2136 = vmatprep.subr.bf16.mxu1 %v6303_v24  ;;  %v226_v19 = vpack.c.bf16 %v170_v18, %v163_v17  ;;  %v179_v23 = vpack.c.bf16 %v74_v22, %v67_v21  ;;  %v81_v24 = vld [vmem:[%s9474_s0 + $0xa0] sm:$0xff]  ;;  %v6375_v18 = vld [vmem:[#allocation2 + $0x12c] ss:$16 sps:$4 sm:$0xff]  }
  0xde   :  { %v186_v26 = vpack.c.bf16 %v88_v25, %v81_v24  ;;  %v6372_v17 = vld [vmem:[#allocation2 + $0x124] ss:$16 sps:$4 sm:$0xff]   ;;  %v6381_v22 = vld [vmem:[#allocation2 + $0x14c] ss:$16 sps:$4 sm:$0xff]   ;;  %v6379_v24 = vld [vmem:[#allocation2 + $0x148] ss:$16 sps:$4 sm:$0xff]  }
  0xdf   :  { %1646 = vmatmul.mubr.bf16.gmra.mrb[28].mxu0 %v224_v29  ;;  %2098 = vmatmul.mubr.bf16.gmra.mrb[28].mxu1 %v224_v29  ;;  %v6378_v21 = vld [vmem:[#allocation2 + $0x144] ss:$16 sps:$4 sm:$0xff]  }
  0xe0   :  { %1685 = vmatpush1.bf16.msra.mxu0 %v6298_v27  ;;  %2137 = vmatpush1.bf16.msra.mxu1 %v6301_v28  ;;  %v95_v27 = vld [vmem:[%s9474_s0 + $0x110] sm:$0xff]  ;;  %v102_v28 = vld [vmem:[%s9474_s0 + $0x148] sm:$0xff] }
  0xe1   :  { %1686 = vmatprep.subr.bf16.mxu0 %v6306_v30  ;;  %2138 = vmatprep.subr.bf16.mxu1 %v6309_v31  ;;  %v193_v29 = vpack.c.bf16 %v102_v28, %v95_v27  ;;  %v109_v30 = vld [vmem:[%s9474_s0 + $0x180] sm:$0xff]  ;;  %v116_v31 = vld [vmem:[%s9474_s0 + $0x1b8] sm:$0xff] }
  0xe2   :  { %1688 = vmatprep.mubr.bf16.mxu0 %v178_v34  ;;  %2140 = vmatprep.mubr.bf16.mxu1 %v178_v34  ;;  %v130_v34 = vld [vmem:[%s9474_s0 + $0x228] sm:$0xff]  ;;  %v6384_v25 = vld [vmem:[#allocation2 + $0x164] ss:$16 sps:$4 sm:$0xff]   ;;  %v6382_v27 = vld [vmem:[#allocation2 + $0x160] ss:$16 sps:$4 sm:$0xff]  }
  0xe3   :  { %v6385_v28 = vld [vmem:[#allocation2 + $0x168] ss:$16 sps:$4 sm:$0xff]  }
  0xe4   :  { %1687 = vmatpush1.bf16.msra.mxu0 %v6304_v32  ;;  %2139 = vmatpush1.bf16.msra.mxu1 %v6307_v33  ;;  %v200_v32 = vpack.c.bf16 %v116_v31, %v109_v30  ;;  %v123_v33 = vld [vmem:[%s9474_s0 + $0x1f0] sm:$0xff]  ;;  %v6393_v30 = vld [vmem:[#allocation2 + $0x18c] ss:$16 sps:$4 sm:$0xff]  }
  0xe5   :  { %1769 = vmatprep.subr.bf16.mxu0 %v6312_v37  ;;  %2221 = vmatprep.subr.bf16.mxu1 %v6315_v40  ;;  %v207_v35 = vpack.c.bf16 %v130_v34, %v123_v33  ;;  %v144_v37 = vld [vmem:[%s9474_s0 + $0x298] sm:$0xff]  ;;  %v158_v40 = vld [vmem:[%s9474_s0 + $0x308] sm:$0xff]  ;;  %v6388_v31 = vld [vmem:[#allocation2 + $0x180] ss:$16 sps:$4 sm:$0xff]  }
  0xe6   :  { %v214_v38 = vpack.c.bf16 %v144_v37, %v137_v36  ;;  %v6396_v33 = vld [vmem:[#allocation2 + $0x1a4] ss:$16 sps:$4 sm:$0xff]   ;;  %v6399_v34 = vld [vmem:[#allocation2 + $0x1ac] ss:$16 sps:$4 sm:$0xff]   ;;  %v6397_v36 = vld [vmem:[#allocation2 + $0x1a8] ss:$16 sps:$4 sm:$0xff]  }
  0xe7   :  { %1689 = vmatmul.mubr.bf16.vlgmr.msra.gmra.mrb[0].mxu0 %v177_v42  ;;  %2141 = vmatmul.mubr.bf16.vlgmr.msra.gmra.mrb[0].mxu1 %v177_v42  ;;  %v165_v42 = vld [vmem:[%s9474_s0 + $0x340] sm:$0xff] }
  0xe8   :  { %1770 = vmatpush1.bf16.msra.mxu0 %v6310_v41  ;;  %1698 = vmatprep.mubr.bf16.mxu0 %v185_v44  ;;  %v221_v41 = vpack.c.bf16 %v158_v40, %v151_v39  ;;  %v6402_v37 = vld [vmem:[#allocation2 + $0x1c4] ss:$16 sps:$4 sm:$0xff]   ;;  %v6400_v39 = vld [vmem:[#allocation2 + $0x1c0] ss:$16 sps:$4 sm:$0xff]   ;;  %v6403_v40 = vld [vmem:[#allocation2 + $0x1c8] ss:$16 sps:$4 sm:$0xff]  }
  0xe9   :  { %2150 = vmatprep.mubr.bf16.mxu1 %v185_v44  ;;  %2222 = vmatpush1.bf16.msra.mxu1 %v6313_v43  ;;  %v172_v43 = vld [vmem:[%s9474_s0 + $0x378] sm:$0xff] }
  0xea   :  { %v228_v44 = vpack.c.bf16 %v172_v43, %v165_v42  ;;  %3715 = vmatprep.subr.bf16.mxu0 %v6318_v45  ;;  %3941 = vmatprep.subr.bf16.mxu1 %v6321_v46  ;;  %v6411_v42 = vld [vmem:[#allocation2 + $0x1ec] ss:$16 sps:$4 sm:$0xff]   ;;  %v6406_v43 = vld [vmem:[#allocation2 + $0x1e0] ss:$16 sps:$4 sm:$0xff]   ;;  %v6414_v45 = vld [vmem:[#allocation2 + $0x204] ss:$16 sps:$4 sm:$0xff]  }
  0xeb   :  { %v6417_v46 = vld [vmem:[#allocation2 + $0x20c] ss:$16 sps:$4 sm:$0xff]  }
  0xef   :  { %1699 = vmatmul.mubr.bf16.gmra.mrb[4].mxu0 %v184_v49  ;;  %2151 = vmatmul.mubr.bf16.gmra.mrb[4].mxu1 %v184_v49  ;;  %v6324_v49 = vld [vmem:[#allocation2 + $0x24] ss:$16 sps:$4 sm:$0xff]  }
  0xf0   :  { %1708 = vmatprep.mubr.bf16.mxu0 %v192_v50  ;;  %2160 = vmatprep.mubr.bf16.mxu1 %v192_v50  ;;  %v6327_v50 = vld [vmem:[#allocation2 + $0x2c] ss:$16 sps:$4 sm:$0xff]  }
  0xf7   :  { %1709 = vmatmul.mubr.bf16.gmra.mrb[8].mxu0 %v191_v55  ;;  %2161 = vmatmul.mubr.bf16.gmra.mrb[8].mxu1 %v191_v55  ;;  %v6328_v55 = vld [vmem:[#allocation2 + $0x40] ss:$16 sps:$4 sm:$0xff]  }
  0xf8   :  { %1718 = vmatprep.mubr.bf16.mxu0 %v199_v56  ;;  %2170 = vmatprep.mubr.bf16.mxu1 %v199_v56  ;;  %v6331_v56 = vld [vmem:[#allocation2 + $0x48] ss:$16 sps:$4 sm:$0xff]  }
  0xff   :  { %1719 = vmatmul.mubr.bf16.gmra.mrb[12].mxu0 %v198_v61  ;;  %2171 = vmatmul.mubr.bf16.gmra.mrb[12].mxu1 %v198_v61  ;;  %v6342_v61 = vld [vmem:[#allocation2 + $0x84] ss:$16 sps:$4 sm:$0xff]  }
 0x100   :  { %1728 = vmatprep.mubr.bf16.mxu0 %v206_v62  ;;  %2180 = vmatprep.mubr.bf16.mxu1 %v206_v62  ;;  %v6345_v62 = vld [vmem:[#allocation2 + $0x8c] ss:$16 sps:$4 sm:$0xff]  }
 0x107   :  { %1729 = vmatmul.mubr.bf16.gmra.mrb[16].mxu0 %v205_v3  ;;  %2181 = vmatmul.mubr.bf16.gmra.mrb[16].mxu1 %v205_v3  ;;  %v6346_v3 = vld [vmem:[#allocation2 + $0xa0] ss:$16 sps:$4 sm:$0xff]  }
 0x108   :  { %1738 = vmatprep.mubr.bf16.mxu0 %v213_v4  ;;  %2190 = vmatprep.mubr.bf16.mxu1 %v213_v4  ;;  %v6349_v4 = vld [vmem:[#allocation2 + $0xa8] ss:$16 sps:$4 sm:$0xff]  }
 0x10f   :  { %1739 = vmatmul.mubr.bf16.gmra.mrb[20].mxu0 %v212_v9  ;;  %2191 = vmatmul.mubr.bf16.gmra.mrb[20].mxu1 %v212_v9  ;;  %v6360_v9 = vld [vmem:[#allocation2 + $0xe4] ss:$16 sps:$4 sm:$0xff]  }
 0x110   :  { %1748 = vmatprep.mubr.bf16.mxu0 %v220_v10  ;;  %2200 = vmatprep.mubr.bf16.mxu1 %v220_v10  ;;  %v6363_v10 = vld [vmem:[#allocation2 + $0xec] ss:$16 sps:$4 sm:$0xff]  }
 0x117   :  { %1749 = vmatmul.mubr.bf16.gmra.mrb[24].mxu0 %v219_v15  ;;  %2201 = vmatmul.mubr.bf16.gmra.mrb[24].mxu1 %v219_v15  ;;  %v6364_v15 = vld [vmem:[#allocation2 + $0x100] ss:$16 sps:$4 sm:$0xff]  }
 0x118   :  { %1758 = vmatprep.mubr.bf16.mxu0 %v227_v16  ;;  %2210 = vmatprep.mubr.bf16.mxu1 %v227_v16  ;;  %v6367_v16 = vld [vmem:[#allocation2 + $0x108] ss:$16 sps:$4 sm:$0xff]  }
 0x11f   :  { %1759 = vmatmul.mubr.bf16.gmra.mrb[28].mxu0 %v226_v19  ;;  %2211 = vmatmul.mubr.bf16.gmra.mrb[28].mxu1 %v226_v19  ;;  %v6370_v19 = vld [vmem:[#allocation2 + $0x120] ss:$16 sps:$4 sm:$0xff]  }
 0x120   :  { %1801 = vmatprep.mubr.bf16.mxu0 %v6610_v20  ;;  %2253 = vmatprep.mubr.bf16.mxu1 %v6610_v20 }
 0x127   :  { %5454 = vmatmul.mubr.msk.bf16.vlgmr.msra.gmra.mrb[0].mxu0 %vm1405_vm0, %v179_v23  ;;  %5462 = vmatmul.mubr.msk.bf16.vlgmr.msra.gmra.mrb[0].mxu1 %vm1405_vm0, %v179_v23  ;;  %v6376_v23 = vld [vmem:[#allocation2 + $0x140] ss:$16 sps:$4 sm:$0xff]  }
 0x128   :  { %1811 = vmatprep.mubr.bf16.mxu0 %v6610_v20  ;;  %2263 = vmatprep.mubr.bf16.mxu1 %v6610_v20 }
 0x129   :  { %3716 = vmatpush1.bf16.msra.mxu0 %v6316_v47  ;;  %3942 = vmatpush1.bf16.msra.mxu1 %v6319_v48 }
 0x12a   :  { %3717 = vmatprep.subr.bf16.mxu0 %v6324_v49  ;;  %3943 = vmatprep.subr.bf16.mxu1 %v6327_v50 }
 0x12d   :  { %3718 = vmatpush1.bf16.msra.mxu0 %v6322_v51  ;;  %3944 = vmatpush1.bf16.msra.mxu1 %v6325_v52 }
 0x12e   :  { %3719 = vmatprep.subr.bf16.mxu0 %v6330_v53  ;;  %3945 = vmatprep.subr.bf16.mxu1 %v6333_v54 }
 0x12f   :  { %5455 = vmatmul.mubr.msk.bf16.gmra.mrb[4].mxu0 %vm1405_vm0, %v186_v26  ;;  %5463 = vmatmul.mubr.msk.bf16.gmra.mrb[4].mxu1 %vm1405_vm0, %v186_v26  ;;  %v6387_v26 = vld [vmem:[#allocation2 + $0x16c] ss:$16 sps:$4 sm:$0xff]  }
 0x130   :  { %1821 = vmatprep.mubr.bf16.mxu0 %v6610_v20  ;;  %2273 = vmatprep.mubr.bf16.mxu1 %v6610_v20 }
 0x131   :  { %3720 = vmatpush1.bf16.msra.mxu0 %v6328_v55  ;;  %3946 = vmatpush1.bf16.msra.mxu1 %v6331_v56 }
 0x132   :  { %3721 = vmatprep.subr.bf16.mxu0 %v6336_v57  ;;  %3947 = vmatprep.subr.bf16.mxu1 %v6339_v58 }
 0x135   :  { %3722 = vmatpush1.bf16.msra.mxu0 %v6334_v59  ;;  %3948 = vmatpush1.bf16.msra.mxu1 %v6337_v60 }
 0x136   :  { %3723 = vmatprep.subr.bf16.mxu0 %v6342_v61  ;;  %3949 = vmatprep.subr.bf16.mxu1 %v6345_v62 }
 0x137   :  { %5456 = vmatmul.mubr.msk.bf16.gmra.mrb[8].mxu0 %vm1405_vm0, %v193_v29  ;;  %5464 = vmatmul.mubr.msk.bf16.gmra.mrb[8].mxu1 %vm1405_vm0, %v193_v29  ;;  %v6390_v29 = vld [vmem:[#allocation2 + $0x184] ss:$16 sps:$4 sm:$0xff]  }
 0x138   :  { %1831 = vmatprep.mubr.bf16.mxu0 %v6610_v20  ;;  %2283 = vmatprep.mubr.bf16.mxu1 %v6610_v20 }
 0x139   :  { %3724 = vmatpush1.bf16.msra.mxu0 %v6340_v63  ;;  %3950 = vmatpush1.bf16.msra.mxu1 %v6343_v0 }
 0x13a   :  { %3725 = vmatprep.subr.bf16.mxu0 %v6348_v1  ;;  %3951 = vmatprep.subr.bf16.mxu1 %v6351_v2 }
 0x13d   :  { %3726 = vmatpush1.bf16.msra.mxu0 %v6346_v3  ;;  %3952 = vmatpush1.bf16.msra.mxu1 %v6349_v4 }
 0x13e   :  { %3727 = vmatprep.subr.bf16.mxu0 %v6354_v5  ;;  %3953 = vmatprep.subr.bf16.mxu1 %v6357_v6 }
 0x13f   :  { %5457 = vmatmul.mubr.msk.bf16.gmra.mrb[12].mxu0 %vm1405_vm0, %v200_v32  ;;  %5465 = vmatmul.mubr.msk.bf16.gmra.mrb[12].mxu1 %vm1405_vm0, %v200_v32  ;;  %v6391_v32 = vld [vmem:[#allocation2 + $0x188] ss:$16 sps:$4 sm:$0xff]  }
 0x140   :  { %1841 = vmatprep.mubr.bf16.mxu0 %v6610_v20  ;;  %2293 = vmatprep.mubr.bf16.mxu1 %v6610_v20 }
 0x141   :  { %3728 = vmatpush1.bf16.msra.mxu0 %v6352_v7  ;;  %3954 = vmatpush1.bf16.msra.mxu1 %v6355_v8 }
 0x142   :  { %3729 = vmatprep.subr.bf16.mxu0 %v6360_v9  ;;  %3955 = vmatprep.subr.bf16.mxu1 %v6363_v10 }
 0x145   :  { %3730 = vmatpush1.bf16.msra.mxu0 %v6358_v11  ;;  %3956 = vmatpush1.bf16.msra.mxu1 %v6361_v12 }
 0x146   :  { %3731 = vmatprep.subr.bf16.mxu0 %v6366_v13  ;;  %3957 = vmatprep.subr.bf16.mxu1 %v6369_v14 }
 0x147   :  { %5458 = vmatmul.mubr.msk.bf16.gmra.mrb[16].mxu0 %vm1405_vm0, %v207_v35  ;;  %5466 = vmatmul.mubr.msk.bf16.gmra.mrb[16].mxu1 %vm1405_vm0, %v207_v35  ;;  %v6394_v35 = vld [vmem:[#allocation2 + $0x1a0] ss:$16 sps:$4 sm:$0xff]  }
 0x148   :  { %1851 = vmatprep.mubr.bf16.mxu0 %v6610_v20  ;;  %2303 = vmatprep.mubr.bf16.mxu1 %v6610_v20 }
 0x149   :  { %3732 = vmatpush1.bf16.msra.mxu0 %v6364_v15  ;;  %3958 = vmatpush1.bf16.msra.mxu1 %v6367_v16 }
 0x14a   :  { %3733 = vmatprep.subr.bf16.mxu0 %v6372_v17  ;;  %3959 = vmatprep.subr.bf16.mxu1 %v6375_v18 }
 0x14d   :  { %3734 = vmatpush1.bf16.msra.mxu0 %v6370_v19 }
 0x14e   :  { %3735 = vmatprep.subr.bf16.mxu0 %v6378_v21 }
 0x14f   :  { %5459 = vmatmul.mubr.msk.bf16.gmra.mrb[20].mxu0 %vm1405_vm0, %v214_v38  ;;  %5467 = vmatmul.mubr.msk.bf16.gmra.mrb[20].mxu1 %vm1405_vm0, %v214_v38  ;;  %v6405_v38 = vld [vmem:[#allocation2 + $0x1cc] ss:$16 sps:$4 sm:$0xff]  }
 0x150   :  { %1861 = vmatprep.mubr.bf16.mxu0 %v6610_v20  ;;  %2313 = vmatprep.mubr.bf16.mxu1 %v6610_v20 }
 0x151   :  { %3736 = vmatpush1.bf16.msra.mxu0 %v6376_v23 }
 0x152   :  { %3737 = vmatprep.subr.bf16.mxu0 %v6384_v25 }
 0x155   :  { %3738 = vmatpush1.bf16.msra.mxu0 %v6382_v27 }
 0x156   :  { %3739 = vmatprep.subr.bf16.mxu0 %v6390_v29 }
 0x157   :  { %5460 = vmatmul.mubr.msk.bf16.gmra.mrb[24].mxu0 %vm1405_vm0, %v221_v41  ;;  %5468 = vmatmul.mubr.msk.bf16.gmra.mrb[24].mxu1 %vm1405_vm0, %v221_v41  ;;  %v6408_v41 = vld [vmem:[#allocation2 + $0x1e4] ss:$16 sps:$4 sm:$0xff]  }
 0x158   :  { %1871 = vmatprep.mubr.bf16.mxu0 %v6610_v20  ;;  %2323 = vmatprep.mubr.bf16.mxu1 %v6610_v20  ;;  %v6373_v20 = vld [vmem:[#allocation2 + $0x128] ss:$16 sps:$4 sm:$0xff]  }
 0x159   :  { %3960 = vmatpush1.bf16.msra.mxu1 %v6373_v20  ;;  %3740 = vmatpush1.bf16.msra.mxu0 %v6388_v31 }
 0x15a   :  { %3961 = vmatprep.subr.bf16.mxu1 %v6381_v22  ;;  %3741 = vmatprep.subr.bf16.mxu0 %v6396_v33 }
 0x15d   :  { %3962 = vmatpush1.bf16.msra.mxu1 %v6379_v24  ;;  %3742 = vmatpush1.bf16.msra.mxu0 %v6394_v35 }
 0x15e   :  { %3963 = vmatprep.subr.bf16.mxu1 %v6387_v26  ;;  %3743 = vmatprep.subr.bf16.mxu0 %v6402_v37 }
 0x15f   :  { %5461 = vmatmul.mubr.msk.bf16.gmra.mrb[28].mxu0 %vm1405_vm0, %v228_v44  ;;  %5469 = vmatmul.mubr.msk.bf16.gmra.mrb[28].mxu1 %vm1405_vm0, %v228_v44  ;;  %v6409_v44 = vld [vmem:[#allocation2 + $0x1e8] ss:$16 sps:$4 sm:$0xff]  }
 0x161   :  { %3964 = vmatpush1.bf16.msra.mxu1 %v6385_v28  ;;  %3744 = vmatpush1.bf16.msra.mxu0 %v6400_v39 }
 0x162   :  { %3965 = vmatprep.subr.bf16.mxu1 %v6393_v30  ;;  %3745 = vmatprep.subr.bf16.mxu0 %v6408_v41 }
 0x165   :  { %3966 = vmatpush1.bf16.msra.mxu1 %v6391_v32  ;;  %3746 = vmatpush1.bf16.msra.mxu0 %v6406_v43 }
 0x166   :  { %3967 = vmatprep.subr.bf16.mxu1 %v6399_v34  ;;  %3828 = vmatprep.subr.bf16.mxu0 %v6414_v45 }
 0x169   :  { %3968 = vmatpush1.bf16.msra.mxu1 %v6397_v36 }
 0x16a   :  { %3969 = vmatprep.subr.bf16.mxu1 %v6405_v38 }
 0x16d   :  { %3970 = vmatpush1.bf16.msra.mxu1 %v6403_v40 }
 0x16e   :  { %3971 = vmatprep.subr.bf16.mxu1 %v6411_v42 }
 0x171   :  { %3972 = vmatpush1.bf16.msra.mxu1 %v6409_v44 }
 0x172   :  { %4054 = vmatprep.subr.bf16.mxu1 %v6417_v46 }
 0x1fa   :  { %v7625_v47 = vpop.f32.mrb[0].mxu0  ;;  %v7627_v48 = vpop.f32.mrb[0].mxu1 }
 0x1fb   :  { %9635 = vst [vmem:[#allocation8_spill] sm:$0xff] %v7627_v48  ;;  %v7629_v49 = vpop.f32.mrb[1].mxu0  ;;  %v7631_v50 = vpop.f32.mrb[1].mxu1  ;;  %v2425_v51 = vmul.f32 %v7625_v47, %v7625_v47  ;;  %v2427_v52 = vmul.f32 %v7627_v48, %v7627_v48 }
 0x1fc   :  { %9636 = vst [vmem:[#allocation9_spill] sm:$0xff] %v7631_v50  ;;  %v2426_v53 = vmul.f32 %v7629_v49, %v7629_v49  ;;  %v2428_v54 = vmul.f32 %v7631_v50, %v7631_v50  ;;  %v7641_v55 = vpop.f32.mrb[2].mxu0  ;;  %v7643_v56 = vpop.f32.mrb[2].mxu1 }
 0x1fd   :  { %9637 = vst [vmem:[#allocation10_spill] sm:$0xff] %v7643_v56  ;;  %v2336_v57 = vadd.f32 %v7641_v55, %v7625_v47  ;;  %v2429_v58 = vmul.f32 %v7641_v55, %v7641_v55  ;;  %v2378_v59 = vadd.f32 %v7643_v56, %v7627_v48  ;;  %v2431_v60 = vmul.f32 %v7643_v56, %v7643_v56  ;;  %v7653_v61 = vpop.f32.mrb[3].mxu0  ;;  %v7655_v62 = vpop.f32.mrb[3].mxu1 }
 0x1fe   :  { %9638 = vst [vmem:[#allocation11_spill] sm:$0xff] %v7655_v62  ;;  %v2357_v63 = vadd.f32 %v7653_v61, %v7629_v49  ;;  %v2430_v0 = vmul.f32 %v7653_v61, %v7653_v61  ;;  %v2399_v1 = vadd.f32 %v7655_v62, %v7631_v50  ;;  %v2432_v2 = vmul.f32 %v7655_v62, %v7655_v62 }
 0x1ff   :  { %v2489_v3 = vadd.f32 %v2429_v58, %v2425_v51  ;;  %v2531_v4 = vadd.f32 %v2431_v60, %v2427_v52 }
 0x200   :  { %v2510_v5 = vadd.f32 %v2430_v0, %v2426_v53  ;;  %v2552_v6 = vadd.f32 %v2432_v2, %v2428_v54 }
 0x202   :  { %v7665_v7 = vpop.f32.mrb[4].mxu0  ;;  %v7667_v8 = vpop.f32.mrb[4].mxu1 }
 0x203   :  { %9639 = vst [vmem:[#allocation12_spill] sm:$0xff] %v7667_v8  ;;  %v2337_v9 = vadd.f32 %v2336_v57, %v7665_v7  ;;  %v2433_v10 = vmul.f32 %v7665_v7, %v7665_v7  ;;  %v2379_v11 = vadd.f32 %v2378_v59, %v7667_v8  ;;  %v2435_v12 = vmul.f32 %v7667_v8, %v7667_v8  ;;  %v7675_v13 = vpop.f32.mrb[5].mxu0  ;;  %v7677_v14 = vpop.f32.mrb[5].mxu1 }
 0x204   :  { %9640 = vst [vmem:[#allocation13_spill] sm:$0xff] %v7677_v14  ;;  %v2358_v15 = vadd.f32 %v2357_v63, %v7675_v13  ;;  %v2434_v16 = vmul.f32 %v7675_v13, %v7675_v13  ;;  %v2400_v17 = vadd.f32 %v2399_v1, %v7677_v14  ;;  %v2436_v18 = vmul.f32 %v7677_v14, %v7677_v14  ;;  %v7685_v19 = vpop.f32.mrb[6].mxu0  ;;  %v7687_v20 = vpop.f32.mrb[6].mxu1 }
 0x205   :  { %9641 = vst [vmem:[#allocation14_spill] sm:$0xff] %v7687_v20  ;;  %v2490_v21 = vadd.f32 %v2489_v3, %v2433_v10  ;;  %v2532_v22 = vadd.f32 %v2531_v4, %v2435_v12  ;;  %v2338_v23 = vadd.f32 %v2337_v9, %v7685_v19  ;;  %v2437_v24 = vmul.f32 %v7685_v19, %v7685_v19  ;;  %v7692_v25 = vpop.f32.mrb[7].mxu0  ;;  %v7694_v26 = vpop.f32.mrb[7].mxu1 }
 0x206   :  { %9642 = vst [vmem:[#allocation15_spill] sm:$0xff] %v7694_v26  ;;  %v2511_v27 = vadd.f32 %v2510_v5, %v2434_v16  ;;  %v2553_v28 = vadd.f32 %v2552_v6, %v2436_v18  ;;  %v2380_v29 = vadd.f32 %v2379_v11, %v7687_v20  ;;  %v2439_v30 = vmul.f32 %v7687_v20, %v7687_v20 }
 0x207   :  { %v2491_v31 = vadd.f32 %v2490_v21, %v2437_v24  ;;  %v2359_v32 = vadd.f32 %v2358_v15, %v7692_v25  ;;  %v2438_v33 = vmul.f32 %v7692_v25, %v7692_v25  ;;  %v2401_v34 = vadd.f32 %v2400_v17, %v7694_v26 }
 0x208   :  { %v2533_v35 = vadd.f32 %v2532_v22, %v2439_v30  ;;  %v2440_v36 = vmul.f32 %v7694_v26, %v7694_v26 }
 0x209   :  { %v2512_v37 = vadd.f32 %v2511_v27, %v2438_v33 }
 0x20a   :  { %v2554_v38 = vadd.f32 %v2553_v28, %v2440_v36  ;;  %v7705_v39 = vpop.f32.mrb[8].mxu0  ;;  %v7707_v40 = vpop.f32.mrb[8].mxu1 }
 0x20b   :  { %9643 = vst [vmem:[#allocation16_spill] sm:$0xff] %v7707_v40  ;;  %v2339_v41 = vadd.f32 %v2338_v23, %v7705_v39  ;;  %v2441_v42 = vmul.f32 %v7705_v39, %v7705_v39  ;;  %v2381_v43 = vadd.f32 %v2380_v29, %v7707_v40  ;;  %v2443_v44 = vmul.f32 %v7707_v40, %v7707_v40  ;;  %v7715_v45 = vpop.f32.mrb[9].mxu0  ;;  %v7717_v46 = vpop.f32.mrb[9].mxu1 }
 0x20c   :  { %9644 = vst [vmem:[#allocation17_spill] sm:$0xff] %v7717_v46  ;;  %v2360_v51 = vadd.f32 %v2359_v32, %v7715_v45  ;;  %v2442_v52 = vmul.f32 %v7715_v45, %v7715_v45  ;;  %v2402_v53 = vadd.f32 %v2401_v34, %v7717_v46  ;;  %v2444_v54 = vmul.f32 %v7717_v46, %v7717_v46  ;;  %v7725_v57 = vpop.f32.mrb[10].mxu0  ;;  %v7727_v58 = vpop.f32.mrb[10].mxu1 }
 0x20d   :  { %9645 = vst [vmem:[#allocation18_spill] sm:$0xff] %v7727_v58  ;;  %v2492_v59 = vadd.f32 %v2491_v31, %v2441_v42  ;;  %v2534_v60 = vadd.f32 %v2533_v35, %v2443_v44  ;;  %v2340_v63 = vadd.f32 %v2339_v41, %v7725_v57  ;;  %v2445_v0 = vmul.f32 %v7725_v57, %v7725_v57  ;;  %v7732_v1 = vpop.f32.mrb[11].mxu0  ;;  %v7734_v2 = vpop.f32.mrb[11].mxu1 }
 0x20e   :  { %9646 = vst [vmem:[#allocation19_spill] sm:$0xff] %v7734_v2  ;;  %v2513_v3 = vadd.f32 %v2512_v37, %v2442_v52  ;;  %v2555_v4 = vadd.f32 %v2554_v38, %v2444_v54  ;;  %v2382_v5 = vadd.f32 %v2381_v43, %v7727_v58  ;;  %v2447_v6 = vmul.f32 %v7727_v58, %v7727_v58 }
 0x20f   :  { %v2493_v9 = vadd.f32 %v2492_v59, %v2445_v0  ;;  %v2361_v10 = vadd.f32 %v2360_v51, %v7732_v1  ;;  %v2446_v11 = vmul.f32 %v7732_v1, %v7732_v1  ;;  %v2403_v12 = vadd.f32 %v2402_v53, %v7734_v2 }
 0x210   :  { %v2535_v15 = vadd.f32 %v2534_v60, %v2447_v6  ;;  %v2448_v16 = vmul.f32 %v7734_v2, %v7734_v2 }
 0x211   :  { %v2514_v17 = vadd.f32 %v2513_v3, %v2446_v11  ;;  %v2662_v11 = vlaneseq }
 0x212   :  { %v2556_v18 = vadd.f32 %v2555_v4, %v2448_v16  ;;  %v7745_v21 = vpop.f32.mrb[12].mxu0  ;;  %v7747_v22 = vpop.f32.mrb[12].mxu1 }
 0x213   :  { %9647 = vst [vmem:[#allocation20_spill] sm:$0xff] %v7747_v22  ;;  %v2341_v23 = vadd.f32 %v2340_v63, %v7745_v21  ;;  %v2449_v24 = vmul.f32 %v7745_v21, %v7745_v21  ;;  %v2383_v27 = vadd.f32 %v2382_v5, %v7747_v22  ;;  %v2451_v28 = vmul.f32 %v7747_v22, %v7747_v22  ;;  %v7755_v29 = vpop.f32.mrb[13].mxu0  ;;  %v7757_v30 = vpop.f32.mrb[13].mxu1 }
 0x214   :  { %9648 = vst [vmem:[#allocation21_spill] sm:$0xff] %v7757_v30  ;;  %v2362_v31 = vadd.f32 %v2361_v10, %v7755_v29  ;;  %v2450_v32 = vmul.f32 %v7755_v29, %v7755_v29  ;;  %v2404_v33 = vadd.f32 %v2403_v12, %v7757_v30  ;;  %v2452_v34 = vmul.f32 %v7757_v30, %v7757_v30  ;;  %v7765_v35 = vpop.f32.mrb[14].mxu0  ;;  %v7767_v36 = vpop.f32.mrb[14].mxu1 }
 0x215   :  { %9649 = vst [vmem:[#allocation22_spill] sm:$0xff] %v7767_v36  ;;  %v2494_v37 = vadd.f32 %v2493_v9, %v2449_v24  ;;  %v2536_v38 = vadd.f32 %v2535_v15, %v2451_v28  ;;  %v2342_v41 = vadd.f32 %v2341_v23, %v7765_v35  ;;  %v2453_v42 = vmul.f32 %v7765_v35, %v7765_v35  ;;  %v7772_v43 = vpop.f32.mrb[15].mxu0  ;;  %v7774_v44 = vpop.f32.mrb[15].mxu1 }
 0x216   :  { %9650 = vst [vmem:[#allocation23_spill] sm:$0xff] %v7774_v44  ;;  %v2515_v51 = vadd.f32 %v2514_v17, %v2450_v32  ;;  %v2557_v52 = vadd.f32 %v2556_v18, %v2452_v34  ;;  %v2384_v53 = vadd.f32 %v2383_v27, %v7767_v36  ;;  %v2455_v54 = vmul.f32 %v7767_v36, %v7767_v36 }
 0x217   :  { %v2495_v59 = vadd.f32 %v2494_v37, %v2453_v42  ;;  %v2363_v60 = vadd.f32 %v2362_v31, %v7772_v43  ;;  %v2454_v63 = vmul.f32 %v7772_v43, %v7772_v43  ;;  %v2405_v0 = vadd.f32 %v2404_v33, %v7774_v44 }
 0x218   :  { %v2537_v3 = vadd.f32 %v2536_v38, %v2455_v54  ;;  %v2456_v4 = vmul.f32 %v7774_v44, %v7774_v44 }
 0x219   :  { %v2516_v5 = vadd.f32 %v2515_v51, %v2454_v63 }
 0x21a   :  { %v2558_v6 = vadd.f32 %v2557_v52, %v2456_v4  ;;  %v7785_v9 = vpop.f32.mrb[16].mxu0  ;;  %v7787_v10 = vpop.f32.mrb[16].mxu1 }
 0x21b   :  { %9651 = vst [vmem:[#allocation24_spill] sm:$0xff] %v7787_v10  ;;  %v2343_v12 = vadd.f32 %v2342_v41, %v7785_v9  ;;  %v2457_v15 = vmul.f32 %v7785_v9, %v7785_v9  ;;  %v2385_v16 = vadd.f32 %v2384_v53, %v7787_v10  ;;  %v2459_v17 = vmul.f32 %v7787_v10, %v7787_v10  ;;  %v7795_v18 = vpop.f32.mrb[17].mxu0  ;;  %v7797_v23 = vpop.f32.mrb[17].mxu1 }
 0x21c   :  { %9652 = vst [vmem:[#allocation25_spill] sm:$0xff] %v7797_v23  ;;  %v2364_v24 = vadd.f32 %v2363_v60, %v7795_v18  ;;  %v2458_v27 = vmul.f32 %v7795_v18, %v7795_v18  ;;  %v2406_v28 = vadd.f32 %v2405_v0, %v7797_v23  ;;  %v2460_v31 = vmul.f32 %v7797_v23, %v7797_v23  ;;  %v7805_v32 = vpop.f32.mrb[18].mxu0  ;;  %v7807_v33 = vpop.f32.mrb[18].mxu1 }
 0x21d   :  { %9653 = vst [vmem:[#allocation26_spill] sm:$0xff] %v7807_v33  ;;  %v2496_v34 = vadd.f32 %v2495_v59, %v2457_v15  ;;  %v2538_v37 = vadd.f32 %v2537_v3, %v2459_v17  ;;  %v2344_v38 = vadd.f32 %v2343_v12, %v7805_v32  ;;  %v2461_v41 = vmul.f32 %v7805_v32, %v7805_v32  ;;  %v7812_v42 = vpop.f32.mrb[19].mxu0  ;;  %v7814_v51 = vpop.f32.mrb[19].mxu1 }
 0x21e   :  { %9654 = vst [vmem:[#allocation27_spill] sm:$0xff] %v7814_v51  ;;  %v2517_v52 = vadd.f32 %v2516_v5, %v2458_v27  ;;  %v2559_v53 = vadd.f32 %v2558_v6, %v2460_v31  ;;  %v2386_v54 = vadd.f32 %v2385_v16, %v7807_v33  ;;  %v2463_v60 = vmul.f32 %v7807_v33, %v7807_v33 }
 0x21f   :  { %v2497_v63 = vadd.f32 %v2496_v34, %v2461_v41  ;;  %v2365_v59 = vadd.f32 %v2364_v24, %v7812_v42  ;;  %v2462_v0 = vmul.f32 %v7812_v42, %v7812_v42  ;;  %v2407_v3 = vadd.f32 %v2406_v28, %v7814_v51 }
 0x220   :  { %v2539_v4 = vadd.f32 %v2538_v37, %v2463_v60  ;;  %v2464_v12 = vmul.f32 %v7814_v51, %v7814_v51  ;;  %v2663_v17 = vshrl.u32 %v2662_v11, 7 }
 0x221   :  { %v2518_v15 = vadd.f32 %v2517_v52, %v2462_v0 }
 0x222   :  { %v2560_v5 = vadd.f32 %v2559_v53, %v2464_v12  ;;  %v7825_v6 = vpop.f32.mrb[20].mxu0  ;;  %v7827_v16 = vpop.f32.mrb[20].mxu1 }
 0x223   :  { %9655 = vst [vmem:[#allocation28_spill] sm:$0xff] %v7827_v16  ;;  %v2345_v27 = vadd.f32 %v2344_v38, %v7825_v6  ;;  %v2465_v24 = vmul.f32 %v7825_v6, %v7825_v6  ;;  %v2387_v31 = vadd.f32 %v2386_v54, %v7827_v16  ;;  %v2467_v28 = vmul.f32 %v7827_v16, %v7827_v16  ;;  %v7835_v34 = vpop.f32.mrb[21].mxu0  ;;  %v7837_v37 = vpop.f32.mrb[21].mxu1 }
 0x224   :  { %9656 = vst [vmem:[#allocation29_spill] sm:$0xff] %v7837_v37  ;;  %v2366_v41 = vadd.f32 %v2365_v59, %v7835_v34  ;;  %v2466_v52 = vmul.f32 %v7835_v34, %v7835_v34  ;;  %v2408_v11 = vadd.f32 %v2407_v3, %v7837_v37  ;;  %v2468_v38 = vmul.f32 %v7837_v37, %v7837_v37  ;;  %v7845_v53 = vpop.f32.mrb[22].mxu0  ;;  %v7847_v54 = vpop.f32.mrb[22].mxu1 }
 0x225   :  { %9657 = vst [vmem:[#allocation30_spill] sm:$0xff] %v7847_v54  ;;  %v2498_v60 = vadd.f32 %v2497_v63, %v2465_v24  ;;  %v2540_v0 = vadd.f32 %v2539_v4, %v2467_v28  ;;  %v2346_v12 = vadd.f32 %v2345_v27, %v7845_v53  ;;  %v2469_v16 = vmul.f32 %v7845_v53, %v7845_v53  ;;  %v7852_v59 = vpop.f32.mrb[23].mxu0  ;;  %v7854_v33 = vpop.f32.mrb[23].mxu1 }
 0x226   :  { %9658 = vst [vmem:[#allocation31_spill] sm:$0xff] %v7854_v33  ;;  %v2519_v10 = vadd.f32 %v2518_v15, %v2466_v52  ;;  %v2561_v3 = vadd.f32 %v2560_v5, %v2468_v38  ;;  %v2388_v51 = vadd.f32 %v2387_v31, %v7847_v54  ;;  %v2471_v37 = vmul.f32 %v7847_v54, %v7847_v54 }
 0x227   :  { %v2499_v23 = vadd.f32 %v2498_v60, %v2469_v16  ;;  %v2367_v63 = vadd.f32 %v2366_v41, %v7852_v59  ;;  %v2470_v4 = vmul.f32 %v7852_v59, %v7852_v59  ;;  %v2409_v27 = vadd.f32 %v2408_v11, %v7854_v33 }
 0x228   :  { %v2541_v24 = vadd.f32 %v2540_v0, %v2471_v37  ;;  %v2472_v28 = vmul.f32 %v7854_v33, %v7854_v33  ;;  %v7865_v15 = vsub.s32 0, %v2663_v17  ;;  %v7871_v16 = vsub.s32 2, %v2663_v17 }
 0x229   :  { %v2520_v36 = vadd.f32 %v2519_v10, %v2470_v4  ;;  %v7873_v41 = vsub.s32 1, %v2663_v17  ;;  %v7875_v38 = vsub.s32 3, %v2663_v17 }
 0x22a   :  { %9659 = vst [vmem:[#allocation32_spill] sm:$0xff] %v7865_v15  ;;  %v2562_v5 = vadd.f32 %v2561_v3, %v2472_v28  ;;  %v7867_v31 = vpop.f32.mrb[24].mxu0  ;;  %v7869_v52 = vpop.f32.mrb[24].mxu1  ;;  %9661 = vst [vmem:[#allocation34_spill] sm:$0xff] %v7871_v16 }
 0x22b   :  { %9660 = vst [vmem:[#allocation33_spill] sm:$0xff] %v7869_v52  ;;  %9662 = vst [vmem:[#allocation35_spill] sm:$0xff] %v7873_v41  ;;  %v2347_v11 = vadd.f32 %v2346_v12, %v7867_v31  ;;  %v2473_v37 = vmul.f32 %v7867_v31, %v7867_v31  ;;  %v2389_v10 = vadd.f32 %v2388_v51, %v7869_v52  ;;  %v7883_v0 = vpop.f32.mrb[25].mxu0  ;;  %v7885_v3 = vpop.f32.mrb[25].mxu1 }
 0x22c   :  { %9663 = vst [vmem:[#allocation36_spill] sm:$0xff] %v7875_v38  ;;  %v2475_v60 = vmul.f32 %v7869_v52, %v7869_v52  ;;  %9664 = vst [vmem:[#allocation37_spill] sm:$0xff] %v7885_v3  ;;  %v2368_v4 = vadd.f32 %v2367_v63, %v7883_v0  ;;  %v2474_v17 = vmul.f32 %v7883_v0, %v7883_v0  ;;  %v7893_v54 = vpop.f32.mrb[26].mxu0  ;;  %v7895_v51 = vpop.f32.mrb[26].mxu1 }
 0x22d   :  { %v2410_v28 = vadd.f32 %v2409_v27, %v7885_v3  ;;  %v2476_v12 = vmul.f32 %v7885_v3, %v7885_v3  ;;  %9665 = vst [vmem:[#allocation38_spill] sm:$0xff] %v7893_v54  ;;  %9666 = vst [vmem:[#allocation39_spill] sm:$0xff] %v7895_v51  ;;  %v2500_v33 = vadd.f32 %v2499_v23, %v2473_v37  ;;  %v7900_v63 = vpop.f32.mrb[27].mxu0  ;;  %v7902_v30 = vpop.f32.mrb[27].mxu1  ;;  %v7907_v27 = vld [vmem:[%s9476_s2] sm:$0xf] }
 0x22e   :  { %v2542_v52 = vadd.f32 %v2541_v24, %v2475_v60  ;;  %v2348_v22 = vadd.f32 %v2347_v11, %v7893_v54  ;;  %v2477_v44 = vmul.f32 %v7893_v54, %v7893_v54  ;;  %9667 = vst [vmem:[#allocation40_spill] sm:$0xff] %v7902_v30  ;;  %9668 = vst [vmem:[#allocation41_spill] sm:$0xff] %v7907_v27  ;;  %v2335_v24 = vld [vmem:[%s9477_s3] sm:$0xf] }
 0x22f   :  { %v2521_v3 = vadd.f32 %v2520_v36, %v2474_v17  ;;  %v2563_v58 = vadd.f32 %v2562_v5, %v2476_v12  ;;  %v2390_v40 = vadd.f32 %v2389_v10, %v7895_v51  ;;  %v2479_v23 = vmul.f32 %v7895_v51, %v7895_v51 }
 0x230   :  { %v2501_v11 = vadd.f32 %v2500_v33, %v2477_v44  ;;  %v2369_v37 = vadd.f32 %v2368_v4, %v7900_v63  ;;  %v2478_v60 = vmul.f32 %v7900_v63, %v7900_v63  ;;  %v2411_v2 = vadd.f32 %v2410_v28, %v7902_v30 }
 0x231   :  { %v2543_v46 = vadd.f32 %v2542_v52, %v2479_v23  ;;  %v2480_v36 = vmul.f32 %v7902_v30, %v7902_v30  ;;  %v7926_v44 = vrot.slane %v2335_v24, %v7865_v15  ;;  %v7937_v23 = vrot.slane %v2335_v24, %v7871_v16 }
 0x232   :  { %v2522_v17 = vadd.f32 %v2521_v3, %v2478_v60  ;;  %v7932_v28 = vpop.f32.mrb[28].mxu0  ;;  %v7934_v12 = vpop.f32.mrb[28].mxu1  ;;  %v7940_v10 = vrot.slane %v2335_v24, %v7873_v41  ;;  %v7943_v3 = vrot.slane %v2335_v24, %v7875_v38 }
 0x233   :  { %9669 = vst [vmem:[#allocation42_spill] sm:$0xff] %v7926_v44  ;;  %v2564_v52 = vadd.f32 %v2563_v58, %v2480_v36  ;;  %9670 = vst [vmem:[#allocation43_spill] sm:$0xff] %v7932_v28  ;;  %v2349_v60 = vadd.f32 %v2348_v22, %v7932_v28  ;;  %v2481_v33 = vmul.f32 %v7932_v28, %v7932_v28  ;;  %v7951_v4 = vpop.f32.mrb[29].mxu0  ;;  %v7953_v5 = vpop.f32.mrb[29].mxu1 }
 0x234   :  { %9671 = vst [vmem:[#allocation44_spill] sm:$0xff] %v7934_v12  ;;  %9672 = vst [vmem:[#allocation45_spill] sm:$0xff] %v7937_v23  ;;  %v2391_v58 = vadd.f32 %v2390_v40, %v7934_v12  ;;  %v2483_v36 = vmul.f32 %v7934_v12, %v7934_v12  ;;  %v2370_v51 = vadd.f32 %v2369_v37, %v7951_v4  ;;  %v7961_v23 = vpop.f32.mrb[30].mxu0  ;;  %v7963_v40 = vpop.f32.mrb[30].mxu1 }
 0x235   :  { %9673 = vst [vmem:[#allocation46_spill] sm:$0xff] %v7940_v10  ;;  %9674 = vst [vmem:[#allocation47_spill] sm:$0xff] %v7943_v3  ;;  %v2482_v24 = vmul.f32 %v7951_v4, %v7951_v4  ;;  %v2412_v30 = vadd.f32 %v2411_v2, %v7953_v5  ;;  %v2484_v22 = vmul.f32 %v7953_v5, %v7953_v5  ;;  %v7968_v37 = vpop.f32.mrb[31].mxu0  ;;  %v7970_v38 = vpop.f32.mrb[31].mxu1 }
 0x236   :  { %9675 = vst [vmem:[#allocation48_spill] sm:$0xff] %v7951_v4  ;;  %9676 = vst [vmem:[#allocation49_spill] sm:$0xff] %v7953_v5  ;;  %v2502_v3 = vadd.f32 %v2501_v11, %v2481_v33  ;;  %v2544_v12 = vadd.f32 %v2543_v46, %v2483_v36  ;;  %v2350_v10 = vadd.f32 %v2349_v60, %v7961_v23 }
 0x237   :  { %v2485_v44 = vmul.f32 %v7961_v23, %v7961_v23  ;;  %v2523_v41 = vadd.f32 %v2522_v17, %v2482_v24  ;;  %v2565_v2 = vadd.f32 %v2564_v52, %v2484_v22  ;;  %v2392_v16 = vadd.f32 %v2391_v58, %v7963_v40 }
 0x238   :  { %v2487_v5 = vmul.f32 %v7963_v40, %v7963_v40  ;;  %v2351_v15 = vrot.slane %v2350_v10, 4  ;;  %v2371_v46 = vadd.f32 %v2370_v51, %v7968_v37  ;;  %v2486_v11 = vmul.f32 %v7968_v37, %v7968_v37 }
 0x239   :  { %v2503_v27 = vadd.f32 %v2502_v3, %v2485_v44  ;;  %v2393_v33 = vrot.slane %v2392_v16, 4  ;;  %v2413_v36 = vadd.f32 %v2412_v30, %v7970_v38  ;;  %v2488_v17 = vmul.f32 %v7970_v38, %v7970_v38 }
 0x23a   :  { %v2545_v60 = vadd.f32 %v2544_v12, %v2487_v5  ;;  %v2352_v52 = vadd.f32 %v2351_v15, %v2350_v10  ;;  %v2372_v58 = vrot.slane %v2371_v46, 4  ;;  %v2524_v22 = vadd.f32 %v2523_v41, %v2486_v11 }
 0x23b   :  { %v2504_v24 = vrot.slane %v2503_v27, 4  ;;  %v2394_v20 = vadd.f32 %v2393_v33, %v2392_v16  ;;  %v2414_v26 = vrot.slane %v2413_v36, 4  ;;  %v2566_v44 = vadd.f32 %v2565_v2, %v2488_v17 }
 0x23c   :  { %v2546_v8 = vrot.slane %v2545_v60, 4  ;;  %v2353_v3 = vrot.slane %v2352_v52, 2  ;;  %v2373_v14 = vadd.f32 %v2372_v58, %v2371_v46  ;;  %v2525_v56 = vrot.slane %v2524_v22, 4 }
 0x23d   :  { %v2505_v51 = vadd.f32 %v2504_v24, %v2503_v27  ;;  %v2395_v48 = vrot.slane %v2394_v20, 2  ;;  %v2415_v5 = vadd.f32 %v2414_v26, %v2413_v36  ;;  %v2567_v12 = vrot.slane %v2566_v44, 4 }
 0x23e   :  { %v2547_v62 = vadd.f32 %v2546_v8, %v2545_v60  ;;  %v2354_v30 = vadd.f32 %v2353_v3, %v2352_v52  ;;  %v2374_v28 = vrot.slane %v2373_v14, 2  ;;  %v2526_v4 = vadd.f32 %v2525_v56, %v2524_v22 }
 0x23f   :  { %v2506_v50 = vrot.slane %v2505_v51, 2  ;;  %v2396_v15 = vadd.f32 %v2395_v48, %v2394_v20  ;;  %v2416_v54 = vrot.slane %v2415_v5, 2  ;;  %v2568_v41 = vadd.f32 %v2567_v12, %v2566_v44 }
 0x240   :  { %v2548_v10 = vrot.slane %v2547_v62, 2  ;;  %v2355_v16 = vrot.slane %v2354_v30, 1  ;;  %v2375_v33 = vadd.f32 %v2374_v28, %v2373_v14  ;;  %v2527_v2 = vrot.slane %v2526_v4, 2 }
 0x241   :  { %v2507_v11 = vadd.f32 %v2506_v50, %v2505_v51  ;;  %v2397_v17 = vrot.slane %v2396_v15, 1  ;;  %v2417_v46 = vadd.f32 %v2416_v54, %v2415_v5  ;;  %v2569_v24 = vrot.slane %v2568_v41, 2 }
 0x242   :  { %v2549_v27 = vadd.f32 %v2548_v10, %v2547_v62  ;;  %v2356_v58 = vadd.f32 %v2355_v16, %v2354_v30  ;;  %v2376_v26 = vrot.slane %v2375_v33, 1  ;;  %v2528_v60 = vadd.f32 %v2527_v2, %v2526_v4 }
 0x243   :  { %v2508_v8 = vrot.slane %v2507_v11, 1  ;;  %v2398_v36 = vadd.f32 %v2397_v17, %v2396_v15  ;;  %v2418_v3 = vrot.slane %v2417_v46, 1  ;;  %v2570_v56 = vadd.f32 %v2569_v24, %v2568_v41  ;;  %v9721_v15 = vld [vmem:[#allocation42_spill] sm:$0xff] }
 0x244   :  { %v2550_v52 = vrot.slane %v2549_v27, 1  ;;  %v7981_v48 = vmul.f32 0.0078125, %v2356_v58  ;;  %v2377_v22 = vadd.f32 %v2376_v26, %v2375_v33  ;;  %v2529_v44 = vrot.slane %v2528_v60, 1 }
 0x245   :  { %v2509_v20 = vadd.f32 %v2508_v8, %v2507_v11  ;;  %v7983_v50 = vmul.f32 0.0078125, %v2398_v36  ;;  %v2419_v28 = vadd.f32 %v2418_v3, %v2417_v46  ;;  %v2571_v62 = vrot.slane %v2570_v56, 1  ;;  %v9705_v11 = vld [vmem:[#allocation29_spill] sm:$0xff] }
 0x246   :  { %v2551_v14 = vadd.f32 %v2550_v52, %v2549_v27  ;;  %v2577_v51 = vmul.f32 %v7981_v48, %v7981_v48  ;;  %v7989_v5 = vmul.f32 0.0078125, %v2377_v22  ;;  %v2530_v10 = vadd.f32 %v2529_v44, %v2528_v60 }
 0x247   :  { %v2573_v54 = vmul.f32 0.0078125, %v2509_v20  ;;  %v2579_v30 = vmul.f32 %v7983_v50, %v7983_v50  ;;  %v7999_v33 = vmul.f32 0.0078125, %v2419_v28  ;;  %v2572_v27 = vadd.f32 %v2571_v62, %v2570_v56  ;;  %v9695_v20 = vld [vmem:[#allocation32_spill] sm:$0xff] }
 0x248   :  { %v2575_v12 = vmul.f32 0.0078125, %v2551_v14  ;;  %v2578_v16 = vmul.f32 %v7989_v5, %v7989_v5  ;;  %v2574_v17 = vmul.f32 0.0078125, %v2530_v10 }
 0x249   :  { %v2581_v41 = vsub.f32 %v2573_v54, %v2577_v51  ;;  %v2580_v58 = vmul.f32 %v7999_v33, %v7999_v33  ;;  %v2576_v52 = vmul.f32 0.0078125, %v2572_v27  ;;  %v9694_v54 = vld [vmem:[#allocation41_spill] sm:$0xff] }
 0x24a   :  { %v2583_v2 = vsub.f32 %v2575_v12, %v2579_v30  ;;  %v2582_v36 = vsub.f32 %v2574_v17, %v2578_v16  ;;  %v9696_v22 = vrot.slane %v9694_v54, %v9695_v20  ;;  %v9700_v30 = vld [vmem:[#allocation34_spill] sm:$0xff]  ;;  %v9715_v17 = vsub.f32 %v7665_v7, %v7981_v48 }
 0x24b   :  { %v2585_v24 = vmax.f32 %v2581_v41, 0.0  ;;  %v2584_v62 = vsub.f32 %v2576_v52, %v2580_v58  ;;  %v9681_v52 = vld [vmem:[#allocation11_spill] sm:$0xff]  ;;  %v9701_v51 = vrot.slane %v9694_v54, %v9700_v30  ;;  %v9712_v30 = vsub.f32 %v7961_v23, %v7981_v48 }
 0x24c   :  { %v2587_v60 = vmax.f32 %v2583_v2, 0.0  ;;  %v2586_v28 = vmax.f32 %v2582_v36, 0.0  ;;  %v9685_v36 = vld [vmem:[#allocation15_spill] sm:$0xff]  ;;  %v9716_v23 = vsub.f32 %v7963_v40, %v7983_v50 }
 0x24d   :  { %v2589_v56 = vadd.f32 1e-05, %v2585_v24  ;;  %v2588_v41 = vmax.f32 %v2584_v62, 0.0  ;;  %v9678_v62 = vld [vmem:[#allocation48_spill] sm:$0xff]  ;;  %v9708_v24 = vld [vmem:[#allocation35_spill] sm:$0xff] }
 0x24e   :  { %v2591_v14 = vadd.f32 1e-05, %v2587_v60  ;;  %v2590_v10 = vadd.f32 1e-05, %v2586_v28  ;;  %v9684_v28 = vld [vmem:[#allocation13_spill] sm:$0xff]  ;;  %v9686_v60 = vld [vmem:[#allocation12_spill] sm:$0xff]  ;;  %v9709_v27 = vrot.slane %v9694_v54, %v9708_v24 }
 0x24f   :  { %6540 = vrsqrt.f32 %v2589_v56  ;;  %v2592_v58 = vadd.f32 1e-05, %v2588_v41  ;;  %v9680_v41 = vld [vmem:[#allocation9_spill] sm:$0xff]  ;;  %v9682_v56 = vld [vmem:[#allocation8_spill] sm:$0xff] }
 0x250   :  { %6542 = vrsqrt.f32 %v2591_v14  ;;  %v9683_v14 = vld [vmem:[#allocation10_spill] sm:$0xff] }
 0x251   :  { %6544 = vrsqrt.f32 %v2590_v10  ;;  %v9679_v10 = vld [vmem:[#allocation43_spill] sm:$0xff] }
 0x252   :  { %6546 = vrsqrt.f32 %v2592_v58  ;;  %v9677_v58 = vld [vmem:[#allocation38_spill] sm:$0xff] }
 0x259   :  { %v6541_v46 = vpop.eup %6540 }
 0x25a   :  { %v6543_v44 = vpop.eup %6542  ;;  %v2682_v3 = vmul.f32 %v6541_v46, %v9696_v22 }
 0x25b   :  { %v2684_v12 = vmul.f32 %v6543_v44, %v9701_v51  ;;  %v6545_v4 = vpop.eup %6544  ;;  %v9707_v44 = vld [vmem:[#allocation28_spill] sm:$0xff] }
 0x25c   :  { %v8112_v26 = vrot.slane %v2682_v3, %v9695_v20  ;;  %v2683_v22 = vmul.f32 %v6545_v4, %v9709_v27  ;;  %v6547_v16 = vpop.eup %6546  ;;  %v9714_v4 = vsub.f32 %v7641_v55, %v7981_v48 }
 0x25d   :  { %v8121_v8 = vrot.slane %v2684_v12, %v9695_v20  ;;  %v9713_v12 = vsub.f32 %v7625_v47, %v7981_v48 }
 0x25e   :  { %v8134_v2 = vmul.f32 %v8112_v26, %v9712_v30  ;;  %v2706_v27 = vmul.f32 %v8112_v26, %v9714_v4  ;;  %v2710_v3 = vmul.f32 %v8112_v26, %v9715_v17  ;;  %v8155_v47 = vrot.slane %v2683_v22, %v9695_v20 }
 0x25f   :  { %v2702_v51 = vmul.f32 %v8112_v26, %v9713_v12  ;;  %v8152_v30 = vmul.f32 %v8121_v8, %v9716_v23  ;;  %v9718_v12 = vld [vmem:[#allocation36_spill] sm:$0xff]  ;;  %v9720_v4 = vsub.f32 %v7685_v19, %v7981_v48  ;;  %v9722_v23 = vsub.f32 %v7705_v39, %v7981_v48 }
 0x260   :  { %v9719_v24 = vrot.slane %v9694_v54, %v9718_v12  ;;  %v2791_v46 = vadd.f32 %v9721_v15, %v2706_v27  ;;  %v2795_v40 = vadd.f32 %v9721_v15, %v2710_v3  ;;  %v9723_v54 = vsub.f32 %v7968_v37, %v7989_v5 }
 0x261   :  { %9717 = vst [vmem:[#allocation38_spill] sm:$0xff] %v8152_v30  ;;  %v2714_v7 = vmul.f32 %v8112_v26, %v9720_v4  ;;  %v2787_v17 = vadd.f32 %v9721_v15, %v2702_v51  ;;  %v2718_v22 = vmul.f32 %v8112_v26, %v9722_v23  ;;  %v9725_v3 = vsub.f32 %v7653_v61, %v7989_v5  ;;  %v9730_v61 = vld [vmem:[#allocation46_spill] sm:$0xff] }
 0x262   :  { %v2685_v55 = vmul.f32 %v6547_v16, %v9719_v24  ;;  %v8175_v16 = vmul.f32 %v8155_v47, %v9723_v54  ;;  %v9724_v24 = vsub.f32 %v7629_v49, %v7989_v5  ;;  %v2855_v4 = vmax.f32 %v2791_v46, 0.0 }
 0x263   :  { %v2707_v39 = vmul.f32 %v8155_v47, %v9725_v3  ;;  %v2851_v27 = vmax.f32 %v2787_v17, 0.0  ;;  %v9726_v37 = vsub.f32 %v7675_v13, %v7989_v5  ;;  %v9728_v49 = vsub.f32 %v7970_v38, %v7999_v33 }
 0x264   :  { %v8178_v19 = vrot.slane %v2685_v55, %v9695_v20  ;;  %v2703_v51 = vmul.f32 %v8155_v47, %v9724_v24  ;;  %v9727_v55 = vsub.f32 %v7692_v25, %v7989_v5  ;;  %v2799_v17 = vadd.f32 %v9721_v15, %v2714_v7 }
 0x265   :  { %v2711_v23 = vmul.f32 %v8155_v47, %v9726_v37  ;;  %v2792_v46 = vadd.f32 %v9730_v61, %v2707_v39  ;;  %v2915_v13 = vpack.c.bf16 %v2855_v4, %v2851_v27  ;;  %v2859_v25 = vmax.f32 %v2795_v40, 0.0 }
 0x266   :  { %v2715_v54 = vmul.f32 %v8155_v47, %v9727_v55  ;;  %v8200_v24 = vmul.f32 %v8178_v19, %v9728_v49  ;;  %v2788_v3 = vadd.f32 %v9730_v61, %v2703_v51  ;;  %v2863_v30 = vmax.f32 %v2799_v17, 0.0 }
 0x267   :  { %v2796_v37 = vadd.f32 %v9730_v61, %v2711_v23  ;;  %v2856_v55 = vmax.f32 %v2792_v46, 0.0  ;;  %v9731_v38 = vsub.f32 %v7715_v45, %v7989_v5  ;;  %v9732_v39 = vsub.f32 %v7732_v1, %v7989_v5  ;;  %v6412_v23 = vld [vmem:[#allocation2 + $0x200] ss:$16 sps:$4 sm:$0xff]   ;;  %v6415_v46 = vld [vmem:[#allocation2 + $0x208] ss:$16 sps:$4 sm:$0xff]  }
 0x268   :  { %9729 = vst [vmem:[#allocation48_spill] sm:$0xff] %v8200_v24  ;;  %v2800_v12 = vadd.f32 %v9730_v61, %v2715_v54  ;;  %v2852_v20 = vmax.f32 %v2788_v3, 0.0  ;;  %v9733_v27 = vsub.f32 %v7725_v57, %v7981_v48  ;;  %v8219_v54 = vpack.c.bf16 %v2863_v30, %v2859_v25  ;;  %v6423_v30 = vld [vmem:[#allocation2 + $0x22c] ss:$16 sps:$4 sm:$0xff]  }
 0x269   :  { %v2719_v49 = vmul.f32 %v8155_v47, %v9731_v38  ;;  %v2860_v24 = vmax.f32 %v2796_v37, 0.0  ;;  %v2723_v7 = vmul.f32 %v8155_v47, %v9732_v39  ;;  %v2803_v3 = vadd.f32 %v9721_v15, %v2718_v22 }
 0x26a   :  { %v2864_v51 = vmax.f32 %v2800_v12, 0.0  ;;  %v2722_v40 = vmul.f32 %v8112_v26, %v9733_v27  ;;  %v2916_v4 = vpack.c.bf16 %v2856_v55, %v2852_v20  ;;  %v9734_v37 = vsub.f32 %v7755_v29, %v7989_v5  ;;  %v6420_v20 = vld [vmem:[#allocation2 + $0x224] ss:$16 sps:$4 sm:$0xff]  }
 0x26b   :  { %v2804_v45 = vadd.f32 %v9730_v61, %v2719_v49  ;;  %v2808_v17 = vadd.f32 %v9730_v61, %v2723_v7  ;;  %v2867_v55 = vmax.f32 %v2803_v3, 0.0  ;;  %v9735_v22 = vsub.f32 %v7772_v43, %v7989_v5  ;;  %v6418_v43 = vld [vmem:[#allocation2 + $0x220] ss:$16 sps:$4 sm:$0xff]   ;;  %v6426_v3 = vld [vmem:[#allocation2 + $0x244] ss:$16 sps:$4 sm:$0xff]  }
 0x26c   :  { %v2920_v12 = vpack.c.bf16 %v2864_v51, %v2860_v24  ;;  %v2807_v1 = vadd.f32 %v9721_v15, %v2722_v40  ;;  %v2727_v57 = vmul.f32 %v8155_v47, %v9734_v37  ;;  %3747 = vmatprep.mubr.bf16.mxu0 %v2916_v4  ;;  %3973 = vmatprep.mubr.bf16.mxu1 %v2916_v4  ;;  %v6429_v37 = vld [vmem:[#allocation2 + $0x24c] ss:$16 sps:$4 sm:$0xff]  }
 0x26d   :  { %v2868_v25 = vmax.f32 %v2804_v45, 0.0  ;;  %v2731_v24 = vmul.f32 %v8155_v47, %v9735_v22  ;;  %v9736_v38 = vsub.f32 %v7745_v21, %v7981_v48  ;;  %3748 = vmatmul.mubr.bf16.vlgmr.msra.gmra.mrb[32].mxu0 %v2915_v13  ;;  %3974 = vmatmul.mubr.bf16.vlgmr.msra.gmra.mrb[32].mxu1 %v2915_v13  ;;  %v2872_v29 = vmax.f32 %v2808_v17, 0.0  ;;  %v6421_v45 = vld [vmem:[#allocation2 + $0x228] ss:$16 sps:$4 sm:$0xff]  }
 0x26e   :  { %v2871_v51 = vmax.f32 %v2807_v1, 0.0  ;;  %v2812_v39 = vadd.f32 %v9730_v61, %v2727_v57  ;;  %v9737_v7 = vsub.f32 %v7765_v35, %v7981_v48  ;;  %3757 = vmatprep.mubr.bf16.mxu0 %v2920_v12  ;;  %3829 = vmatpush1.bf16.msra.mxu0 %v6412_v23  ;;  %v9738_v4 = vsub.f32 %v7795_v18, %v7989_v5 }
 0x26f   :  { %v2726_v49 = vmul.f32 %v8112_v26, %v9736_v38  ;;  %v2816_v40 = vadd.f32 %v9730_v61, %v2731_v24  ;;  %3983 = vmatprep.mubr.bf16.mxu1 %v2920_v12  ;;  %4055 = vmatpush1.bf16.msra.mxu1 %v6415_v46  ;;  %v2924_v17 = vpack.c.bf16 %v2872_v29, %v2868_v25 }
 0x270   :  { %v2730_v27 = vmul.f32 %v8112_v26, %v9737_v7  ;;  %v2735_v13 = vmul.f32 %v8155_v47, %v9738_v4  ;;  %v8248_v35 = vpack.c.bf16 %v2871_v51, %v2867_v55  ;;  %v2876_v1 = vmax.f32 %v2812_v39, 0.0  ;;  %3830 = vmatprep.subr.bf16.mxu0 %v6420_v20  ;;  %4056 = vmatprep.subr.bf16.mxu1 %v6423_v30 }
 0x271   :  { %v2811_v21 = vadd.f32 %v9721_v15, %v2726_v49  ;;  %v2880_v57 = vmax.f32 %v2816_v40, 0.0  ;;  %v9739_v18 = vsub.f32 %v7812_v42, %v7989_v5  ;;  %v9740_v25 = vsub.f32 %v7785_v9, %v7981_v48  ;;  %v6424_v49 = vld [vmem:[#allocation2 + $0x240] ss:$16 sps:$4 sm:$0xff]   ;;  %v6432_v40 = vld [vmem:[#allocation2 + $0x264] ss:$16 sps:$4 sm:$0xff]  }
 0x272   :  { %v2815_v23 = vadd.f32 %v9721_v15, %v2730_v27  ;;  %v2820_v46 = vadd.f32 %v9730_v61, %v2735_v13  ;;  %v9741_v20 = vsub.f32 %v7805_v32, %v7981_v48  ;;  %v9742_v38 = vsub.f32 %v7835_v34, %v7989_v5  ;;  %3831 = vmatpush1.bf16.msra.mxu0 %v6418_v43  ;;  %v6427_v32 = vld [vmem:[#allocation2 + $0x248] ss:$16 sps:$4 sm:$0xff]  }
 0x273   :  { %v2875_v22 = vmax.f32 %v2811_v21, 0.0  ;;  %v2739_v24 = vmul.f32 %v8155_v47, %v9739_v18  ;;  %v2734_v55 = vmul.f32 %v8112_v26, %v9740_v25  ;;  %v8268_v29 = vpack.c.bf16 %v2880_v57, %v2876_v1  ;;  %4057 = vmatpush1.bf16.msra.mxu1 %v6421_v45  ;;  %3832 = vmatprep.subr.bf16.mxu0 %v6426_v3  ;;  %v6435_v21 = vld [vmem:[#allocation2 + $0x26c] ss:$16 sps:$4 sm:$0xff]   ;;  %v6433_v25 = vld [vmem:[#allocation2 + $0x268] ss:$16 sps:$4 sm:$0xff]  }
 0x274   :  { %v2879_v12 = vmax.f32 %v2815_v23, 0.0  ;;  %v2738_v30 = vmul.f32 %v8112_v26, %v9741_v20  ;;  %v2743_v42 = vmul.f32 %v8155_v47, %v9742_v38  ;;  %v2884_v39 = vmax.f32 %v2820_v46, 0.0  ;;  %4058 = vmatprep.subr.bf16.mxu1 %v6429_v37  ;;  %v6441_v38 = vld [vmem:[#allocation2 + $0x28c] ss:$16 sps:$4 sm:$0xff]  }
 0x275   :  { %v2824_v51 = vadd.f32 %v9730_v61, %v2739_v24  ;;  %v9743_v9 = vsub.f32 %v7852_v59, %v7989_v5  ;;  %v2819_v34 = vadd.f32 %v9721_v15, %v2734_v55  ;;  %v9744_v59 = vsub.f32 %v7825_v6, %v7981_v48  ;;  %3758 = vmatmul.mubr.bf16.gmra.mrb[36].mxu0 %v8219_v54  ;;  %v6430_v6 = vld [vmem:[#allocation2 + $0x260] ss:$16 sps:$4 sm:$0xff]  }
 0x276   :  { %v8275_v27 = vpack.c.bf16 %v2879_v12, %v2875_v22  ;;  %v2823_v43 = vadd.f32 %v9721_v15, %v2738_v30  ;;  %v2828_v13 = vadd.f32 %v9730_v61, %v2743_v42  ;;  %3984 = vmatmul.mubr.bf16.gmra.mrb[36].mxu1 %v8219_v54  ;;  %v9745_v37 = vsub.f32 %v7845_v53, %v7981_v48  ;;  %v6438_v53 = vld [vmem:[#allocation2 + $0x284] ss:$16 sps:$4 sm:$0xff]  }
 0x277   :  { %v2747_v7 = vmul.f32 %v8155_v47, %v9743_v9  ;;  %v2888_v4 = vmax.f32 %v2824_v51, 0.0  ;;  %v2742_v45 = vmul.f32 %v8112_v26, %v9744_v59  ;;  %v2883_v3 = vmax.f32 %v2819_v34, 0.0  ;;  %3767 = vmatprep.mubr.bf16.mxu0 %v2924_v17  ;;  %3833 = vmatpush1.bf16.msra.mxu0 %v6424_v49 }
 0x278   :  { %v2887_v23 = vmax.f32 %v2823_v43, 0.0  ;;  %v2746_v57 = vmul.f32 %v8112_v26, %v9745_v37  ;;  %v9746_v22 = vsub.f32 %v7883_v0, %v7989_v5  ;;  %v2892_v46 = vmax.f32 %v2828_v13, 0.0  ;;  %3993 = vmatprep.mubr.bf16.mxu1 %v2924_v17  ;;  %4059 = vmatpush1.bf16.msra.mxu1 %v6427_v32 }
 0x279   :  { %v2832_v1 = vadd.f32 %v9730_v61, %v2747_v7  ;;  %v8295_v24 = vpack.c.bf16 %v2888_v4, %v2884_v39  ;;  %v2827_v54 = vadd.f32 %v9721_v15, %v2742_v45  ;;  %v9747_v0 = vsub.f32 %v7900_v63, %v7989_v5  ;;  %3834 = vmatprep.subr.bf16.mxu0 %v6432_v40  ;;  %v6436_v40 = vld [vmem:[#allocation2 + $0x280] ss:$16 sps:$4 sm:$0xff]   ;;  %v6444_v45 = vld [vmem:[#allocation2 + $0x2a4] ss:$16 sps:$4 sm:$0xff]  }
 0x27a   :  { %v2751_v18 = vmul.f32 %v8155_v47, %v9746_v22  ;;  %v8298_v55 = vpack.c.bf16 %v2887_v23, %v2883_v3  ;;  %v2831_v20 = vadd.f32 %v9721_v15, %v2746_v57  ;;  %4060 = vmatprep.subr.bf16.mxu1 %v6435_v21  ;;  %v9748_v51 = vsub.f32 %v7867_v31, %v7981_v48  ;;  %v6447_v3 = vld [vmem:[#allocation2 + $0x2ac] ss:$16 sps:$4 sm:$0xff]  }
 0x27b   :  { %v2896_v12 = vmax.f32 %v2832_v1, 0.0  ;;  %v2755_v30 = vmul.f32 %v8155_v47, %v9747_v0  ;;  %v2891_v49 = vmax.f32 %v2827_v54, 0.0  ;;  %v9749_v63 = vsub.f32 %v9677_v58, %v7981_v48  ;;  %3835 = vmatpush1.bf16.msra.mxu0 %v6430_v6  ;;  %v6439_v1 = vld [vmem:[#allocation2 + $0x288] ss:$16 sps:$4 sm:$0xff]   ;;  %v6450_v54 = vld [vmem:[#allocation2 + $0x2c4] ss:$16 sps:$4 sm:$0xff]  }
 0x27c   :  { %v2836_v17 = vadd.f32 %v9730_v61, %v2751_v18  ;;  %v2750_v39 = vmul.f32 %v8112_v26, %v9748_v51  ;;  %v2895_v9 = vmax.f32 %v2831_v20, 0.0  ;;  %v9750_v34 = vsub.f32 %v9678_v62, %v7989_v5  ;;  %4061 = vmatpush1.bf16.msra.mxu1 %v6433_v25  ;;  %3836 = vmatprep.subr.bf16.mxu0 %v6438_v53  ;;  %v6442_v18 = vld [vmem:[#allocation2 + $0x2a0] ss:$16 sps:$4 sm:$0xff]   ;;  %v9755_v20 = vld [vmem:[#allocation47_spill] sm:$0xff] }
 0x27d   :  { %v8305_v42 = vpack.c.bf16 %v2896_v12, %v2892_v46  ;;  %v2840_v7 = vadd.f32 %v9730_v61, %v2755_v30  ;;  %v2754_v32 = vmul.f32 %v8112_v26, %v9749_v63  ;;  %v2848_v4 = vadd.f32 %v9730_v61, %v8175_v16  ;;  %4062 = vmatprep.subr.bf16.mxu1 %v6441_v38 }
 0x27e   :  { %v2759_v43 = vmul.f32 %v8155_v47, %v9750_v34  ;;  %v2900_v21 = vmax.f32 %v2836_v17, 0.0  ;;  %v2835_v31 = vadd.f32 %v9721_v15, %v2750_v39  ;;  %v9751_v13 = vsub.f32 %v9679_v10, %v7981_v48  ;;  %3768 = vmatmul.mubr.bf16.gmra.mrb[40].mxu0 %v8248_v35  ;;  %3994 = vmatmul.mubr.bf16.gmra.mrb[40].mxu1 %v8248_v35  ;;  %v9757_v17 = vld [vmem:[#allocation45_spill] sm:$0xff] }
 0x27f   :  { %v8328_v59 = vpack.c.bf16 %v2895_v9, %v2891_v49  ;;  %v2904_v5 = vmax.f32 %v2840_v7, 0.0  ;;  %v2839_v62 = vadd.f32 %v9721_v15, %v2754_v32  ;;  %v2912_v16 = vmax.f32 %v2848_v4, 0.0  ;;  %3777 = vmatprep.mubr.bf16.mxu0 %v8268_v29  ;;  %3837 = vmatpush1.bf16.msra.mxu0 %v6436_v40  ;;  %v6448_v32 = vld [vmem:[#allocation2 + $0x2c0] ss:$16 sps:$4 sm:$0xff]  }
 0x280   :  { %v2758_v58 = vmul.f32 %v8112_v26, %v9751_v13  ;;  %v2844_v47 = vadd.f32 %v9730_v61, %v2759_v43  ;;  %v2899_v23 = vmax.f32 %v2835_v31, 0.0  ;;  %v2847_v48 = vadd.f32 %v9721_v15, %v8134_v2  ;;  %4003 = vmatprep.mubr.bf16.mxu1 %v8268_v29  ;;  %4063 = vmatpush1.bf16.msra.mxu1 %v6439_v1  ;;  %v9763_v1 = vld [vmem:[#allocation17_spill] sm:$0xff] }
 0x281   :  { %v8337_v26 = vpack.c.bf16 %v2904_v5, %v2900_v21  ;;  %v2903_v10 = vmax.f32 %v2839_v62, 0.0  ;;  %v9752_v61 = vsub.f32 %v9680_v41, %v7999_v33  ;;  %v9754_v35 = vsub.f32 %v9682_v56, %v7983_v50  ;;  %v6445_v41 = vld [vmem:[#allocation2 + $0x2a8] ss:$16 sps:$4 sm:$0xff]   ;;  %3838 = vmatprep.subr.bf16.mxu0 %v6444_v45  ;;  %4064 = vmatprep.subr.bf16.mxu1 %v6447_v3  ;;  %v9761_v21 = vld [vmem:[#allocation14_spill] sm:$0xff] }
 0x282   :  { %v2843_v37 = vadd.f32 %v9721_v15, %v2758_v58  ;;  %v2908_v57 = vmax.f32 %v2844_v47, 0.0  ;;  %v2911_v46 = vmax.f32 %v2847_v48, 0.0  ;;  %v9753_v15 = vsub.f32 %v9681_v52, %v7999_v33  ;;  %v6453_v52 = vld [vmem:[#allocation2 + $0x2cc] ss:$16 sps:$4 sm:$0xff]   ;;  %v6456_v62 = vld [vmem:[#allocation2 + $0x2e4] ss:$16 sps:$4 sm:$0xff]  }
 0x283   :  { %v2705_v22 = vmul.f32 %v8178_v19, %v9752_v61  ;;  %v2704_v12 = vmul.f32 %v8121_v8, %v9754_v35  ;;  %v8353_v25 = vpack.c.bf16 %v2903_v10, %v2899_v23  ;;  %v9756_v38 = vsub.f32 %v9683_v14, %v7983_v50  ;;  %3839 = vmatpush1.bf16.msra.mxu0 %v6442_v18  ;;  %v6459_v47 = vld [vmem:[#allocation2 + $0x2ec] ss:$16 sps:$4 sm:$0xff]   ;;  %v6454_v18 = vld [vmem:[#allocation2 + $0x2e0] ss:$16 sps:$4 sm:$0xff]  }
 0x284   :  { %v2907_v6 = vmax.f32 %v2843_v37, 0.0  ;;  %v2709_v2 = vmul.f32 %v8178_v19, %v9753_v15  ;;  %v8355_v53 = vpack.c.bf16 %v2912_v16, %v2908_v57  ;;  %v9758_v39 = vsub.f32 %v9684_v28, %v7999_v33  ;;  %4065 = vmatpush1.bf16.msra.mxu1 %v6445_v41  ;;  %3840 = vmatprep.subr.bf16.mxu0 %v6450_v54  ;;  %v9765_v10 = vld [vmem:[#allocation19_spill] sm:$0xff]  ;;  %v6462_v41 = vld [vmem:[#allocation2 + $0x304] ss:$16 sps:$4 sm:$0xff]  }
 0x285   :  { %v2790_v0 = vadd.f32 %v9755_v20, %v2705_v22  ;;  %v2708_v29 = vmul.f32 %v8121_v8, %v9756_v38  ;;  %v2789_v51 = vadd.f32 %v9757_v17, %v2704_v12  ;;  %v9759_v7 = vsub.f32 %v9685_v36, %v7999_v33  ;;  %v6451_v36 = vld [vmem:[#allocation2 + $0x2c8] ss:$16 sps:$4 sm:$0xff]   ;;  %4066 = vmatprep.subr.bf16.mxu1 %v6453_v52 }
 0x286   :  { %v8358_v30 = vpack.c.bf16 %v2911_v46, %v2907_v6  ;;  %v2794_v56 = vadd.f32 %v9755_v20, %v2709_v2  ;;  %v2713_v9 = vmul.f32 %v8178_v19, %v9758_v39  ;;  %v9760_v43 = vsub.f32 %v9686_v60, %v7983_v50  ;;  %3778 = vmatmul.mubr.bf16.gmra.mrb[44].mxu0 %v8275_v27  ;;  %v9767_v2 = vld [vmem:[#allocation16_spill] sm:$0xff]  ;;  %v6457_v12 = vld [vmem:[#allocation2 + $0x2e8] ss:$16 sps:$4 sm:$0xff]  }
 0x287   :  { %v2854_v49 = vmax.f32 %v2790_v0, 0.0  ;;  %v2717_v63 = vmul.f32 %v8178_v19, %v9759_v7  ;;  %v2793_v14 = vadd.f32 %v9757_v17, %v2708_v29  ;;  %v9762_v28 = vsub.f32 %v9761_v21, %v7983_v50  ;;  %4004 = vmatmul.mubr.bf16.gmra.mrb[44].mxu1 %v8275_v27  ;;  %3787 = vmatprep.mubr.bf16.mxu0 %v8295_v24  ;;  %v9771_v39 = vld [vmem:[#allocation21_spill] sm:$0xff] }
 0x288   :  { %v2858_v34 = vmax.f32 %v2794_v56, 0.0  ;;  %v2712_v40 = vmul.f32 %v8121_v8, %v9760_v43  ;;  %v2853_v4 = vmax.f32 %v2789_v51, 0.0  ;;  %v2798_v13 = vadd.f32 %v9755_v20, %v2713_v9  ;;  %3841 = vmatpush1.bf16.msra.mxu0 %v6448_v32  ;;  %4013 = vmatprep.mubr.bf16.mxu1 %v8295_v24  ;;  %v9769_v56 = vld [vmem:[#allocation18_spill] sm:$0xff] }
 0x289   :  { %v2716_v31 = vmul.f32 %v8121_v8, %v9762_v28  ;;  %v2802_v58 = vadd.f32 %v9755_v20, %v2717_v63  ;;  %v9764_v5 = vsub.f32 %v9763_v1, %v7999_v33  ;;  %v2857_v3 = vmax.f32 %v2793_v14, 0.0  ;;  %4067 = vmatpush1.bf16.msra.mxu1 %v6451_v36  ;;  %3842 = vmatprep.subr.bf16.mxu0 %v6456_v62 }
 0x28a   :  { %v8389_v45 = vpack.c.bf16 %v2858_v34, %v2854_v49  ;;  %v2797_v23 = vadd.f32 %v9757_v17, %v2712_v40  ;;  %v2862_v37 = vmax.f32 %v2798_v13, 0.0  ;;  %v9766_v57 = vsub.f32 %v9765_v10, %v7999_v33  ;;  %4068 = vmatprep.subr.bf16.mxu1 %v6459_v47  ;;  %v6465_v49 = vld [vmem:[#allocation2 + $0x30c] ss:$16 sps:$4 sm:$0xff]   ;;  %v9775_v40 = vld [vmem:[#allocation20_spill] sm:$0xff]  ;;  %v9777_v13 = vld [vmem:[#allocation22_spill] sm:$0xff] }
 0x28b   :  { %v2721_v60 = vmul.f32 %v8178_v19, %v9764_v5  ;;  %v2801_v16 = vadd.f32 %v9757_v17, %v2716_v31  ;;  %v2866_v48 = vmax.f32 %v2802_v58, 0.0  ;;  %v8401_v6 = vpack.c.bf16 %v2857_v3, %v2853_v4  ;;  %v9773_v34 = vld [vmem:[#allocation23_spill] sm:$0xff]  ;;  %v6460_v31 = vld [vmem:[#allocation2 + $0x300] ss:$16 sps:$4 sm:$0xff]   ;;  %v9779_v5 = vld [vmem:[#allocation25_spill] sm:$0xff] }
 0x28c   :  { %v2725_v61 = vmul.f32 %v8178_v19, %v9766_v57  ;;  %v2861_v46 = vmax.f32 %v2797_v23, 0.0  ;;  %v9768_v27 = vsub.f32 %v9767_v2, %v7983_v50  ;;  %v9770_v38 = vsub.f32 %v9769_v56, %v7983_v50  ;;  %3843 = vmatpush1.bf16.msra.mxu0 %v6454_v18  ;;  %v6463_v47 = vld [vmem:[#allocation2 + $0x308] ss:$16 sps:$4 sm:$0xff]   ;;  %v6471_v10 = vld [vmem:[#allocation2 + $0x32c] ss:$16 sps:$4 sm:$0xff]  }
 0x28d   :  { %v2806_v22 = vadd.f32 %v9755_v20, %v2721_v60  ;;  %v2865_v15 = vmax.f32 %v2801_v16, 0.0  ;;  %v8408_v54 = vpack.c.bf16 %v2866_v48, %v2862_v37  ;;  %v9772_v9 = vsub.f32 %v9771_v39, %v7999_v33  ;;  %4069 = vmatpush1.bf16.msra.mxu1 %v6457_v12  ;;  %3844 = vmatprep.subr.bf16.mxu0 %v6462_v41  ;;  %v6468_v48 = vld [vmem:[#allocation2 + $0x324] ss:$16 sps:$4 sm:$0xff]   ;;  %v6469_v39 = vld [vmem:[#allocation2 + $0x328] ss:$16 sps:$4 sm:$0xff]  }
 0x28e   :  { %v2720_v35 = vmul.f32 %v8121_v8, %v9768_v27  ;;  %v2810_v0 = vadd.f32 %v9755_v20, %v2725_v61  ;;  %v2724_v29 = vmul.f32 %v8121_v8, %v9770_v38  ;;  %v9774_v14 = vsub.f32 %v9773_v34, %v7999_v33  ;;  %4070 = vmatprep.subr.bf16.mxu1 %v6465_v49  ;;  %v9783_v12 = vld [vmem:[#allocation24_spill] sm:$0xff]  ;;  %v9785_v49 = vld [vmem:[#allocation26_spill] sm:$0xff] }
 0x28f   :  { %v2870_v52 = vmax.f32 %v2806_v22, 0.0  ;;  %v8415_v51 = vpack.c.bf16 %v2865_v15, %v2861_v46  ;;  %v2729_v7 = vmul.f32 %v8178_v19, %v9772_v9  ;;  %v9776_v21 = vsub.f32 %v9775_v40, %v7983_v50  ;;  %v9781_v22 = vld [vmem:[#allocation27_spill] sm:$0xff]  ;;  %3788 = vmatmul.mubr.bf16.gmra.mrb[48].mxu0 %v8298_v55  ;;  %4014 = vmatmul.mubr.bf16.gmra.mrb[48].mxu1 %v8298_v55  ;;  %v6474_v9 = vld [vmem:[#allocation2 + $0x344] ss:$16 sps:$4 sm:$0xff]  }
 0x290   :  { %v2805_v24 = vadd.f32 %v9757_v17, %v2720_v35  ;;  %v2874_v63 = vmax.f32 %v2810_v0, 0.0  ;;  %v2809_v32 = vadd.f32 %v9757_v17, %v2724_v29  ;;  %v2733_v43 = vmul.f32 %v8178_v19, %v9774_v14  ;;  %3797 = vmatprep.mubr.bf16.mxu0 %v8305_v42  ;;  %3845 = vmatpush1.bf16.msra.mxu0 %v6460_v31  ;;  %v6477_v14 = vld [vmem:[#allocation2 + $0x34c] ss:$16 sps:$4 sm:$0xff]  }
 0x291   :  { %v2728_v28 = vmul.f32 %v8121_v8, %v9776_v21  ;;  %v2814_v4 = vadd.f32 %v9755_v20, %v2729_v7  ;;  %v9778_v58 = vsub.f32 %v9777_v13, %v7983_v50  ;;  %v9780_v60 = vsub.f32 %v9779_v5, %v7999_v33  ;;  %4023 = vmatprep.mubr.bf16.mxu1 %v8305_v42  ;;  %v9788_v21 = vld [vmem:[#allocation31_spill] sm:$0xff] }
 0x292   :  { %v2869_v36 = vmax.f32 %v2805_v24, 0.0  ;;  %v8440_v3 = vpack.c.bf16 %v2874_v63, %v2870_v52  ;;  %v2873_v23 = vmax.f32 %v2809_v32, 0.0  ;;  %v2818_v16 = vadd.f32 %v9755_v20, %v2733_v43  ;;  %v6466_v52 = vld [vmem:[#allocation2 + $0x320] ss:$16 sps:$4 sm:$0xff]   ;;  %4071 = vmatpush1.bf16.msra.mxu1 %v6463_v47  ;;  %3846 = vmatprep.subr.bf16.mxu0 %v6468_v48 }
 0x293   :  { %v2732_v1 = vmul.f32 %v8121_v8, %v9778_v58  ;;  %v2737_v62 = vmul.f32 %v8178_v19, %v9780_v60  ;;  %v2813_v37 = vadd.f32 %v9757_v17, %v2728_v28  ;;  %v2878_v57 = vmax.f32 %v2814_v4, 0.0  ;;  %4072 = vmatprep.subr.bf16.mxu1 %v6471_v10  ;;  %v9791_v58 = vld [vmem:[#allocation30_spill] sm:$0xff] }
 0x294   :  { %v9782_v18 = vsub.f32 %v9781_v22, %v7999_v33  ;;  %v8452_v2 = vpack.c.bf16 %v2873_v23, %v2869_v36  ;;  %v2882_v27 = vmax.f32 %v2818_v16, 0.0  ;;  %v9784_v41 = vsub.f32 %v9783_v12, %v7983_v50  ;;  %3847 = vmatpush1.bf16.msra.mxu0 %v6466_v52  ;;  %v6472_v60 = vld [vmem:[#allocation2 + $0x340] ss:$16 sps:$4 sm:$0xff]  }
 0x295   :  { %v2817_v61 = vadd.f32 %v9757_v17, %v2732_v1  ;;  %v2822_v15 = vadd.f32 %v9755_v20, %v2737_v62  ;;  %v2877_v35 = vmax.f32 %v2813_v37, 0.0  ;;  %v9786_v55 = vsub.f32 %v9785_v49, %v7983_v50  ;;  %v9793_v16 = vld [vmem:[#allocation40_spill] sm:$0xff]  ;;  %3848 = vmatprep.subr.bf16.mxu0 %v6474_v9 }
 0x296   :  { %v2741_v46 = vmul.f32 %v8178_v19, %v9782_v18  ;;  %v2736_v0 = vmul.f32 %v8121_v8, %v9784_v41  ;;  %v8465_v7 = vpack.c.bf16 %v2882_v27, %v2878_v57  ;;  %v9787_v32 = vsub.f32 %v9705_v11, %v7999_v33  ;;  %4073 = vmatpush1.bf16.msra.mxu1 %v6469_v39  ;;  %v9796_v41 = vld [vmem:[#allocation33_spill] sm:$0xff] }
 0x297   :  { %v2881_v56 = vmax.f32 %v2817_v61, 0.0  ;;  %v2886_v29 = vmax.f32 %v2822_v15, 0.0  ;;  %v2740_v24 = vmul.f32 %v8121_v8, %v9786_v55  ;;  %v9789_v28 = vsub.f32 %v9788_v21, %v7999_v33  ;;  %v9794_v61 = vld [vmem:[#allocation37_spill] sm:$0xff]  ;;  %4074 = vmatprep.subr.bf16.mxu1 %v6477_v14  ;;  %3798 = vmatmul.mubr.bf16.gmra.mrb[52].mxu0 %v8328_v59  ;;  %v6478_v55 = vld [vmem:[#allocation2 + $0x360] ss:$16 sps:$4 sm:$0xff]  }
 0x298   :  { %v2826_v38 = vadd.f32 %v9755_v20, %v2741_v46  ;;  %v2821_v63 = vadd.f32 %v9757_v17, %v2736_v0  ;;  %v2745_v34 = vmul.f32 %v8178_v19, %v9787_v32  ;;  %v9790_v11 = vsub.f32 %v9707_v44, %v7983_v50  ;;  %v6475_v44 = vld [vmem:[#allocation2 + $0x348] ss:$16 sps:$4 sm:$0xff]   ;;  %v6480_v46 = vld [vmem:[#allocation2 + $0x364] ss:$16 sps:$4 sm:$0xff]   ;;  %v6483_v15 = vld [vmem:[#allocation2 + $0x36c] ss:$16 sps:$4 sm:$0xff]   ;;  %4024 = vmatmul.mubr.bf16.gmra.mrb[52].mxu1 %v8328_v59 }
 0x299   :  { %v8472_v43 = vpack.c.bf16 %v2881_v56, %v2877_v35  ;;  %v2825_v42 = vadd.f32 %v9757_v17, %v2740_v24  ;;  %v2749_v31 = vmul.f32 %v8178_v19, %v9789_v28  ;;  %v9792_v1 = vsub.f32 %v9791_v58, %v7983_v50  ;;  %3807 = vmatprep.mubr.bf16.mxu0 %v8337_v26  ;;  %v6481_v59 = vld [vmem:[#allocation2 + $0x368] ss:$16 sps:$4 sm:$0xff]   ;;  %v6489_v21 = vld [vmem:[#allocation2 + $0x38c] ss:$16 sps:$4 sm:$0xff]  }
 0x29a   :  { %v2890_v40 = vmax.f32 %v2826_v38, 0.0  ;;  %v2885_v36 = vmax.f32 %v2821_v63, 0.0  ;;  %v2830_v4 = vadd.f32 %v9755_v20, %v2745_v34  ;;  %v2744_v13 = vmul.f32 %v8121_v8, %v9790_v11  ;;  %3849 = vmatpush1.bf16.msra.mxu0 %v6472_v60  ;;  %4033 = vmatprep.mubr.bf16.mxu1 %v8337_v26  ;;  %v6486_v63 = vld [vmem:[#allocation2 + $0x384] ss:$16 sps:$4 sm:$0xff]  }
 0x29b   :  { %v2748_v5 = vmul.f32 %v8121_v8, %v9792_v1  ;;  %v2889_v47 = vmax.f32 %v2825_v42, 0.0  ;;  %v2834_v23 = vadd.f32 %v9755_v20, %v2749_v31  ;;  %v2652_v37 = vsub.f32 %v9793_v16, %v7999_v33  ;;  %4075 = vmatpush1.bf16.msra.mxu1 %v6475_v44  ;;  %3850 = vmatprep.subr.bf16.mxu0 %v6480_v46  ;;  %v9801_v1 = vld [vmem:[#allocation38_spill] sm:$0xff]  ;;  %v6487_v16 = vld [vmem:[#allocation2 + $0x388] ss:$16 sps:$4 sm:$0xff]  }
 0x29c   :  { %v8488_v62 = vpack.c.bf16 %v2890_v40, %v2886_v29  ;;  %v2894_v48 = vmax.f32 %v2830_v4, 0.0  ;;  %v2829_v10 = vadd.f32 %v9757_v17, %v2744_v13  ;;  %v9795_v22 = vsub.f32 %v9794_v61, %v7999_v33  ;;  %v9797_v29 = vld [vmem:[#allocation39_spill] sm:$0xff]  ;;  %v9798_v40 = vld [vmem:[#allocation49_spill] sm:$0xff]  ;;  %4076 = vmatprep.subr.bf16.mxu1 %v6483_v15  ;;  %v9800_v4 = vld [vmem:[#allocation44_spill] sm:$0xff] }
 0x29d   :  { %v2833_v57 = vadd.f32 %v9757_v17, %v2748_v5  ;;  %v8499_v27 = vpack.c.bf16 %v2889_v47, %v2885_v36  ;;  %v2898_v35 = vmax.f32 %v2834_v23, 0.0  ;;  %v2757_v12 = vmul.f32 %v8178_v19, %v2652_v37  ;;  %v9799_v36 = vld [vmem:[#allocation48_spill] sm:$0xff] }
 0x29e   :  { %v2753_v18 = vmul.f32 %v8178_v19, %v9795_v22  ;;  %v2647_v0 = vsub.f32 %v9796_v41, %v7983_v50  ;;  %v2893_v52 = vmax.f32 %v2829_v10, 0.0  ;;  %v2651_v49 = vsub.f32 %v9797_v29, %v7983_v50  ;;  %3851 = vmatpush1.bf16.msra.mxu0 %v6478_v55  ;;  %v6498_v46 = vld [vmem:[#allocation2 + $0x3c4] ss:$16 sps:$4 sm:$0xff]   ;;  %v6522_v29 = vld [vmem:[#allocation4 + $0xd8] sm:$0xff]  }
 0x29f   :  { %v2897_v56 = vmax.f32 %v2833_v57, 0.0  ;;  %v8510_v24 = vpack.c.bf16 %v2898_v35, %v2894_v48  ;;  %v2842_v39 = vadd.f32 %v9755_v20, %v2757_v12  ;;  %v2656_v42 = vsub.f32 %v9798_v40, %v7999_v33  ;;  %v6484_v33 = vld [vmem:[#allocation2 + $0x380] ss:$16 sps:$4 sm:$0xff]   ;;  %4077 = vmatpush1.bf16.msra.mxu1 %v6481_v59  ;;  %3852 = vmatprep.subr.bf16.mxu0 %v6486_v63  ;;  %v6492_v48 = vld [vmem:[#allocation2 + $0x3a4] ss:$16 sps:$4 sm:$0xff]   ;;  %v6523_v55 = vld [vmem:[#allocation4 + $0x98] sm:$0xff]  }
 0x2a0   :  { %v2838_v38 = vadd.f32 %v9755_v20, %v2753_v18  ;;  %v2752_v9 = vmul.f32 %v8121_v8, %v2647_v0  ;;  %v2756_v14 = vmul.f32 %v8121_v8, %v2651_v49  ;;  %v2850_v26 = vadd.f32 %v9755_v20, %v9799_v36  ;;  %4078 = vmatprep.subr.bf16.mxu1 %v6489_v21  ;;  %v6496_v12 = vld [vmem:[#allocation2 + $0x3c0] ss:$16 sps:$4 sm:$0xff]   ;;  %v6504_v41 = vld [vmem:[#allocation2 + $0x3e4] ss:$16 sps:$4 sm:$0xff]   ;;  %v6507_v0 = vld [vmem:[#allocation2 + $0x3ec] ss:$16 sps:$4 sm:$0xff]  }
 0x2a1   :  { %v8515_v32 = vpack.c.bf16 %v2897_v56, %v2893_v52  ;;  %v2906_v28 = vmax.f32 %v2842_v39, 0.0  ;;  %v2655_v11 = vsub.f32 %v9800_v4, %v7983_v50  ;;  %v2761_v58 = vmul.f32 %v8178_v19, %v2656_v42  ;;  %v6495_v19 = vld [vmem:[#allocation2 + $0x3ac] ss:$16 sps:$4 sm:$0xff]   ;;  %3808 = vmatmul.mubr.bf16.gmra.mrb[56].mxu0 %v8353_v25  ;;  %4034 = vmatmul.mubr.bf16.gmra.mrb[56].mxu1 %v8353_v25  ;;  %v6499_v25 = vld [vmem:[#allocation2 + $0x3c8] ss:$16 sps:$4 sm:$0xff]   ;;  %v6519_v56 = vld [vmem:[#allocation4 + $0x90] sm:$0xff]  }
 0x2a2   :  { %v2902_v34 = vmax.f32 %v2838_v38, 0.0  ;;  %v2837_v31 = vadd.f32 %v9757_v17, %v2752_v9  ;;  %v2841_v13 = vadd.f32 %v9757_v17, %v2756_v14  ;;  %v2849_v5 = vadd.f32 %v9757_v17, %v9801_v1  ;;  %3817 = vmatprep.mubr.bf16.mxu0 %v8355_v53  ;;  %3853 = vmatpush1.bf16.msra.mxu0 %v6484_v33  ;;  %v6505_v52 = vld [vmem:[#allocation2 + $0x3e8] ss:$16 sps:$4 sm:$0xff]   ;;  %v6526_v39 = vld [vmem:[#allocation4 + $0xe0] sm:$0xff]   ;;  %v6532_v40 = vld [vmem:[#allocation4 + $0x70] sm:$0xff]  }
 0x2a3   :  { %v2760_v23 = vmul.f32 %v8121_v8, %v2655_v11  ;;  %v2846_v50 = vadd.f32 %v9755_v20, %v2761_v58  ;;  %v2914_v44 = vmax.f32 %v2850_v26, 0.0  ;;  %v6490_v8 = vld [vmem:[#allocation2 + $0x3a0] ss:$16 sps:$4 sm:$0xff]   ;;  %4043 = vmatprep.mubr.bf16.mxu1 %v8355_v53  ;;  %4079 = vmatpush1.bf16.msra.mxu1 %v6487_v16  ;;  %v6493_v20 = vld [vmem:[#allocation2 + $0x3a8] ss:$16 sps:$4 sm:$0xff]  }
 0x2a4   :  { %v8529_v60 = vpack.c.bf16 %v2906_v28, %v2902_v34  ;;  %v2901_v47 = vmax.f32 %v2837_v31, 0.0  ;;  %v2905_v37 = vmax.f32 %v2841_v13, 0.0  ;;  %v2913_v57 = vmax.f32 %v2849_v5, 0.0  ;;  %3854 = vmatprep.subr.bf16.mxu0 %v6492_v48  ;;  %4080 = vmatprep.subr.bf16.mxu1 %v6495_v19  ;;  %v6502_v53 = vld [vmem:[#allocation2 + $0x3e0] ss:$16 sps:$4 sm:$0xff]   ;;  %v6520_v38 = vld [vmem:[#allocation4 + $0x58] sm:$0xff]  }
 0x2a5   :  { %v2845_v10 = vadd.f32 %v9757_v17, %v2760_v23  ;;  %v2910_v22 = vmax.f32 %v2846_v50, 0.0  ;;  %v6501_v17 = vld [vmem:[#allocation2 + $0x3cc] ss:$16 sps:$4 sm:$0xff]   ;;  %v6525_v9 = vld [vmem:[#allocation4 + $0x20] sm:$0xff]   ;;  %v6534_v42 = vld [vmem:[#allocation4 + $0xf0] sm:$0xff]  }
 0x2a6   :  { %v2941_v61 = vpack.c.bf16 %v2905_v37, %v2901_v47  ;;  %3855 = vmatpush1.bf16.msra.mxu0 %v6490_v8  ;;  %v6521_v49 = vld [vmem:[#allocation4 + $0x18] sm:$0xff]   ;;  %v6527_v59 = vld [vmem:[#allocation4 + $0xa0] sm:$0xff]   ;;  %v6528_v63 = vld [vmem:[#allocation4 + $0x68] sm:$0xff]  }
 0x2a7   :  { %v2909_v18 = vmax.f32 %v2845_v10, 0.0  ;;  %v2946_v15 = vpack.c.bf16 %v2914_v44, %v2910_v22  ;;  %4081 = vmatpush1.bf16.msra.mxu1 %v6493_v20  ;;  %3856 = vmatprep.subr.bf16.mxu0 %v6498_v46  ;;  %v6529_v34 = vld [vmem:[#allocation4 + $0x28] sm:$0xff]   ;;  %v6533_v21 = vld [vmem:[#allocation4 + $0x30] sm:$0xff]   ;;  %v6536_v31 = vld [vmem:[#allocation4 + $0x78] sm:$0xff]  }
 0x2a8   :  { %4082 = vmatprep.subr.bf16.mxu1 %v6501_v17  ;;  %v6531_v14 = vld [vmem:[#allocation4 + $0xa8] sm:$0xff]   ;;  %v6535_v28 = vld [vmem:[#allocation4 + $0xb0] sm:$0xff]   ;;  %v6538_v36 = vld [vmem:[#allocation4 + $0xf8] sm:$0xff]  }
 0x2a9   :  { %v2945_v35 = vpack.c.bf16 %v2913_v57, %v2909_v18  ;;  %3818 = vmatmul.mubr.bf16.gmra.mrb[60].mxu0 %v8358_v30  ;;  %4044 = vmatmul.mubr.bf16.gmra.mrb[60].mxu1 %v8358_v30  ;;  %v6508_v30 = vld [vmem:[#allocation4 + $0x40] sm:$0xff]   ;;  %v6537_v26 = vld [vmem:[#allocation4 + $0x38] sm:$0xff]  }
 0x2aa   :  { %3857 = vmatpush1.bf16.msra.mxu0 %v6496_v12  ;;  %3860 = vmatprep.mubr.bf16.mxu0 %v8389_v45  ;;  %v6539_v4 = vld [vmem:[#allocation4 + $0xb8] sm:$0xff]  }
 0x2ab   :  { %4083 = vmatpush1.bf16.msra.mxu1 %v6499_v25  ;;  %4086 = vmatprep.mubr.bf16.mxu1 %v8389_v45  ;;  %v6509_v45 = vld [vmem:[#allocation4] sm:$0xff]  }
 0x2ac   :  { %3858 = vmatprep.subr.bf16.mxu0 %v6504_v41  ;;  %4084 = vmatprep.subr.bf16.mxu1 %v6507_v0 }
 0x2ae   :  { %3859 = vmatpush1.bf16.msra.mxu0 %v6502_v53 }
 0x2af   :  { %4085 = vmatpush1.bf16.msra.mxu1 %v6505_v52  ;;  %5631 = vmatprep.subr.bf16.mxu0 %v6508_v30 }
 0x2b1   :  { %3861 = vmatmul.mubr.bf16.vlgmr.msra.gmra.mrb[32].mxu0 %v8401_v6 }
 0x2b2   :  { %4087 = vmatmul.mubr.bf16.vlgmr.msra.gmra.mrb[32].mxu1 %v8401_v6  ;;  %3870 = vmatprep.mubr.bf16.mxu0 %v8408_v54  ;;  %v6510_v6 = vld [vmem:[#allocation4 + $0xc0] sm:$0xff]  }
 0x2b3   :  { %4096 = vmatprep.mubr.bf16.mxu1 %v8408_v54  ;;  %v6511_v54 = vld [vmem:[#allocation4 + $0x80] sm:$0xff]   ;;  %5695 = vmatprep.subr.bf16.mxu1 %v6510_v6 }
 0x2b4   :  { %5632 = vmatpush3.bf16.msra.mxu0 %v6509_v45  ;;  %5696 = vmatpush3.bf16.msra.mxu1 %v6511_v54 }
 0x2b9   :  { %3871 = vmatmul.mubr.bf16.gmra.mrb[36].mxu0 %v8415_v51 }
 0x2ba   :  { %4097 = vmatmul.mubr.bf16.gmra.mrb[36].mxu1 %v8415_v51  ;;  %3880 = vmatprep.mubr.bf16.mxu0 %v8440_v3  ;;  %v6512_v51 = vld [vmem:[#allocation4 + $0x48] sm:$0xff]  }
 0x2bb   :  { %4106 = vmatprep.mubr.bf16.mxu1 %v8440_v3  ;;  %v6513_v3 = vld [vmem:[#allocation4 + $0x8] sm:$0xff]   ;;  %5633 = vmatprep.subr.bf16.mxu0 %v6512_v51 }
 0x2bc   :  { %5634 = vmatpush3.bf16.msra.mxu0 %v6513_v3 }
 0x2c1   :  { %3881 = vmatmul.mubr.bf16.gmra.mrb[40].mxu0 %v8452_v2 }
 0x2c2   :  { %4107 = vmatmul.mubr.bf16.gmra.mrb[40].mxu1 %v8452_v2  ;;  %3890 = vmatprep.mubr.bf16.mxu0 %v8465_v7  ;;  %v6514_v2 = vld [vmem:[#allocation4 + $0xc8] sm:$0xff]  }
 0x2c3   :  { %4116 = vmatprep.mubr.bf16.mxu1 %v8465_v7  ;;  %v6515_v7 = vld [vmem:[#allocation4 + $0x88] sm:$0xff]   ;;  %5697 = vmatprep.subr.bf16.mxu1 %v6514_v2 }
 0x2c4   :  { %5698 = vmatpush3.bf16.msra.mxu1 %v6515_v7 }
 0x2c9   :  { %3891 = vmatmul.mubr.bf16.gmra.mrb[44].mxu0 %v8472_v43 }
 0x2ca   :  { %4117 = vmatmul.mubr.bf16.gmra.mrb[44].mxu1 %v8472_v43  ;;  %3900 = vmatprep.mubr.bf16.mxu0 %v8488_v62  ;;  %v6516_v43 = vld [vmem:[#allocation4 + $0x50] sm:$0xff]  }
 0x2cb   :  { %4126 = vmatprep.mubr.bf16.mxu1 %v8488_v62  ;;  %v6517_v62 = vld [vmem:[#allocation4 + $0x10] sm:$0xff]   ;;  %5635 = vmatprep.subr.bf16.mxu0 %v6516_v43 }
 0x2cc   :  { %5636 = vmatpush3.bf16.msra.mxu0 %v6517_v62 }
 0x2cd   :  { %5637 = vmatprep.subr.bf16.mxu0 %v6520_v38 }
 0x2d0   :  { %5638 = vmatpush3.bf16.msra.mxu0 %v6521_v49 }
 0x2d1   :  { %3901 = vmatmul.mubr.bf16.gmra.mrb[48].mxu0 %v8499_v27 }
 0x2d2   :  { %4127 = vmatmul.mubr.bf16.gmra.mrb[48].mxu1 %v8499_v27  ;;  %3910 = vmatprep.mubr.bf16.mxu0 %v8510_v24  ;;  %v6518_v27 = vld [vmem:[#allocation4 + $0xd0] sm:$0xff]  }
 0x2d3   :  { %4136 = vmatprep.mubr.bf16.mxu1 %v8510_v24  ;;  %5699 = vmatprep.subr.bf16.mxu1 %v6518_v27  ;;  %v6524_v24 = vld [vmem:[#allocation4 + $0x60] sm:$0xff]  }
 0x2d4   :  { %5700 = vmatpush3.bf16.msra.mxu1 %v6519_v56  ;;  %5639 = vmatprep.subr.bf16.mxu0 %v6524_v24 }
 0x2d5   :  { %5701 = vmatprep.subr.bf16.mxu1 %v6522_v29  ;;  %5640 = vmatpush3.bf16.msra.mxu0 %v6525_v9 }
 0x2d6   :  { %5641 = vmatprep.subr.bf16.mxu0 %v6528_v63 }
 0x2d8   :  { %5702 = vmatpush3.bf16.msra.mxu1 %v6523_v55 }
 0x2d9   :  { %3911 = vmatmul.mubr.bf16.gmra.mrb[52].mxu0 %v8515_v32  ;;  %5703 = vmatprep.subr.bf16.mxu1 %v6526_v39 }
 0x2da   :  { %4137 = vmatmul.mubr.bf16.gmra.mrb[52].mxu1 %v8515_v32  ;;  %3920 = vmatprep.mubr.bf16.mxu0 %v8529_v60  ;;  %v6530_v32 = vld [vmem:[#allocation4 + $0xe8] sm:$0xff]  }
 0x2db   :  { %4146 = vmatprep.mubr.bf16.mxu1 %v8529_v60  ;;  %5642 = vmatpush3.bf16.msra.mxu0 %v6529_v34 }
 0x2dc   :  { %5704 = vmatpush3.bf16.msra.mxu1 %v6527_v59  ;;  %5643 = vmatprep.subr.bf16.mxu0 %v6532_v40 }
 0x2dd   :  { %5705 = vmatprep.subr.bf16.mxu1 %v6530_v32 }
 0x2df   :  { %5644 = vmatpush3.bf16.msra.mxu0 %v6533_v21 }
 0x2e0   :  { %5706 = vmatpush3.bf16.msra.mxu1 %v6531_v14  ;;  %5645 = vmatprep.subr.bf16.mxu0 %v6536_v31 }
 0x2e1   :  { %3921 = vmatmul.mubr.bf16.gmra.mrb[56].mxu0 %v2941_v61  ;;  %5707 = vmatprep.subr.bf16.mxu1 %v6534_v42 }
 0x2e2   :  { %4147 = vmatmul.mubr.bf16.gmra.mrb[56].mxu1 %v2941_v61  ;;  %3930 = vmatprep.mubr.bf16.mxu0 %v2946_v15 }
 0x2e3   :  { %4156 = vmatprep.mubr.bf16.mxu1 %v2946_v15  ;;  %5646 = vmatpush3.bf16.msra.mxu0 %v6537_v26 }
 0x2e4   :  { %5708 = vmatpush3.bf16.msra.mxu1 %v6535_v28 }
 0x2e5   :  { %5709 = vmatprep.subr.bf16.mxu1 %v6538_v36 }
 0x2e8   :  { %5710 = vmatpush3.bf16.msra.mxu1 %v6539_v4 }
 0x2e9   :  { %3931 = vmatmul.mubr.bf16.gmra.mrb[60].mxu0 %v2945_v35 }
 0x2ea   :  { %4157 = vmatmul.mubr.bf16.gmra.mrb[60].mxu1 %v2945_v35 }
 0x384   :  { %v8566_v11 = vpop.f32.mrb[32].mxu0 }
 0x385   :  { %v8568_v13 = vpop.f32.mrb[32].mxu1  ;;  %v8570_v58 = vpop.f32.mrb[33].mxu0  ;;  %v4257_v1 = vmul.f32 %v8566_v11, %v8566_v11 }
 0x386   :  { %v8574_v5 = vpop.f32.mrb[33].mxu1  ;;  %v8576_v33 = vpop.f32.mrb[34].mxu0  ;;  %v4259_v60 = vmul.f32 %v8568_v13, %v8568_v13  ;;  %v4258_v47 = vmul.f32 %v8570_v58, %v8570_v58 }
 0x387   :  { %v4169_v23 = vadd.f32 %v8576_v33, %v8566_v11  ;;  %v4261_v16 = vmul.f32 %v8576_v33, %v8576_v33  ;;  %v8586_v37 = vpop.f32.mrb[34].mxu1  ;;  %v8588_v50 = vpop.f32.mrb[35].mxu0  ;;  %v4260_v61 = vmul.f32 %v8574_v5, %v8574_v5 }
 0x388   :  { %v4211_v44 = vadd.f32 %v8586_v37, %v8568_v13  ;;  %v4263_v48 = vmul.f32 %v8586_v37, %v8586_v37  ;;  %v4190_v19 = vadd.f32 %v8588_v50, %v8570_v58  ;;  %v4262_v10 = vmul.f32 %v8588_v50, %v8588_v50  ;;  %v8598_v57 = vpop.f32.mrb[35].mxu1 }
 0x389   :  { %v4321_v22 = vadd.f32 %v4261_v16, %v4257_v1  ;;  %v4232_v8 = vadd.f32 %v8598_v57, %v8574_v5  ;;  %v4264_v18 = vmul.f32 %v8598_v57, %v8598_v57 }
 0x38a   :  { %v4363_v20 = vadd.f32 %v4263_v48, %v4259_v60  ;;  %v4342_v46 = vadd.f32 %v4262_v10, %v4258_v47 }
 0x38b   :  { %v4384_v15 = vadd.f32 %v4264_v18, %v4260_v61 }
 0x38c   :  { %v8606_v17 = vpop.f32.mrb[36].mxu0 }
 0x38d   :  { %v4170_v35 = vadd.f32 %v4169_v23, %v8606_v17  ;;  %v4265_v12 = vmul.f32 %v8606_v17, %v8606_v17  ;;  %v8611_v25 = vpop.f32.mrb[36].mxu1  ;;  %v8613_v41 = vpop.f32.mrb[37].mxu0 }
 0x38e   :  { %v4212_v0 = vadd.f32 %v4211_v44, %v8611_v25  ;;  %v4267_v53 = vmul.f32 %v8611_v25, %v8611_v25  ;;  %v4191_v52 = vadd.f32 %v4190_v19, %v8613_v41  ;;  %v4266_v30 = vmul.f32 %v8613_v41, %v8613_v41  ;;  %v8621_v45 = vpop.f32.mrb[37].mxu1  ;;  %v8623_v6 = vpop.f32.mrb[38].mxu0 }
 0x38f   :  { %v4322_v54 = vadd.f32 %v4321_v22, %v4265_v12  ;;  %v4233_v51 = vadd.f32 %v4232_v8, %v8621_v45  ;;  %v4268_v3 = vmul.f32 %v8621_v45, %v8621_v45  ;;  %v4171_v2 = vadd.f32 %v4170_v35, %v8623_v6  ;;  %v8629_v7 = vpop.f32.mrb[38].mxu1  ;;  %v8631_v43 = vpop.f32.mrb[39].mxu0 }
 0x390   :  { %v4364_v62 = vadd.f32 %v4363_v20, %v4267_v53  ;;  %v4343_v27 = vadd.f32 %v4342_v46, %v4266_v30  ;;  %v4269_v56 = vmul.f32 %v8623_v6, %v8623_v6  ;;  %v4213_v38 = vadd.f32 %v4212_v0, %v8629_v7  ;;  %v8636_v29 = vpop.f32.mrb[39].mxu1 }
 0x391   :  { %v4385_v49 = vadd.f32 %v4384_v15, %v4268_v3  ;;  %v4271_v55 = vmul.f32 %v8629_v7, %v8629_v7  ;;  %v4192_v24 = vadd.f32 %v4191_v52, %v8631_v43  ;;  %v4270_v39 = vmul.f32 %v8631_v43, %v8631_v43 }
 0x392   :  { %v4323_v9 = vadd.f32 %v4322_v54, %v4269_v56  ;;  %v4234_v59 = vadd.f32 %v4233_v51, %v8636_v29  ;;  %v4272_v63 = vmul.f32 %v8636_v29, %v8636_v29 }
 0x393   :  { %v4365_v32 = vadd.f32 %v4364_v62, %v4271_v55  ;;  %v4344_v34 = vadd.f32 %v4343_v27, %v4270_v39 }
 0x394   :  { %v4386_v14 = vadd.f32 %v4385_v49, %v4272_v63  ;;  %v8646_v40 = vpop.f32.mrb[40].mxu0 }
 0x395   :  { %v4172_v42 = vadd.f32 %v4171_v2, %v8646_v40  ;;  %v4273_v21 = vmul.f32 %v8646_v40, %v8646_v40  ;;  %v8651_v28 = vpop.f32.mrb[40].mxu1  ;;  %v8653_v31 = vpop.f32.mrb[41].mxu0 }
 0x396   :  { %v4214_v36 = vadd.f32 %v4213_v38, %v8651_v28  ;;  %v4275_v26 = vmul.f32 %v8651_v28, %v8651_v28  ;;  %v4193_v4 = vadd.f32 %v4192_v24, %v8653_v31  ;;  %v4274_v1 = vmul.f32 %v8653_v31, %v8653_v31  ;;  %v8661_v60 = vpop.f32.mrb[41].mxu1  ;;  %v8663_v47 = vpop.f32.mrb[42].mxu0 }
 0x397   :  { %v4324_v23 = vadd.f32 %v4323_v9, %v4273_v21  ;;  %v4235_v16 = vadd.f32 %v4234_v59, %v8661_v60  ;;  %v4276_v44 = vmul.f32 %v8661_v60, %v8661_v60  ;;  %v4173_v48 = vadd.f32 %v4172_v42, %v8663_v47  ;;  %v8669_v19 = vpop.f32.mrb[42].mxu1  ;;  %v8671_v10 = vpop.f32.mrb[43].mxu0 }
 0x398   :  { %v4366_v61 = vadd.f32 %v4365_v32, %v4275_v26  ;;  %v4345_v22 = vadd.f32 %v4344_v34, %v4274_v1  ;;  %v4277_v8 = vmul.f32 %v8663_v47, %v8663_v47  ;;  %v4215_v18 = vadd.f32 %v4214_v36, %v8669_v19  ;;  %v8676_v20 = vpop.f32.mrb[43].mxu1 }
 0x399   :  { %v4387_v46 = vadd.f32 %v4386_v14, %v4276_v44  ;;  %v4279_v15 = vmul.f32 %v8669_v19, %v8669_v19  ;;  %v4194_v35 = vadd.f32 %v4193_v4, %v8671_v10  ;;  %v4278_v12 = vmul.f32 %v8671_v10, %v8671_v10 }
 0x39a   :  { %v4325_v0 = vadd.f32 %v4324_v23, %v4277_v8  ;;  %v4236_v53 = vadd.f32 %v4235_v16, %v8676_v20  ;;  %v4280_v52 = vmul.f32 %v8676_v20, %v8676_v20 }
 0x39b   :  { %v4367_v30 = vadd.f32 %v4366_v61, %v4279_v15  ;;  %v4346_v54 = vadd.f32 %v4345_v22, %v4278_v12 }
 0x39c   :  { %v4388_v51 = vadd.f32 %v4387_v46, %v4280_v52  ;;  %v8686_v3 = vpop.f32.mrb[44].mxu0 }
 0x39d   :  { %9802 = vst [vmem:[#allocation43_spill] sm:$0xff] %v8686_v3  ;;  %v4174_v2 = vadd.f32 %v4173_v48, %v8686_v3  ;;  %v4281_v62 = vmul.f32 %v8686_v3, %v8686_v3  ;;  %v8691_v27 = vpop.f32.mrb[44].mxu1  ;;  %v8693_v56 = vpop.f32.mrb[45].mxu0 }
 0x39e   :  { %9803 = vst [vmem:[#allocation9_spill] sm:$0xff] %v8691_v27  ;;  %v4216_v38 = vadd.f32 %v4215_v18, %v8691_v27  ;;  %v4283_v49 = vmul.f32 %v8691_v27, %v8691_v27  ;;  %v4195_v55 = vadd.f32 %v4194_v35, %v8693_v56  ;;  %v4282_v24 = vmul.f32 %v8693_v56, %v8693_v56  ;;  %v8701_v39 = vpop.f32.mrb[45].mxu1  ;;  %v8703_v9 = vpop.f32.mrb[46].mxu0 }
 0x39f   :  { %9804 = vst [vmem:[#allocation11_spill] sm:$0xff] %v8701_v39  ;;  %9805 = vst [vmem:[#allocation8_spill] sm:$0xff] %v8703_v9  ;;  %v4326_v59 = vadd.f32 %v4325_v0, %v4281_v62  ;;  %v4237_v63 = vadd.f32 %v4236_v53, %v8701_v39  ;;  %v4284_v32 = vmul.f32 %v8701_v39, %v8701_v39  ;;  %v8709_v14 = vpop.f32.mrb[46].mxu1  ;;  %v8711_v42 = vpop.f32.mrb[47].mxu0 }
 0x3a0   :  { %v4175_v34 = vadd.f32 %v4174_v2, %v8703_v9  ;;  %9806 = vst [vmem:[#allocation10_spill] sm:$0xff] %v8709_v14  ;;  %v4368_v21 = vadd.f32 %v4367_v30, %v4283_v49  ;;  %v4347_v36 = vadd.f32 %v4346_v54, %v4282_v24  ;;  %v4285_v26 = vmul.f32 %v8703_v9, %v8703_v9  ;;  %v8716_v1 = vpop.f32.mrb[47].mxu1 }
 0x3a1   :  { %v4217_v4 = vadd.f32 %v4216_v38, %v8709_v14  ;;  %9807 = vst [vmem:[#allocation13_spill] sm:$0xff] %v8716_v1  ;;  %v4389_v23 = vadd.f32 %v4388_v51, %v4284_v32  ;;  %v4287_v16 = vmul.f32 %v8709_v14, %v8709_v14  ;;  %v4196_v44 = vadd.f32 %v4195_v55, %v8711_v42 }
 0x3a2   :  { %v4286_v48 = vmul.f32 %v8711_v42, %v8711_v42  ;;  %v4327_v61 = vadd.f32 %v4326_v59, %v4285_v26  ;;  %v4238_v22 = vadd.f32 %v4237_v63, %v8716_v1  ;;  %v4288_v8 = vmul.f32 %v8716_v1, %v8716_v1 }
 0x3a3   :  { %v4369_v18 = vadd.f32 %v4368_v21, %v4287_v16 }
 0x3a4   :  { %v4348_v46 = vadd.f32 %v4347_v36, %v4286_v48  ;;  %v4390_v15 = vadd.f32 %v4389_v23, %v4288_v8  ;;  %v8726_v35 = vpop.f32.mrb[48].mxu0 }
 0x3a5   :  { %9808 = vst [vmem:[#allocation15_spill] sm:$0xff] %v8726_v35  ;;  %v4176_v12 = vadd.f32 %v4175_v34, %v8726_v35  ;;  %v4289_v0 = vmul.f32 %v8726_v35, %v8726_v35  ;;  %v8731_v53 = vpop.f32.mrb[48].mxu1  ;;  %v8733_v52 = vpop.f32.mrb[49].mxu0 }
 0x3a6   :  { %9809 = vst [vmem:[#allocation12_spill] sm:$0xff] %v8731_v53  ;;  %9810 = vst [vmem:[#allocation41_spill] sm:$0xff] %v8733_v52  ;;  %v4218_v30 = vadd.f32 %v4217_v4, %v8731_v53  ;;  %v4291_v54 = vmul.f32 %v8731_v53, %v8731_v53  ;;  %v4197_v51 = vadd.f32 %v4196_v44, %v8733_v52  ;;  %v8741_v62 = vpop.f32.mrb[49].mxu1  ;;  %v8743_v38 = vpop.f32.mrb[50].mxu0  ;;  %v9839_v53 = vld [vmem:[#allocation36_spill] sm:$0xff] }
 0x3a7   :  { %v4290_v2 = vmul.f32 %v8733_v52, %v8733_v52  ;;  %9811 = vst [vmem:[#allocation29_spill] sm:$0xff] %v8741_v62  ;;  %9812 = vst [vmem:[#allocation28_spill] sm:$0xff] %v8743_v38  ;;  %v4328_v49 = vadd.f32 %v4327_v61, %v4289_v0  ;;  %v4239_v55 = vadd.f32 %v4238_v22, %v8741_v62  ;;  %v8749_v63 = vpop.f32.mrb[50].mxu1  ;;  %v8751_v32 = vpop.f32.mrb[51].mxu0 }
 0x3a8   :  { %v4292_v24 = vmul.f32 %v8741_v62, %v8741_v62  ;;  %v4177_v59 = vadd.f32 %v4176_v12, %v8743_v38  ;;  %9813 = vst [vmem:[#allocation42_spill] sm:$0xff] %v8749_v63  ;;  %9814 = vst [vmem:[#allocation46_spill] sm:$0xff] %v8751_v32  ;;  %v4370_v34 = vadd.f32 %v4369_v18, %v4291_v54  ;;  %v8756_v4 = vpop.f32.mrb[51].mxu1 }
 0x3a9   :  { %v4349_v21 = vadd.f32 %v4348_v46, %v4290_v2  ;;  %v4293_v36 = vmul.f32 %v8743_v38, %v8743_v38  ;;  %v4219_v26 = vadd.f32 %v4218_v30, %v8749_v63  ;;  %9815 = vst [vmem:[#allocation47_spill] sm:$0xff] %v8756_v4  ;;  %v4295_v16 = vmul.f32 %v8749_v63, %v8749_v63 }
 0x3aa   :  { %v4391_v23 = vadd.f32 %v4390_v15, %v4292_v24  ;;  %v4198_v44 = vadd.f32 %v4197_v51, %v8751_v32  ;;  %v4294_v48 = vmul.f32 %v8751_v32, %v8751_v32  ;;  %v4240_v22 = vadd.f32 %v4239_v55, %v8756_v4 }
 0x3ab   :  { %v4329_v61 = vadd.f32 %v4328_v49, %v4293_v36  ;;  %v4296_v8 = vmul.f32 %v8756_v4, %v8756_v4  ;;  %v4371_v18 = vadd.f32 %v4370_v34, %v4295_v16 }
 0x3ac   :  { %v4350_v46 = vadd.f32 %v4349_v21, %v4294_v48  ;;  %v8766_v0 = vpop.f32.mrb[52].mxu0 }
 0x3ad   :  { %v4392_v12 = vadd.f32 %v4391_v23, %v4296_v8  ;;  %9816 = vst [vmem:[#allocation45_spill] sm:$0xff] %v8766_v0  ;;  %v4178_v15 = vadd.f32 %v4177_v59, %v8766_v0  ;;  %v4297_v30 = vmul.f32 %v8766_v0, %v8766_v0  ;;  %v8771_v54 = vpop.f32.mrb[52].mxu1  ;;  %v8773_v51 = vpop.f32.mrb[53].mxu0 }
 0x3ae   :  { %9817 = vst [vmem:[#allocation14_spill] sm:$0xff] %v8771_v54  ;;  %9818 = vst [vmem:[#allocation17_spill] sm:$0xff] %v8773_v51  ;;  %v4220_v2 = vadd.f32 %v4219_v26, %v8771_v54  ;;  %v4299_v49 = vmul.f32 %v8771_v54, %v8771_v54  ;;  %v4199_v55 = vadd.f32 %v4198_v44, %v8773_v51  ;;  %v8781_v34 = vpop.f32.mrb[53].mxu1  ;;  %v8783_v59 = vpop.f32.mrb[54].mxu0 }
 0x3af   :  { %v4298_v24 = vmul.f32 %v8773_v51, %v8773_v51  ;;  %9819 = vst [vmem:[#allocation19_spill] sm:$0xff] %v8781_v34  ;;  %9820 = vst [vmem:[#allocation16_spill] sm:$0xff] %v8783_v59  ;;  %v4330_v21 = vadd.f32 %v4329_v61, %v4297_v30  ;;  %v4241_v36 = vadd.f32 %v4240_v22, %v8781_v34  ;;  %v8789_v16 = vpop.f32.mrb[54].mxu1  ;;  %v8791_v48 = vpop.f32.mrb[55].mxu0 }
 0x3b0   :  { %v4300_v23 = vmul.f32 %v8781_v34, %v8781_v34  ;;  %v4179_v26 = vadd.f32 %v4178_v15, %v8783_v59  ;;  %9821 = vst [vmem:[#allocation18_spill] sm:$0xff] %v8789_v16  ;;  %9822 = vst [vmem:[#allocation21_spill] sm:$0xff] %v8791_v48  ;;  %v4372_v44 = vadd.f32 %v4371_v18, %v4299_v49  ;;  %v8796_v51 = vpop.f32.mrb[55].mxu1 }
 0x3b1   :  { %v4351_v8 = vadd.f32 %v4350_v46, %v4298_v24  ;;  %v4301_v54 = vmul.f32 %v8783_v59, %v8783_v59  ;;  %v4221_v0 = vadd.f32 %v4220_v2, %v8789_v16  ;;  %9823 = vst [vmem:[#allocation23_spill] sm:$0xff] %v8796_v51  ;;  %v4303_v22 = vmul.f32 %v8789_v16, %v8789_v16 }
 0x3b2   :  { %v4393_v61 = vadd.f32 %v4392_v12, %v4300_v23  ;;  %v4200_v30 = vadd.f32 %v4199_v55, %v8791_v48  ;;  %v4302_v15 = vmul.f32 %v8791_v48, %v8791_v48  ;;  %v4242_v18 = vadd.f32 %v4241_v36, %v8796_v51 }
 0x3b3   :  { %v4331_v34 = vadd.f32 %v4330_v21, %v4301_v54  ;;  %v4304_v46 = vmul.f32 %v8796_v51, %v8796_v51  ;;  %v4373_v49 = vadd.f32 %v4372_v44, %v4303_v22 }
 0x3b4   :  { %v4352_v24 = vadd.f32 %v4351_v8, %v4302_v15  ;;  %v8806_v59 = vpop.f32.mrb[56].mxu0 }
 0x3b5   :  { %v4394_v2 = vadd.f32 %v4393_v61, %v4304_v46  ;;  %9824 = vst [vmem:[#allocation20_spill] sm:$0xff] %v8806_v59  ;;  %v4180_v12 = vadd.f32 %v4179_v26, %v8806_v59  ;;  %v4305_v23 = vmul.f32 %v8806_v59, %v8806_v59  ;;  %v8811_v55 = vpop.f32.mrb[56].mxu1  ;;  %v8813_v16 = vpop.f32.mrb[57].mxu0  ;;  %v4168_v61 = vld [vmem:[%s9480_s6] sm:$0xf] }
 0x3b6   :  { %9825 = vst [vmem:[#allocation22_spill] sm:$0xff] %v8811_v55  ;;  %9826 = vst [vmem:[#allocation25_spill] sm:$0xff] %v8813_v16  ;;  %v4222_v54 = vadd.f32 %v4221_v0, %v8811_v55  ;;  %v4307_v21 = vmul.f32 %v8811_v55, %v8811_v55  ;;  %v4201_v36 = vadd.f32 %v4200_v30, %v8813_v16  ;;  %v8821_v8 = vpop.f32.mrb[57].mxu1  ;;  %v8823_v26 = vpop.f32.mrb[58].mxu0 }
 0x3b7   :  { %v4306_v44 = vmul.f32 %v8813_v16, %v8813_v16  ;;  %9827 = vst [vmem:[#allocation27_spill] sm:$0xff] %v8821_v8  ;;  %9828 = vst [vmem:[#allocation24_spill] sm:$0xff] %v8823_v26  ;;  %v4332_v22 = vadd.f32 %v4331_v34, %v4305_v23  ;;  %v4243_v15 = vadd.f32 %v4242_v18, %v8821_v8  ;;  %v8832_v30 = vpop.f32.mrb[58].mxu1  ;;  %v8834_v55 = vpop.f32.mrb[59].mxu0 }
 0x3b8   :  { %v4308_v0 = vmul.f32 %v8821_v8, %v8821_v8  ;;  %v4181_v46 = vadd.f32 %v4180_v12, %v8823_v26  ;;  %9829 = vst [vmem:[#allocation26_spill] sm:$0xff] %v8832_v30  ;;  %9830 = vst [vmem:[#allocation31_spill] sm:$0xff] %v8834_v55  ;;  %v4374_v59 = vadd.f32 %v4373_v49, %v4307_v21  ;;  %v8839_v63 = vpop.f32.mrb[59].mxu1  ;;  %v8849_v49 = vld [vmem:[%s9479_s5] sm:$0xf] }
 0x3b9   :  { %v4353_v16 = vadd.f32 %v4352_v24, %v4306_v44  ;;  %v4309_v51 = vmul.f32 %v8823_v26, %v8823_v26  ;;  %v4223_v48 = vadd.f32 %v4222_v54, %v8832_v30  ;;  %9831 = vst [vmem:[#allocation30_spill] sm:$0xff] %v8839_v63  ;;  %v4311_v18 = vmul.f32 %v8832_v30, %v8832_v30  ;;  %v9833_v24 = vld [vmem:[#allocation32_spill] sm:$0xff] }
 0x3ba   :  { %v4395_v34 = vadd.f32 %v4394_v2, %v4308_v0  ;;  %v4202_v23 = vadd.f32 %v4201_v36, %v8834_v55  ;;  %v4310_v12 = vmul.f32 %v8834_v55, %v8834_v55  ;;  %9832 = vst [vmem:[#allocation40_spill] sm:$0xff] %v8849_v49  ;;  %v8852_v21 = vrot.slane %v4168_v61, %v9833_v24  ;;  %v9835_v0 = vld [vmem:[#allocation34_spill] sm:$0xff]  ;;  %v9837_v36 = vld [vmem:[#allocation35_spill] sm:$0xff] }
 0x3bb   :  { %v4333_v54 = vadd.f32 %v4332_v22, %v4309_v51  ;;  %v4244_v44 = vadd.f32 %v4243_v15, %v8839_v63  ;;  %v4312_v2 = vmul.f32 %v8839_v63, %v8839_v63  ;;  %v8858_v30 = vrot.slane %v4168_v61, %v9835_v0 }
 0x3bc   :  { %9834 = vst [vmem:[#allocation37_spill] sm:$0xff] %v8852_v21  ;;  %v8861_v26 = vrot.slane %v4168_v61, %v9837_v36  ;;  %v4375_v8 = vadd.f32 %v4374_v59, %v4311_v18  ;;  %v4354_v55 = vadd.f32 %v4353_v16, %v4310_v12  ;;  %v8864_v38 = vrot.slane %v4168_v61, %v9839_v53  ;;  %v8866_v4 = vpop.f32.mrb[60].mxu0 }
 0x3bd   :  { %9836 = vst [vmem:[#allocation33_spill] sm:$0xff] %v8858_v30  ;;  %v4396_v35 = vadd.f32 %v4395_v34, %v4312_v2  ;;  %9841 = vst [vmem:[#allocation48_spill] sm:$0xff] %v8866_v4  ;;  %v4182_v15 = vadd.f32 %v4181_v46, %v8866_v4  ;;  %v4313_v30 = vmul.f32 %v8866_v4, %v8866_v4  ;;  %v8877_v59 = vpop.f32.mrb[61].mxu0 }
 0x3be   :  { %9838 = vst [vmem:[#allocation39_spill] sm:$0xff] %v8861_v26  ;;  %9840 = vst [vmem:[#allocation49_spill] sm:$0xff] %v8864_v38  ;;  %v8875_v26 = vpop.f32.mrb[60].mxu1  ;;  %v4203_v46 = vadd.f32 %v4202_v23, %v8877_v59  ;;  %v4314_v12 = vmul.f32 %v8877_v59, %v8877_v59  ;;  %v8891_v22 = vpop.f32.mrb[62].mxu0 }
 0x3bf   :  { %9842 = vst [vmem:[#allocation44_spill] sm:$0xff] %v8875_v26  ;;  %9843 = vst [vmem:[#allocation38_spill] sm:$0xff] %v8877_v59  ;;  %v4224_v34 = vadd.f32 %v4223_v48, %v8875_v26  ;;  %v4315_v18 = vmul.f32 %v8875_v26, %v8875_v26  ;;  %v8889_v2 = vpop.f32.mrb[61].mxu1  ;;  %v4334_v51 = vadd.f32 %v4333_v54, %v4313_v30  ;;  %v8899_v26 = vpop.f32.mrb[63].mxu0 }
 0x3c0   :  { %9844 = vst [vmem:[#allocation50_spill] sm:$0xff] %v8889_v2  ;;  %v4245_v16 = vadd.f32 %v4244_v44, %v8889_v2  ;;  %v4316_v61 = vmul.f32 %v8889_v2, %v8889_v2  ;;  %v4183_v48 = vadd.f32 %v4182_v15, %v8891_v22  ;;  %v8897_v4 = vpop.f32.mrb[62].mxu1  ;;  %v4355_v38 = vadd.f32 %v4354_v55, %v4314_v12 }
 0x3c1   :  { %v4376_v23 = vadd.f32 %v4375_v8, %v4315_v18  ;;  %v4317_v21 = vmul.f32 %v8891_v22, %v8891_v22  ;;  %v4225_v53 = vadd.f32 %v4224_v34, %v8897_v4  ;;  %v8904_v59 = vpop.f32.mrb[63].mxu1  ;;  %v4319_v44 = vmul.f32 %v8897_v4, %v8897_v4 }
 0x3c2   :  { %v4397_v30 = vadd.f32 %v4396_v35, %v4316_v61  ;;  %v4184_v54 = vrot.slane %v4183_v48, 4  ;;  %v4204_v15 = vadd.f32 %v4203_v46, %v8899_v26  ;;  %v4318_v8 = vmul.f32 %v8899_v26, %v8899_v26 }
 0x3c3   :  { %v4335_v2 = vadd.f32 %v4334_v51, %v4317_v21  ;;  %v4226_v36 = vrot.slane %v4225_v53, 4  ;;  %v4246_v55 = vadd.f32 %v4245_v16, %v8904_v59  ;;  %v4377_v12 = vadd.f32 %v4376_v23, %v4319_v44 }
 0x3c4   :  { %v4185_v18 = vadd.f32 %v4184_v54, %v4183_v48  ;;  %v4205_v63 = vrot.slane %v4204_v15, 4  ;;  %v4320_v34 = vmul.f32 %v8904_v59, %v8904_v59  ;;  %v4356_v0 = vadd.f32 %v4355_v38, %v4318_v8 }
 0x3c5   :  { %v4336_v35 = vrot.slane %v4335_v2, 4  ;;  %v4227_v61 = vadd.f32 %v4226_v36, %v4225_v53  ;;  %v4247_v24 = vrot.slane %v4246_v55, 4  ;;  %v4378_v62 = vrot.slane %v4377_v12, 4 }
 0x3c6   :  { %v4186_v49 = vrot.slane %v4185_v18, 2  ;;  %v4206_v46 = vadd.f32 %v4205_v63, %v4204_v15  ;;  %v4398_v21 = vadd.f32 %v4397_v30, %v4320_v34  ;;  %v4357_v52 = vrot.slane %v4356_v0, 4 }
 0x3c7   :  { %v4337_v51 = vadd.f32 %v4336_v35, %v4335_v2  ;;  %v4228_v32 = vrot.slane %v4227_v61, 2  ;;  %v4248_v14 = vadd.f32 %v4247_v24, %v4246_v55  ;;  %v4379_v16 = vadd.f32 %v4378_v62, %v4377_v12 }
 0x3c8   :  { %v4187_v27 = vadd.f32 %v4186_v49, %v4185_v18  ;;  %v4207_v48 = vrot.slane %v4206_v46, 2  ;;  %v4399_v23 = vrot.slane %v4398_v21, 4  ;;  %v4358_v9 = vadd.f32 %v4357_v52, %v4356_v0 }
 0x3c9   :  { %v4338_v54 = vrot.slane %v4337_v51, 2  ;;  %v4229_v44 = vadd.f32 %v4228_v32, %v4227_v61  ;;  %v4249_v3 = vrot.slane %v4248_v14, 2  ;;  %v4380_v53 = vrot.slane %v4379_v16, 2 }
 0x3ca   :  { %v4188_v1 = vrot.slane %v4187_v27, 1  ;;  %v4208_v38 = vadd.f32 %v4207_v48, %v4206_v46  ;;  %v4400_v36 = vadd.f32 %v4399_v23, %v4398_v21  ;;  %v4359_v63 = vrot.slane %v4358_v9, 2 }
 0x3cb   :  { %v4339_v8 = vadd.f32 %v4338_v54, %v4337_v51  ;;  %v4230_v39 = vrot.slane %v4229_v44, 1  ;;  %v4250_v30 = vadd.f32 %v4249_v3, %v4248_v14  ;;  %v4381_v15 = vadd.f32 %v4380_v53, %v4379_v16  ;;  %v9871_v51 = vld [vmem:[#allocation34_spill] sm:$0xff] }
 0x3cc   :  { %v4189_v2 = vadd.f32 %v4188_v1, %v4187_v27  ;;  %v4209_v34 = vrot.slane %v4208_v38, 1  ;;  %v4401_v24 = vrot.slane %v4400_v36, 2  ;;  %v4360_v55 = vadd.f32 %v4359_v63, %v4358_v9  ;;  %v9866_v27 = vld [vmem:[#allocation32_spill] sm:$0xff] }
 0x3cd   :  { %v4340_v49 = vrot.slane %v4339_v8, 1  ;;  %v4231_v62 = vadd.f32 %v4230_v39, %v4229_v44  ;;  %v4251_v18 = vrot.slane %v4250_v30, 1  ;;  %v4382_v52 = vrot.slane %v4381_v15, 1 }
 0x3ce   :  { %v8914_v12 = vmul.f32 0.0078125, %v4189_v2  ;;  %v4210_v32 = vadd.f32 %v4209_v34, %v4208_v38  ;;  %v4402_v0 = vadd.f32 %v4401_v24, %v4400_v36  ;;  %v4361_v46 = vrot.slane %v4360_v55, 1 }
 0x3cf   :  { %v4341_v35 = vadd.f32 %v4340_v49, %v4339_v8  ;;  %v8916_v61 = vmul.f32 0.0078125, %v4231_v62  ;;  %v4252_v21 = vadd.f32 %v4251_v18, %v4250_v30  ;;  %v4383_v14 = vadd.f32 %v4382_v52, %v4381_v15  ;;  %v9865_v52 = vld [vmem:[#allocation40_spill] sm:$0xff] }
 0x3d0   :  { %v4409_v3 = vmul.f32 %v8914_v12, %v8914_v12  ;;  %v8922_v39 = vmul.f32 0.0078125, %v4210_v32  ;;  %v4362_v16 = vadd.f32 %v4361_v46, %v4360_v55  ;;  %v4403_v36 = vrot.slane %v4402_v0, 1 }
 0x3d1   :  { %v4405_v9 = vmul.f32 0.0078125, %v4341_v35  ;;  %v4411_v1 = vmul.f32 %v8916_v61, %v8916_v61  ;;  %v4407_v48 = vmul.f32 0.0078125, %v4383_v14  ;;  %v8932_v44 = vmul.f32 0.0078125, %v4252_v21  ;;  %v9876_v14 = vld [vmem:[#allocation35_spill] sm:$0xff] }
 0x3d2   :  { %v4410_v23 = vmul.f32 %v8922_v39, %v8922_v39  ;;  %v4406_v38 = vmul.f32 0.0078125, %v4362_v16  ;;  %v4404_v49 = vadd.f32 %v4403_v36, %v4402_v0  ;;  %v9867_v8 = vrot.slane %v9865_v52, %v9866_v27 }
 0x3d3   :  { %v4413_v53 = vsub.f32 %v4405_v9, %v4409_v3  ;;  %v4415_v63 = vsub.f32 %v4407_v48, %v4411_v1  ;;  %v4412_v30 = vmul.f32 %v8932_v44, %v8932_v44  ;;  %v9872_v2 = vrot.slane %v9865_v52, %v9871_v51 }
 0x3d4   :  { %v4414_v24 = vsub.f32 %v4406_v38, %v4410_v23  ;;  %v4408_v21 = vmul.f32 0.0078125, %v4404_v49  ;;  %v9850_v49 = vld [vmem:[#allocation10_spill] sm:$0xff]  ;;  %v9877_v3 = vrot.slane %v9865_v52, %v9876_v14  ;;  %v9878_v23 = vld [vmem:[#allocation20_spill] sm:$0xff] }
 0x3d5   :  { %v4417_v34 = vmax.f32 %v4413_v53, 0.0  ;;  %v4419_v55 = vmax.f32 %v4415_v63, 0.0 }
 0x3d6   :  { %v4418_v46 = vmax.f32 %v4414_v24, 0.0  ;;  %v4416_v48 = vsub.f32 %v4408_v21, %v4412_v30  ;;  %v9846_v21 = vld [vmem:[#allocation13_spill] sm:$0xff]  ;;  %v9854_v30 = vld [vmem:[#allocation47_spill] sm:$0xff] }
 0x3d7   :  { %v4421_v35 = vadd.f32 1e-05, %v4417_v34  ;;  %v4423_v0 = vadd.f32 1e-05, %v4419_v55  ;;  %v9851_v55 = vld [vmem:[#allocation41_spill] sm:$0xff]  ;;  %v9855_v34 = vld [vmem:[#allocation15_spill] sm:$0xff] }
 0x3d8   :  { %v4422_v16 = vadd.f32 1e-05, %v4418_v46  ;;  %v4420_v63 = vmax.f32 %v4416_v48, 0.0  ;;  %v9849_v48 = vld [vmem:[#allocation9_spill] sm:$0xff] }
 0x3d9   :  { %6548 = vrsqrt.f32 %v4421_v35  ;;  %v9853_v24 = vld [vmem:[#allocation29_spill] sm:$0xff] }
 0x3da   :  { %6550 = vrsqrt.f32 %v4423_v0  ;;  %v4424_v46 = vadd.f32 1e-05, %v4420_v63  ;;  %v9845_v63 = vld [vmem:[#allocation11_spill] sm:$0xff] }
 0x3db   :  { %6552 = vrsqrt.f32 %v4422_v16  ;;  %v9847_v0 = vld [vmem:[#allocation43_spill] sm:$0xff]  ;;  %v9848_v16 = vld [vmem:[#allocation8_spill] sm:$0xff] }
 0x3dc   :  { %6554 = vrsqrt.f32 %v4424_v46  ;;  %v9852_v46 = vld [vmem:[#allocation46_spill] sm:$0xff] }
 0x3e3   :  { %v6549_v38 = vpop.eup %6548 }
 0x3e4   :  { %v6551_v15 = vpop.eup %6550  ;;  %v4514_v35 = vmul.f32 %v6549_v38, %v9867_v8  ;;  %v9880_v8 = vld [vmem:[#allocation22_spill] sm:$0xff] }
 0x3e5   :  { %v6553_v62 = vpop.eup %6552  ;;  %v4516_v53 = vmul.f32 %v6551_v15, %v9872_v2  ;;  %v9879_v2 = vld [vmem:[#allocation24_spill] sm:$0xff] }
 0x3e6   :  { %v9049_v54 = vrot.slane %v4514_v35, %v9866_v27  ;;  %v4515_v18 = vmul.f32 %v6553_v62, %v9877_v3  ;;  %v9883_v62 = vsub.f32 %v8891_v22, %v8914_v12  ;;  %v9886_v35 = vsub.f32 %v8576_v33, %v8914_v12  ;;  %v6555_v32 = vpop.eup %6554 }
 0x3e7   :  { %v9059_v9 = vrot.slane %v4516_v53, %v9866_v27  ;;  %v9885_v53 = vsub.f32 %v8566_v11, %v8914_v12  ;;  %v9887_v22 = vsub.f32 %v8897_v4, %v8916_v61  ;;  %v9890_v11 = vsub.f32 %v8586_v37, %v8916_v61 }
 0x3e8   :  { %v9071_v3 = vmul.f32 %v9049_v54, %v9883_v62  ;;  %v9074_v14 = vrot.slane %v4515_v18, %v9866_v27  ;;  %v4538_v15 = vmul.f32 %v9049_v54, %v9886_v35  ;;  %v9889_v18 = vsub.f32 %v8568_v13, %v8916_v61  ;;  %v9894_v13 = vld [vmem:[#allocation36_spill] sm:$0xff] }
 0x3e9   :  { %v4534_v36 = vmul.f32 %v9049_v54, %v9885_v53  ;;  %v9088_v62 = vmul.f32 %v9059_v9, %v9887_v22  ;;  %v4540_v53 = vmul.f32 %v9059_v9, %v9890_v11  ;;  %v9891_v33 = vsub.f32 %v8606_v17, %v8914_v12 }
 0x3ea   :  { %9884 = vst [vmem:[#allocation11_spill] sm:$0xff] %v9071_v3  ;;  %v4536_v51 = vmul.f32 %v9059_v9, %v9889_v18  ;;  %v9892_v4 = vsub.f32 %v8899_v26, %v8922_v39  ;;  %v9896_v37 = vsub.f32 %v8570_v58, %v8922_v39  ;;  %v9897_v17 = vsub.f32 %v8588_v50, %v8922_v39  ;;  %v9898_v3 = vld [vmem:[#allocation37_spill] sm:$0xff] }
 0x3eb   :  { %9888 = vst [vmem:[#allocation13_spill] sm:$0xff] %v9088_v62  ;;  %v4542_v35 = vmul.f32 %v9049_v54, %v9891_v33  ;;  %v9895_v62 = vrot.slane %v9865_v52, %v9894_v13  ;;  %v4619_v38 = vadd.f32 %v9898_v3, %v4534_v36  ;;  %v4623_v26 = vadd.f32 %v9898_v3, %v4538_v15 }
 0x3ec   :  { %v9106_v22 = vmul.f32 %v9074_v14, %v9892_v4  ;;  %v4535_v11 = vmul.f32 %v9074_v14, %v9896_v37  ;;  %v4539_v33 = vmul.f32 %v9074_v14, %v9897_v17  ;;  %v9899_v4 = vld [vmem:[#allocation33_spill] sm:$0xff]  ;;  %v9901_v50 = vsub.f32 %v8613_v41, %v8922_v39 }
 0x3ed   :  { %v4517_v18 = vmul.f32 %v6555_v32, %v9895_v62  ;;  %v4625_v1 = vadd.f32 %v9899_v4, %v4540_v53  ;;  %v9900_v32 = vld [vmem:[#allocation39_spill] sm:$0xff]  ;;  %v4683_v37 = vmax.f32 %v4619_v38, 0.0  ;;  %v4687_v36 = vmax.f32 %v4623_v26, 0.0 }
 0x3ee   :  { %9893 = vst [vmem:[#allocation43_spill] sm:$0xff] %v9106_v22  ;;  %v4621_v22 = vadd.f32 %v9899_v4, %v4536_v51  ;;  %v4620_v58 = vadd.f32 %v9900_v32, %v4535_v11  ;;  %v4624_v62 = vadd.f32 %v9900_v32, %v4539_v33  ;;  %v4543_v13 = vmul.f32 %v9074_v14, %v9901_v50 }
 0x3ef   :  { %v9124_v52 = vrot.slane %v4517_v18, %v9866_v27  ;;  %v4689_v15 = vmax.f32 %v4625_v1, 0.0  ;;  %v9902_v51 = vsub.f32 %v8904_v59, %v8932_v44  ;;  %v9903_v11 = vsub.f32 %v8574_v5, %v8932_v44 }
 0x3f0   :  { %v4685_v17 = vmax.f32 %v4621_v22, 0.0  ;;  %v4684_v27 = vmax.f32 %v4620_v58, 0.0  ;;  %v4688_v18 = vmax.f32 %v4624_v62, 0.0  ;;  %v9904_v41 = vsub.f32 %v8598_v57, %v8932_v44  ;;  %v9906_v58 = vld [vmem:[#allocation49_spill] sm:$0xff] }
 0x3f1   :  { %v9136_v53 = vmul.f32 %v9124_v52, %v9902_v51  ;;  %v4537_v33 = vmul.f32 %v9124_v52, %v9903_v11  ;;  %v4747_v22 = vpack.c.bf16 %v4687_v36, %v4683_v37  ;;  %v9905_v59 = vsub.f32 %v8631_v43, %v8922_v39 }
 0x3f2   :  { %v4541_v38 = vmul.f32 %v9124_v52, %v9904_v41  ;;  %v4749_v1 = vpack.c.bf16 %v4689_v15, %v4685_v17  ;;  %v4748_v50 = vpack.c.bf16 %v4688_v18, %v4684_v27  ;;  %v4628_v51 = vadd.f32 %v9900_v32, %v4543_v13 }
 0x3f3   :  { %v4547_v26 = vmul.f32 %v9074_v14, %v9905_v59  ;;  %v4622_v62 = vadd.f32 %v9906_v58, %v4537_v33  ;;  %v9907_v5 = vsub.f32 %v8621_v45, %v8932_v44  ;;  %v9908_v36 = vsub.f32 %v8636_v29, %v8932_v44 }
 0x3f4   :  { %v4626_v57 = vadd.f32 %v9906_v58, %v4541_v38  ;;  %v9909_v17 = vsub.f32 %v8623_v6, %v8914_v12  ;;  %5074 = vmatprep.mubr.bf16.mxu0 %v4748_v50  ;;  %v4692_v27 = vmax.f32 %v4628_v51, 0.0  ;;  %v4627_v18 = vadd.f32 %v9898_v3, %v4542_v35 }
 0x3f5   :  { %v4545_v11 = vmul.f32 %v9124_v52, %v9907_v5  ;;  %v4632_v37 = vadd.f32 %v9900_v32, %v4547_v26  ;;  %v4549_v43 = vmul.f32 %v9124_v52, %v9908_v36  ;;  %v4686_v13 = vmax.f32 %v4622_v62, 0.0  ;;  %5075 = vmatmul.mubr.bf16.vlgmr.msra.gmra.mrb[64].mxu0 %v4747_v22 }
 0x3f6   :  { %v4546_v15 = vmul.f32 %v9049_v54, %v9909_v17  ;;  %v4690_v33 = vmax.f32 %v4626_v57, 0.0  ;;  %v4691_v26 = vmax.f32 %v4627_v18, 0.0  ;;  %v9910_v6 = vsub.f32 %v8611_v25, %v8916_v61 }
 0x3f7   :  { %v4630_v45 = vadd.f32 %v9906_v58, %v4545_v11  ;;  %v4696_v41 = vmax.f32 %v4632_v37, 0.0  ;;  %v4634_v38 = vadd.f32 %v9906_v58, %v4549_v43  ;;  %v9911_v62 = vsub.f32 %v8629_v7, %v8916_v61 }
 0x3f8   :  { %v4631_v29 = vadd.f32 %v9898_v3, %v4546_v15  ;;  %v4544_v50 = vmul.f32 %v9059_v9, %v9910_v6  ;;  %v4750_v35 = vpack.c.bf16 %v4690_v33, %v4686_v13  ;;  %v9912_v36 = vsub.f32 %v8653_v31, %v8922_v39 }
 0x3f9   :  { %v4694_v59 = vmax.f32 %v4630_v45, 0.0  ;;  %v4548_v51 = vmul.f32 %v9059_v9, %v9911_v62  ;;  %v4752_v5 = vpack.c.bf16 %v4696_v41, %v4692_v27  ;;  %v4698_v22 = vmax.f32 %v4634_v38, 0.0 }
 0x3fa   :  { %v4695_v11 = vmax.f32 %v4631_v29, 0.0  ;;  %v4629_v57 = vadd.f32 %v9899_v4, %v4544_v50  ;;  %v4551_v25 = vmul.f32 %v9074_v14, %v9912_v36  ;;  %v9913_v43 = vsub.f32 %v8671_v10, %v8922_v39  ;;  %5171 = vmatprep.mubr.bf16.mxu1 %v4750_v35 }
 0x3fb   :  { %v4633_v37 = vadd.f32 %v9899_v4, %v4548_v51  ;;  %5082 = vmatprep.mubr.bf16.mxu0 %v4752_v5  ;;  %v4754_v17 = vpack.c.bf16 %v4698_v22, %v4694_v59  ;;  %v9914_v13 = vsub.f32 %v8661_v60, %v8932_v44  ;;  %5172 = vmatmul.mubr.bf16.vlgmr.msra.gmra.mrb[64].mxu1 %v4749_v1 }
 0x3fc   :  { %v4555_v7 = vmul.f32 %v9074_v14, %v9913_v43  ;;  %v4751_v15 = vpack.c.bf16 %v4695_v11, %v4691_v26  ;;  %v4693_v45 = vmax.f32 %v4629_v57, 0.0  ;;  %v4636_v31 = vadd.f32 %v9900_v32, %v4551_v25 }
 0x3fd   :  { %v4553_v27 = vmul.f32 %v9124_v52, %v9914_v13  ;;  %v4697_v18 = vmax.f32 %v4633_v37, 0.0  ;;  %5179 = vmatprep.mubr.bf16.mxu1 %v4754_v17  ;;  %v9915_v10 = vsub.f32 %v8676_v20, %v8932_v44  ;;  %v9916_v60 = vsub.f32 %v8646_v40, %v8914_v12 }
 0x3fe   :  { %v4640_v33 = vadd.f32 %v9900_v32, %v4555_v7  ;;  %v9917_v1 = vsub.f32 %v8663_v47, %v8914_v12  ;;  %v4700_v6 = vmax.f32 %v4636_v31, 0.0  ;;  %v9918_v20 = vsub.f32 %v8651_v28, %v8916_v61  ;;  %5083 = vmatmul.mubr.bf16.gmra.mrb[68].mxu0 %v4751_v15 }
 0x3ff   :  { %v4557_v41 = vmul.f32 %v9124_v52, %v9915_v10  ;;  %v4638_v38 = vadd.f32 %v9906_v58, %v4553_v27  ;;  %v4550_v29 = vmul.f32 %v9049_v54, %v9916_v60  ;;  %v4753_v26 = vpack.c.bf16 %v4697_v18, %v4693_v45 }
 0x400   :  { %v4554_v59 = vmul.f32 %v9049_v54, %v9917_v1  ;;  %v4704_v50 = vmax.f32 %v4640_v33, 0.0  ;;  %v4552_v62 = vmul.f32 %v9059_v9, %v9918_v20  ;;  %v9919_v47 = vsub.f32 %v8669_v19, %v8916_v61 }
 0x401   :  { %v4642_v51 = vadd.f32 %v9906_v58, %v4557_v41  ;;  %v4702_v35 = vmax.f32 %v4638_v38, 0.0  ;;  %v4635_v40 = vadd.f32 %v9898_v3, %v4550_v29  ;;  %v9920_v28 = vsub.f32 %v8693_v56, %v8922_v39 }
 0x402   :  { %v4639_v5 = vadd.f32 %v9898_v3, %v4554_v59  ;;  %v4756_v22 = vpack.c.bf16 %v4704_v50, %v4700_v6  ;;  %v4556_v11 = vmul.f32 %v9059_v9, %v9919_v47  ;;  %v4637_v57 = vadd.f32 %v9899_v4, %v4552_v62 }
 0x403   :  { %v4559_v37 = vmul.f32 %v9074_v14, %v9920_v28  ;;  %v4706_v36 = vmax.f32 %v4642_v51, 0.0  ;;  %v4699_v25 = vmax.f32 %v4635_v40, 0.0  ;;  %v9921_v7 = vsub.f32 %v8711_v42, %v8922_v39  ;;  %5180 = vmatmul.mubr.bf16.gmra.mrb[68].mxu1 %v4753_v26 }
 0x404   :  { %v4703_v43 = vmax.f32 %v4639_v5, 0.0  ;;  %5090 = vmatprep.mubr.bf16.mxu0 %v4756_v22  ;;  %v4641_v19 = vadd.f32 %v9899_v4, %v4556_v11  ;;  %v4701_v15 = vmax.f32 %v4637_v57, 0.0  ;;  %v9922_v27 = vsub.f32 %v9845_v63, %v8932_v44 }
 0x405   :  { %v4563_v17 = vmul.f32 %v9074_v14, %v9921_v7  ;;  %v4644_v13 = vadd.f32 %v9900_v32, %v4559_v37  ;;  %v4758_v45 = vpack.c.bf16 %v4706_v36, %v4702_v35  ;;  %v9923_v42 = vsub.f32 %v9846_v21, %v8932_v44 }
 0x406   :  { %v4561_v56 = vmul.f32 %v9124_v52, %v9922_v27  ;;  %v4755_v18 = vpack.c.bf16 %v4703_v43, %v4699_v25  ;;  %v4705_v10 = vmax.f32 %v4641_v19, 0.0  ;;  %v9924_v60 = vsub.f32 %v9847_v0, %v8914_v12 }
 0x407   :  { %v4648_v31 = vadd.f32 %v9900_v32, %v4563_v17  ;;  %v4565_v33 = vmul.f32 %v9124_v52, %v9923_v42  ;;  %v4708_v41 = vmax.f32 %v4644_v13, 0.0  ;;  %5187 = vmatprep.mubr.bf16.mxu1 %v4758_v45  ;;  %v9925_v59 = vsub.f32 %v9848_v16, %v8914_v12 }
 0x408   :  { %v4646_v38 = vadd.f32 %v9906_v58, %v4561_v56  ;;  %v4558_v63 = vmul.f32 %v9049_v54, %v9924_v60  ;;  %v9926_v26 = vsub.f32 %v9849_v48, %v8916_v61  ;;  %v4757_v50 = vpack.c.bf16 %v4705_v10, %v4701_v15  ;;  %5091 = vmatmul.mubr.bf16.gmra.mrb[72].mxu0 %v4755_v18  ;;  %v9933_v56 = vld [vmem:[#allocation28_spill] sm:$0xff] }
 0x409   :  { %v4712_v29 = vmax.f32 %v4648_v31, 0.0  ;;  %v4650_v1 = vadd.f32 %v9906_v58, %v4565_v33  ;;  %v4562_v21 = vmul.f32 %v9049_v54, %v9925_v59  ;;  %v9927_v62 = vsub.f32 %v9850_v49, %v8916_v61  ;;  %v9937_v59 = vld [vmem:[#allocation42_spill] sm:$0xff] }
 0x40a   :  { %v4560_v6 = vmul.f32 %v9059_v9, %v9926_v26  ;;  %v4710_v20 = vmax.f32 %v4646_v38, 0.0  ;;  %v4643_v0 = vadd.f32 %v9898_v3, %v4558_v63  ;;  %v9928_v47 = vsub.f32 %v9851_v55, %v8922_v39 }
 0x40b   :  { %v4564_v51 = vmul.f32 %v9059_v9, %v9927_v62  ;;  %v4760_v35 = vpack.c.bf16 %v4712_v29, %v4708_v41  ;;  %v4714_v40 = vmax.f32 %v4650_v1, 0.0  ;;  %v4647_v16 = vadd.f32 %v9898_v3, %v4562_v21  ;;  %5188 = vmatmul.mubr.bf16.gmra.mrb[72].mxu1 %v4757_v50 }
 0x40c   :  { %v4645_v5 = vadd.f32 %v9899_v4, %v4560_v6  ;;  %v4707_v22 = vmax.f32 %v4643_v0, 0.0  ;;  %v4567_v11 = vmul.f32 %v9074_v14, %v9928_v47  ;;  %v9929_v49 = vsub.f32 %v9852_v46, %v8922_v39  ;;  %v9939_v6 = vld [vmem:[#allocation17_spill] sm:$0xff]  ;;  %v9943_v47 = vld [vmem:[#allocation19_spill] sm:$0xff] }
 0x40d   :  { %v4649_v48 = vadd.f32 %v9899_v4, %v4564_v51  ;;  %5098 = vmatprep.mubr.bf16.mxu0 %v4760_v35  ;;  %v4762_v28 = vpack.c.bf16 %v4714_v40, %v4710_v20  ;;  %v4711_v37 = vmax.f32 %v4647_v16, 0.0  ;;  %v9930_v25 = vsub.f32 %v9853_v24, %v8932_v44  ;;  %v9941_v35 = vld [vmem:[#allocation21_spill] sm:$0xff] }
 0x40e   :  { %v4571_v57 = vmul.f32 %v9074_v14, %v9929_v49  ;;  %v4709_v36 = vmax.f32 %v4645_v5, 0.0  ;;  %v4652_v17 = vadd.f32 %v9900_v32, %v4567_v11  ;;  %v9931_v19 = vsub.f32 %v9854_v30, %v8932_v44 }
 0x40f   :  { %v4569_v43 = vmul.f32 %v9124_v52, %v9930_v25  ;;  %v4713_v7 = vmax.f32 %v4649_v48, 0.0  ;;  %v4759_v15 = vpack.c.bf16 %v4711_v37, %v4707_v22  ;;  %v9932_v27 = vsub.f32 %v9855_v34, %v8914_v12  ;;  %5195 = vmatprep.mubr.bf16.mxu1 %v4762_v28  ;;  %v9935_v34 = vld [vmem:[#allocation12_spill] sm:$0xff] }
 0x410   :  { %v4656_v55 = vadd.f32 %v9900_v32, %v4571_v57  ;;  %v4573_v46 = vmul.f32 %v9124_v52, %v9931_v19  ;;  %v9934_v45 = vsub.f32 %v9933_v56, %v8914_v12  ;;  %v4716_v42 = vmax.f32 %v4652_v17, 0.0  ;;  %v9947_v19 = vld [vmem:[#allocation45_spill] sm:$0xff] }
 0x411   :  { %v4654_v13 = vadd.f32 %v9906_v58, %v4569_v43  ;;  %v4566_v24 = vmul.f32 %v9049_v54, %v9932_v27  ;;  %v4761_v31 = vpack.c.bf16 %v4713_v7, %v4709_v36  ;;  %v9936_v60 = vsub.f32 %v9935_v34, %v8916_v61  ;;  %5099 = vmatmul.mubr.bf16.gmra.mrb[76].mxu0 %v4759_v15  ;;  %v9945_v36 = vld [vmem:[#allocation23_spill] sm:$0xff] }
 0x412   :  { %v4570_v18 = vmul.f32 %v9049_v54, %v9934_v45  ;;  %v4720_v33 = vmax.f32 %v4656_v55, 0.0  ;;  %v4658_v30 = vadd.f32 %v9906_v58, %v4573_v46  ;;  %v9938_v21 = vsub.f32 %v9937_v59, %v8916_v61 }
 0x413   :  { %v4718_v10 = vmax.f32 %v4654_v13, 0.0  ;;  %v4651_v41 = vadd.f32 %v9898_v3, %v4566_v24  ;;  %v4568_v63 = vmul.f32 %v9059_v9, %v9936_v60  ;;  %v9940_v50 = vsub.f32 %v9939_v6, %v8922_v39  ;;  %v9949_v24 = vld [vmem:[#allocation16_spill] sm:$0xff]  ;;  %5196 = vmatmul.mubr.bf16.gmra.mrb[76].mxu1 %v4761_v31  ;;  %v9955_v31 = vld [vmem:[#allocation25_spill] sm:$0xff] }
 0x414   :  { %v4655_v38 = vadd.f32 %v9898_v3, %v4570_v18  ;;  %v4764_v29 = vpack.c.bf16 %v4720_v33, %v4716_v42  ;;  %v4722_v1 = vmax.f32 %v4658_v30, 0.0  ;;  %v4572_v26 = vmul.f32 %v9059_v9, %v9938_v21  ;;  %v9951_v18 = vld [vmem:[#allocation14_spill] sm:$0xff] }
 0x415   :  { %v4575_v20 = vmul.f32 %v9074_v14, %v9940_v50  ;;  %v4715_v0 = vmax.f32 %v4651_v41, 0.0  ;;  %v4653_v51 = vadd.f32 %v9899_v4, %v4568_v63  ;;  %v9942_v40 = vsub.f32 %v9941_v35, %v8922_v39 }
 0x416   :  { %v4719_v62 = vmax.f32 %v4655_v38, 0.0  ;;  %5106 = vmatprep.mubr.bf16.mxu0 %v4764_v29  ;;  %v4766_v5 = vpack.c.bf16 %v4722_v1, %v4718_v10  ;;  %v4657_v22 = vadd.f32 %v9899_v4, %v4572_v26  ;;  %v9944_v11 = vsub.f32 %v9943_v47, %v8932_v44  ;;  %v9953_v38 = vld [vmem:[#allocation18_spill] sm:$0xff] }
 0x417   :  { %v4579_v16 = vmul.f32 %v9074_v14, %v9942_v40  ;;  %v4660_v48 = vadd.f32 %v9900_v32, %v4575_v20  ;;  %v4717_v28 = vmax.f32 %v4653_v51, 0.0  ;;  %v9946_v25 = vsub.f32 %v9945_v36, %v8932_v44  ;;  %v9957_v20 = vld [vmem:[#allocation31_spill] sm:$0xff] }
 0x418   :  { %v4577_v49 = vmul.f32 %v9124_v52, %v9944_v11  ;;  %v4763_v57 = vpack.c.bf16 %v4719_v62, %v4715_v0  ;;  %v4721_v7 = vmax.f32 %v4657_v22, 0.0  ;;  %v9948_v46 = vsub.f32 %v9947_v19, %v8914_v12  ;;  %5203 = vmatprep.mubr.bf16.mxu1 %v4766_v5 }
 0x419   :  { %v4664_v37 = vadd.f32 %v9900_v32, %v4579_v16  ;;  %v4581_v43 = vmul.f32 %v9124_v52, %v9946_v25  ;;  %v4724_v17 = vmax.f32 %v4660_v48, 0.0  ;;  %v9950_v56 = vsub.f32 %v9949_v24, %v8914_v12  ;;  %v9959_v16 = vld [vmem:[#allocation27_spill] sm:$0xff] }
 0x41a   :  { %v4662_v55 = vadd.f32 %v9906_v58, %v4577_v49  ;;  %v4574_v15 = vmul.f32 %v9049_v54, %v9948_v46  ;;  %v9952_v42 = vsub.f32 %v9951_v18, %v8916_v61  ;;  %v4765_v30 = vpack.c.bf16 %v4721_v7, %v4717_v28  ;;  %5107 = vmatmul.mubr.bf16.gmra.mrb[80].mxu0 %v4763_v57  ;;  %v9961_v49 = vld [vmem:[#allocation30_spill] sm:$0xff] }
 0x41b   :  { %v4728_v13 = vmax.f32 %v4664_v37, 0.0  ;;  %v4666_v27 = vadd.f32 %v9906_v58, %v4581_v43  ;;  %v4578_v45 = vmul.f32 %v9049_v54, %v9950_v56  ;;  %v9954_v34 = vsub.f32 %v9953_v38, %v8916_v61  ;;  %v9966_v18 = vld [vmem:[#allocation26_spill] sm:$0xff] }
 0x41c   :  { %v4576_v33 = vmul.f32 %v9059_v9, %v9952_v42  ;;  %v4726_v10 = vmax.f32 %v4662_v55, 0.0  ;;  %v4659_v41 = vadd.f32 %v9898_v3, %v4574_v15  ;;  %v9956_v6 = vsub.f32 %v9955_v31, %v8922_v39  ;;  %5204 = vmatmul.mubr.bf16.gmra.mrb[80].mxu1 %v4765_v30 }
 0x41d   :  { %v4580_v60 = vmul.f32 %v9059_v9, %v9954_v34  ;;  %v4768_v63 = vpack.c.bf16 %v4728_v13, %v4724_v17  ;;  %v4730_v29 = vmax.f32 %v4666_v27, 0.0  ;;  %v4663_v1 = vadd.f32 %v9898_v3, %v4578_v45 }
 0x41e   :  { %v4661_v59 = vadd.f32 %v9899_v4, %v4576_v33  ;;  %v4723_v21 = vmax.f32 %v4659_v41, 0.0  ;;  %v4583_v50 = vmul.f32 %v9074_v14, %v9956_v6  ;;  %v9958_v0 = vsub.f32 %v9957_v20, %v8922_v39 }
 0x41f   :  { %v4665_v26 = vadd.f32 %v9899_v4, %v4580_v60  ;;  %v4770_v51 = vpack.c.bf16 %v4730_v29, %v4726_v10  ;;  %v4727_v35 = vmax.f32 %v4663_v1, 0.0  ;;  %v9960_v5 = vsub.f32 %v9959_v16, %v8932_v44  ;;  %5114 = vmatprep.mubr.bf16.mxu0 %v4768_v63  ;;  %v9968_v10 = vld [vmem:[#allocation38_spill] sm:$0xff]  ;;  %v9970_v63 = vld [vmem:[#allocation43_spill] sm:$0xff] }
 0x420   :  { %v4587_v62 = vmul.f32 %v9074_v14, %v9958_v0  ;;  %v4725_v40 = vmax.f32 %v4661_v59, 0.0  ;;  %v4668_v47 = vadd.f32 %v9900_v32, %v4583_v50  ;;  %v9962_v28 = vsub.f32 %v9961_v49, %v8932_v44 }
 0x421   :  { %v4585_v22 = vmul.f32 %v9124_v52, %v9960_v5  ;;  %v4729_v48 = vmax.f32 %v4665_v26, 0.0  ;;  %v4767_v57 = vpack.c.bf16 %v4727_v35, %v4723_v21  ;;  %v9963_v25 = vsub.f32 %v9878_v23, %v8914_v12  ;;  %5211 = vmatprep.mubr.bf16.mxu1 %v4770_v51  ;;  %v9971_v21 = vld [vmem:[#allocation50_spill] sm:$0xff]  ;;  %v9975_v5 = vld [vmem:[#allocation13_spill] sm:$0xff] }
 0x422   :  { %v4672_v11 = vadd.f32 %v9900_v32, %v4587_v62  ;;  %v4589_v37 = vmul.f32 %v9124_v52, %v9962_v28  ;;  %v9964_v7 = vsub.f32 %v9879_v2, %v8914_v12  ;;  %v4732_v19 = vmax.f32 %v4668_v47, 0.0  ;;  %v9972_v62 = vld [vmem:[#allocation48_spill] sm:$0xff] }
 0x423   :  { %v4670_v36 = vadd.f32 %v9906_v58, %v4585_v22  ;;  %v4582_v43 = vmul.f32 %v9049_v54, %v9963_v25  ;;  %v4769_v55 = vpack.c.bf16 %v4729_v48, %v4725_v40  ;;  %v9965_v23 = vsub.f32 %v9880_v8, %v8916_v61  ;;  %5115 = vmatmul.mubr.bf16.gmra.mrb[84].mxu0 %v4767_v57 }
 0x424   :  { %v4586_v17 = vmul.f32 %v9049_v54, %v9964_v7  ;;  %v4736_v46 = vmax.f32 %v4672_v11, 0.0  ;;  %v4674_v15 = vadd.f32 %v9906_v58, %v4589_v37  ;;  %v9967_v42 = vsub.f32 %v9966_v18, %v8916_v61 }
 0x425   :  { %v4734_v13 = vmax.f32 %v4670_v36, 0.0  ;;  %v4667_v27 = vadd.f32 %v9898_v3, %v4582_v43  ;;  %v4584_v56 = vmul.f32 %v9059_v9, %v9965_v23  ;;  %v9969_v41 = vsub.f32 %v9968_v10, %v8922_v39  ;;  %5212 = vmatmul.mubr.bf16.gmra.mrb[84].mxu1 %v4769_v55 }
 0x426   :  { %v4671_v24 = vadd.f32 %v9898_v3, %v4586_v17  ;;  %v4772_v45 = vpack.c.bf16 %v4736_v46, %v4732_v19  ;;  %v4738_v2 = vmax.f32 %v4674_v15, 0.0  ;;  %v4588_v33 = vmul.f32 %v9059_v9, %v9967_v42 }
 0x427   :  { %v4591_v38 = vmul.f32 %v9074_v14, %v9969_v41  ;;  %v4731_v34 = vmax.f32 %v4667_v27, 0.0  ;;  %v4669_v8 = vadd.f32 %v9899_v4, %v4584_v56  ;;  %v4680_v30 = vadd.f32 %v9900_v32, %v9970_v63 }
 0x428   :  { %v4735_v60 = vmax.f32 %v4671_v24, 0.0  ;;  %v4774_v29 = vpack.c.bf16 %v4738_v2, %v4734_v13  ;;  %v4673_v1 = vadd.f32 %v9899_v4, %v4588_v33  ;;  %v4488_v26 = vsub.f32 %v9971_v21, %v8932_v44  ;;  %5122 = vmatprep.mubr.bf16.mxu0 %v4772_v45  ;;  %v9974_v44 = vld [vmem:[#allocation44_spill] sm:$0xff] }
 0x429   :  { %v4676_v59 = vadd.f32 %v9900_v32, %v4591_v38  ;;  %v4733_v31 = vmax.f32 %v4669_v8, 0.0  ;;  %v4744_v14 = vmax.f32 %v4680_v30, 0.0  ;;  %v4682_v6 = vadd.f32 %v9906_v58, %v9136_v53  ;;  %v9973_v32 = vld [vmem:[#allocation11_spill] sm:$0xff] }
 0x42a   :  { %v4771_v39 = vpack.c.bf16 %v4735_v60, %v4731_v34  ;;  %v4737_v50 = vmax.f32 %v4673_v1, 0.0  ;;  %v4593_v0 = vmul.f32 %v9124_v52, %v4488_v26  ;;  %v4485_v51 = vsub.f32 %v9972_v62, %v8914_v12  ;;  %5219 = vmatprep.mubr.bf16.mxu1 %v4774_v29 }
 0x42b   :  { %v4740_v20 = vmax.f32 %v4676_v59, 0.0  ;;  %v4746_v35 = vmax.f32 %v4682_v6, 0.0  ;;  %v4679_v40 = vadd.f32 %v9898_v3, %v9973_v32  ;;  %v4487_v16 = vsub.f32 %v9974_v44, %v8916_v61 }
 0x42c   :  { %v4681_v22 = vadd.f32 %v9899_v4, %v9975_v5  ;;  %v4773_v48 = vpack.c.bf16 %v4737_v50, %v4733_v31  ;;  %v4678_v47 = vadd.f32 %v9906_v58, %v4593_v0  ;;  %v4590_v11 = vmul.f32 %v9049_v54, %v4485_v51  ;;  %5123 = vmatmul.mubr.bf16.gmra.mrb[88].mxu0 %v4771_v39 }
 0x42d   :  { %v4776_v53 = vpack.c.bf16 %v4744_v14, %v4740_v20  ;;  %v4592_v52 = vmul.f32 %v9059_v9, %v4487_v16  ;;  %v4743_v28 = vmax.f32 %v4679_v40, 0.0 }
 0x42e   :  { %v4742_v12 = vmax.f32 %v4678_v47, 0.0  ;;  %v4675_v49 = vadd.f32 %v9898_v3, %v4590_v11  ;;  %v4745_v61 = vmax.f32 %v4681_v22, 0.0  ;;  %5220 = vmatmul.mubr.bf16.gmra.mrb[88].mxu1 %v4773_v48  ;;  %v9408_v3 = vld [vmem:[%s9482_s8] ss:$0 sm:$0xff] }
 0x42f   :  { %v4677_v37 = vadd.f32 %v9899_v4, %v4592_v52  ;;  %5130 = vmatprep.mubr.bf16.mxu0 %v4776_v53 }
 0x430   :  { %v4778_v57 = vpack.c.bf16 %v4746_v35, %v4742_v12  ;;  %v4739_v36 = vmax.f32 %v4675_v49, 0.0 }
 0x431   :  { %v4741_v25 = vmax.f32 %v4677_v37, 0.0 }
 0x432   :  { %v4775_v43 = vpack.c.bf16 %v4743_v28, %v4739_v36  ;;  %5227 = vmatprep.mubr.bf16.mxu1 %v4778_v57 }
 0x433   :  { %v4777_v58 = vpack.c.bf16 %v4745_v61, %v4741_v25 }
 0x434   :  { %5131 = vmatmul.mubr.bf16.gmra.mrb[92].mxu0 %v4775_v43 }
 0x436   :  { %5228 = vmatmul.mubr.bf16.gmra.mrb[92].mxu1 %v4777_v58 }
 0x4c8   :  { %v5647_v54 = vpop.f32.mrb[64].mxu0 }
 0x4c9   :  { %v5648_v9 = vpop.f32.mrb[65].mxu0 }
 0x4ca   :  { %v5649_v4 = vadd.f32 %v5648_v9, %v5647_v54  ;;  %v5650_v7 = vpop.f32.mrb[66].mxu0 }
 0x4cb   :  { %v5651_v17 = vpop.f32.mrb[67].mxu0 }
 0x4cc   :  { %v5652_v55 = vadd.f32 %v5651_v17, %v5650_v7  ;;  %v5077_v46 = vadd.f32 %v5649_v4, %v9408_v3 }
 0x4ce   :  { %v5711_v19 = vpop.f32.mrb[64].mxu1  ;;  %v5080_v24 = vadd.f32 %v5652_v55, %v9408_v3 }
 0x4cf   :  { %v5712_v15 = vpop.f32.mrb[65].mxu1 }
 0x4d0   :  { %v5713_v13 = vadd.f32 %v5712_v15, %v5711_v19  ;;  %v5714_v27 = vpop.f32.mrb[66].mxu1 }
 0x4d1   :  { %v5715_v23 = vpop.f32.mrb[67].mxu1  ;;  %v5653_v56 = vpop.f32.mrb[68].mxu0 }
 0x4d2   :  { %v5174_v45 = vadd.f32 %v5713_v13, %v5077_v46  ;;  %v5716_v2 = vadd.f32 %v5715_v23, %v5714_v27  ;;  %v5654_v18 = vpop.f32.mrb[69].mxu0 }
 0x4d3   :  { %v5655_v42 = vadd.f32 %v5654_v18, %v5653_v56  ;;  %v5656_v33 = vpop.f32.mrb[70].mxu0 }
 0x4d4   :  { %5236 = vst [vmem:[%s9483_s9] sm:$0xff] %v5174_v45  ;;  %v5177_v10 = vadd.f32 %v5716_v2, %v5080_v24  ;;  %v5657_v41 = vpop.f32.mrb[71].mxu0 }
 0x4d5   :  { %v5658_v38 = vadd.f32 %v5657_v41, %v5656_v33  ;;  %v5085_v60 = vadd.f32 %v5655_v42, %v9408_v3 }
 0x4d6   :  { %5237 = vst [vmem:[%s9483_s9 + $0x8] sm:$0xff] %v5177_v10  ;;  %v5717_v34 = vpop.f32.mrb[68].mxu1 }
 0x4d7   :  { %v5718_v8 = vpop.f32.mrb[69].mxu1  ;;  %v5088_v29 = vadd.f32 %v5658_v38, %v9408_v3 }
 0x4d8   :  { %v5719_v63 = vadd.f32 %v5718_v8, %v5717_v34  ;;  %v5720_v30 = vpop.f32.mrb[70].mxu1 }
 0x4d9   :  { %v5721_v1 = vpop.f32.mrb[71].mxu1 }
 0x4da   :  { %v5182_v21 = vadd.f32 %v5719_v63, %v5085_v60  ;;  %v5722_v26 = vadd.f32 %v5721_v1, %v5720_v30 }
 0x4db   :  { %v5659_v59 = vpop.f32.mrb[72].mxu0 }
 0x4dc   :  { %v5660_v39 = vpop.f32.mrb[73].mxu0  ;;  %5238 = vst [vmem:[%s9483_s9 + $0x10] sm:$0xff] %v5182_v21  ;;  %v5185_v6 = vadd.f32 %v5722_v26, %v5088_v29 }
 0x4dd   :  { %v5661_v31 = vadd.f32 %v5660_v39, %v5659_v59  ;;  %v5662_v14 = vpop.f32.mrb[74].mxu0 }
 0x4de   :  { %v5663_v50 = vpop.f32.mrb[75].mxu0  ;;  %5239 = vst [vmem:[%s9483_s9 + $0x18] sm:$0xff] %v5185_v6  ;;  %v5723_v0 = vpop.f32.mrb[72].mxu1 }
 0x4df   :  { %v5664_v20 = vadd.f32 %v5663_v50, %v5662_v14  ;;  %v5093_v62 = vadd.f32 %v5661_v31, %v9408_v3  ;;  %v5724_v51 = vpop.f32.mrb[73].mxu1 }
 0x4e0   :  { %v5725_v35 = vadd.f32 %v5724_v51, %v5723_v0  ;;  %v5726_v32 = vpop.f32.mrb[74].mxu1 }
 0x4e1   :  { %v5096_v40 = vadd.f32 %v5664_v20, %v9408_v3  ;;  %v5727_v44 = vpop.f32.mrb[75].mxu1 }
 0x4e2   :  { %v5190_v5 = vadd.f32 %v5725_v35, %v5093_v62  ;;  %v5728_v22 = vadd.f32 %v5727_v44, %v5726_v32 }
 0x4e4   :  { %v5665_v16 = vpop.f32.mrb[76].mxu0  ;;  %5240 = vst [vmem:[%s9483_s9 + $0x20] sm:$0xff] %v5190_v5  ;;  %v5193_v11 = vadd.f32 %v5728_v22, %v5096_v40 }
 0x4e5   :  { %v5666_v48 = vpop.f32.mrb[77].mxu0 }
 0x4e6   :  { %v5667_v53 = vadd.f32 %v5666_v48, %v5665_v16  ;;  %v5668_v47 = vpop.f32.mrb[78].mxu0  ;;  %5241 = vst [vmem:[%s9483_s9 + $0x28] sm:$0xff] %v5193_v11  ;;  %v5729_v49 = vpop.f32.mrb[76].mxu1 }
 0x4e7   :  { %v5669_v52 = vpop.f32.mrb[79].mxu0  ;;  %v5730_v37 = vpop.f32.mrb[77].mxu1 }
 0x4e8   :  { %v5670_v12 = vadd.f32 %v5669_v52, %v5668_v47  ;;  %v5101_v28 = vadd.f32 %v5667_v53, %v9408_v3  ;;  %v5731_v61 = vadd.f32 %v5730_v37, %v5729_v49  ;;  %v5732_v57 = vpop.f32.mrb[78].mxu1 }
 0x4e9   :  { %v5733_v25 = vpop.f32.mrb[79].mxu1 }
 0x4ea   :  { %v5104_v36 = vadd.f32 %v5670_v12, %v9408_v3  ;;  %v5198_v58 = vadd.f32 %v5731_v61, %v5101_v28  ;;  %v5734_v54 = vadd.f32 %v5733_v25, %v5732_v57 }
 0x4ec   :  { %5242 = vst [vmem:[%s9483_s9 + $0x30] sm:$0xff] %v5198_v58  ;;  %v5201_v17 = vadd.f32 %v5734_v54, %v5104_v36 }
 0x4ed   :  { %v5671_v43 = vpop.f32.mrb[80].mxu0 }
 0x4ee   :  { %v5672_v9 = vpop.f32.mrb[81].mxu0  ;;  %5243 = vst [vmem:[%s9483_s9 + $0x38] sm:$0xff] %v5201_v17 }
 0x4ef   :  { %v5673_v4 = vadd.f32 %v5672_v9, %v5671_v43  ;;  %v5674_v7 = vpop.f32.mrb[82].mxu0  ;;  %v5735_v46 = vpop.f32.mrb[80].mxu1 }
 0x4f0   :  { %v5675_v55 = vpop.f32.mrb[83].mxu0  ;;  %v5736_v13 = vpop.f32.mrb[81].mxu1 }
 0x4f1   :  { %v5676_v19 = vadd.f32 %v5675_v55, %v5674_v7  ;;  %v5109_v15 = vadd.f32 %v5673_v4, %v9408_v3  ;;  %v5737_v27 = vadd.f32 %v5736_v13, %v5735_v46  ;;  %v5738_v24 = vpop.f32.mrb[82].mxu1 }
 0x4f2   :  { %v5739_v56 = vpop.f32.mrb[83].mxu1 }
 0x4f3   :  { %v5112_v23 = vadd.f32 %v5676_v19, %v9408_v3  ;;  %v5206_v2 = vadd.f32 %v5737_v27, %v5109_v15  ;;  %v5740_v18 = vadd.f32 %v5739_v56, %v5738_v24 }
 0x4f5   :  { %5244 = vst [vmem:[%s9483_s9 + $0x40] sm:$0xff] %v5206_v2  ;;  %v5209_v41 = vadd.f32 %v5740_v18, %v5112_v23 }
 0x4f6   :  { %v5677_v45 = vpop.f32.mrb[84].mxu0 }
 0x4f7   :  { %v5678_v42 = vpop.f32.mrb[85].mxu0  ;;  %5245 = vst [vmem:[%s9483_s9 + $0x48] sm:$0xff] %v5209_v41 }
 0x4f8   :  { %v5679_v33 = vadd.f32 %v5678_v42, %v5677_v45  ;;  %v5680_v10 = vpop.f32.mrb[86].mxu0  ;;  %v5741_v60 = vpop.f32.mrb[84].mxu1 }
 0x4f9   :  { %v5681_v38 = vpop.f32.mrb[87].mxu0  ;;  %v5742_v63 = vpop.f32.mrb[85].mxu1 }
 0x4fa   :  { %v5682_v34 = vadd.f32 %v5681_v38, %v5680_v10  ;;  %v5117_v8 = vadd.f32 %v5679_v33, %v9408_v3  ;;  %v5743_v30 = vadd.f32 %v5742_v63, %v5741_v60  ;;  %v5744_v29 = vpop.f32.mrb[86].mxu1 }
 0x4fb   :  { %v5745_v59 = vpop.f32.mrb[87].mxu1 }
 0x4fc   :  { %v5120_v1 = vadd.f32 %v5682_v34, %v9408_v3  ;;  %v5214_v26 = vadd.f32 %v5743_v30, %v5117_v8  ;;  %v5746_v39 = vadd.f32 %v5745_v59, %v5744_v29 }
 0x4fe   :  { %5246 = vst [vmem:[%s9483_s9 + $0x50] sm:$0xff] %v5214_v26  ;;  %v5217_v50 = vadd.f32 %v5746_v39, %v5120_v1 }
 0x4ff   :  { %v5683_v21 = vpop.f32.mrb[88].mxu0 }
 0x500   :  { %v5684_v31 = vpop.f32.mrb[89].mxu0  ;;  %5247 = vst [vmem:[%s9483_s9 + $0x58] sm:$0xff] %v5217_v50 }
 0x501   :  { %v5685_v14 = vadd.f32 %v5684_v31, %v5683_v21  ;;  %v5686_v6 = vpop.f32.mrb[90].mxu0  ;;  %v5747_v62 = vpop.f32.mrb[88].mxu1 }
 0x502   :  { %v5687_v20 = vpop.f32.mrb[91].mxu0  ;;  %v5748_v35 = vpop.f32.mrb[89].mxu1 }
 0x503   :  { %v5688_v0 = vadd.f32 %v5687_v20, %v5686_v6  ;;  %v5125_v51 = vadd.f32 %v5685_v14, %v9408_v3  ;;  %v5749_v32 = vadd.f32 %v5748_v35, %v5747_v62  ;;  %v5750_v40 = vpop.f32.mrb[90].mxu1 }
 0x504   :  { %v5751_v16 = vpop.f32.mrb[91].mxu1 }
 0x505   :  { %v5128_v44 = vadd.f32 %v5688_v0, %v9408_v3  ;;  %v5222_v22 = vadd.f32 %v5749_v32, %v5125_v51  ;;  %v5752_v48 = vadd.f32 %v5751_v16, %v5750_v40 }
 0x507   :  { %v5689_v5 = vpop.f32.mrb[92].mxu0  ;;  %5248 = vst [vmem:[%s9483_s9 + $0x60] sm:$0xff] %v5222_v22  ;;  %v5225_v52 = vadd.f32 %v5752_v48, %v5128_v44 }
 0x508   :  { %v5690_v53 = vpop.f32.mrb[93].mxu0 }
 0x509   :  { %v5691_v47 = vadd.f32 %v5690_v53, %v5689_v5  ;;  %v5692_v11 = vpop.f32.mrb[94].mxu0  ;;  %5249 = vst [vmem:[%s9483_s9 + $0x68] sm:$0xff] %v5225_v52  ;;  %v5753_v28 = vpop.f32.mrb[92].mxu1 }
 0x50a   :  { %v5693_v12 = vpop.f32.mrb[95].mxu0  ;;  %v5754_v61 = vpop.f32.mrb[93].mxu1 }
 0x50b   :  { %v5694_v49 = vadd.f32 %v5693_v12, %v5692_v11  ;;  %v5133_v37 = vadd.f32 %v5691_v47, %v9408_v3  ;;  %v5755_v57 = vadd.f32 %v5754_v61, %v5753_v28  ;;  %v5756_v36 = vpop.f32.mrb[94].mxu1 }
 0x50c   :  { %v5757_v43 = vpop.f32.mrb[95].mxu1 }
 0x50d   :  { %v5136_v25 = vadd.f32 %v5694_v49, %v9408_v3  ;;  %v5230_v58 = vadd.f32 %v5755_v57, %v5133_v37  ;;  %v5758_v54 = vadd.f32 %v5757_v43, %v5756_v36 }
 0x50f   :  { %5250 = vst [vmem:[%s9483_s9 + $0x70] sm:$0xff] %v5230_v58  ;;  %v5233_v9 = vadd.f32 %v5758_v54, %v5136_v25 }
 0x511   :  { %5251 = vst [vmem:[%s9483_s9 + $0x78] sm:$0xff] %v5233_v9 }
 0x512   :  { %5256 = vsyncpa [#allocation3], 1 }
 0x513   :  { %5257 = vsyncpa [#allocation5], 1 }

</bundles_post_ra>
